<compile_context>
chip_gen: v6e
topology: v6e:2x2x1
jax: 0.10.0
libtpu: 0.0.40
codegen_flags: <defaults>
</compile_context>

<pallas_src>
import functools

import jax
import jax.numpy as jnp
from jax.experimental import pallas as pl
from jax.experimental.pallas import tpu as pltpu


# ----------------------------------------------------------------------------
# Tile-size heuristics (simple VMEM budgeting; keeps blocks well under the
# scoped-VMEM defaults of v5e/v6e/v7x without needing vmem_limit_bytes).
# ----------------------------------------------------------------------------
def _pick_tile_cin(cin, cout):
    # Keep the folded (16, Cin, Cout) bf16 weights resident unless they are big;
    # then stream them over a Cin (reduction) grid axis.
    if 16 * cin * cout * 2 <= 16 * 1024 * 1024:
        return cin
    for tc in (256, 128):
        if cin % tc == 0:
            return tc
    return cin


def _pick_tile_h_conv(H, W, tc, cout, elem_bytes, budget=8 * 1024 * 1024):
    best = 1
    for th in range(1, H + 1):
        if H % th:
            continue
        out_blk = 2 * (2 * th) * (2 * W) * cout * elem_bytes   # double-buffered
        in_blk = 2 * (th + 2) * (W + 2) * tc * elem_bytes      # double-buffered
        acc_blk = 4 * th * W * cout * 4                        # f32 scratch
        if out_blk + in_blk + acc_blk <= budget:
            best = th
    return best


def _pick_tile_h_nearest(H, W, C, elem_bytes, budget=8 * 1024 * 1024):
    best = 1
    for th in range(1, H + 1):
        if H % th:
            continue
        blk = 2 * th * W * C * elem_bytes + 2 * (2 * th) * (2 * W) * C * elem_bytes
        if blk <= budget:
            best = th
    return best


# ----------------------------------------------------------------------------
# Kernel 1: nearest-neighbor 2x upsample (use_conv=False path).
# Output layout (N, H, 2, W, 2*C) is row-major identical to (N, 2H, 2W, C).
# ----------------------------------------------------------------------------
def _nearest2x_kernel(x_ref, o_ref):
    # x_ref: (1, TH, W, C)   o_ref: (1, TH, 2, W, 2*C)
    C = x_ref.shape[-1]
    x = x_ref[0]                                   # (TH, W, C)
    for r in range(2):
        for s in range(2):
            # output element (2y+r, 2x+s, c) lives at lane s*C + c of row (y, r, x)
            o_ref[0, :, r, :, pl.ds(s * C, C)] = x


@jax.jit
def nearest_upsample_2x(x_nhwc):
    N, H, W, C = x_nhwc.shape
    th = _pick_tile_h_nearest(H, W, C, x_nhwc.dtype.itemsize)
    hb = H // th
    out = pl.pallas_call(
        _nearest2x_kernel,
        out_shape=jax.ShapeDtypeStruct((N, H, 2, W, 2 * C), x_nhwc.dtype),
        grid=(N, hb),
        in_specs=[pl.BlockSpec((1, th, W, C), lambda n, i: (n, i, 0, 0))],
        out_specs=pl.BlockSpec((1, th, 2, W, 2 * C), lambda n, i: (n, i, 0, 0, 0)),
        compiler_params=pltpu.CompilerParams(
            dimension_semantics=("parallel", "parallel")),
    )(x_nhwc)
    # (N, H, 2, W, 2, C) row-major == (N, 2H, 2W, C): metadata-only reshape.
    return out.reshape(N, 2 * H, 2 * W, C)


# ----------------------------------------------------------------------------
# Kernel 2: fused nearest-2x upsample + 3x3 "same" conv (phase decomposition).
#
#   out[2y+r, 2x+s, :] = sum_{a,b in {0,1}} xp[y+r+a, x+s+b, :] @ K[r,s,a,b]
#
# where xp is the ORIGINAL image zero-padded by 1 pixel and K are the folded
# 3x3 weights (taps that alias the same source pixel are pre-summed host-side).
# ----------------------------------------------------------------------------
def _up2x_conv3x3_kernel(x_ref, w_ref, b_ref, o_ref, acc_ref, *, TH, W, Cout):
    # x_ref  : (1, 1, TH+2, W+2, TC)   input row-tile with 1-px halo (orig dtype)
    # w_ref  : (16, TC, Cout)          folded sub-pixel weights, bf16
    # b_ref  : (1, Cout)               f32 bias
    # o_ref  : (1, TH, 2, W, 2*Cout)   lanes pack [s=0 channels | s=1 channels]
    # acc_ref: (2, 2, TH*W, Cout)      f32 accumulator, carried over the Cin axis
    k = pl.program_id(2)

    @pl.when(k == 0)
    def _init():
        acc_ref[...] = jnp.zeros_like(acc_ref)

    # Iterate the 9 distinct source slabs (ap, bp) = (r+a, s+b).  The column
    # shift bp (sublane-offset slice) is hoisted so it happens 3x per step; the
    # row shift ap is a cheap leading-dim slice of the already-loaded value.
    for bp in range(3):
        xs = x_ref[0, 0, :, pl.ds(bp, W), :].astype(jnp.bfloat16)   # (TH+2, W, TC)
        tc = xs.shape[-1]
        for ap in range(3):
            lhs = xs[ap:ap + TH].reshape(TH * W, tc)                # (TH*W, TC) bf16
            for r in (ap - 1, ap):
                if r < 0 or r > 1:
                    continue
                for s in (bp - 1, bp):
                    if s < 0 or s > 1:
                        continue
                    a, b = ap - r, bp - s
                    widx = ((r * 2 + s) * 2 + a) * 2 + b
                    acc_ref[r, s] += jnp.dot(
                        lhs, w_ref[widx], preferred_element_type=jnp.float32)

    @pl.when(k == pl.num_programs(2) - 1)
    def _finalize():
        bias = b_ref[...]                                           # (1, Cout) f32
        for r in range(2):
            for s in range(2):
                res = (acc_ref[r, s] + bias).reshape(TH, W, Cout)
                o_ref[0, :, r, :, pl.ds(s * Cout, Cout)] = res.astype(o_ref.dtype)


# Row/column tap-folding matrices: FOLD[r, a, dy] == tap dy of the 3x3 kernel
# contributes to the (phase r, 2x2-tap a) folded weight.
_FOLD = jnp.array([[[1, 0, 0], [0, 1, 1]],
                   [[1, 1, 0], [0, 0, 1]]], dtype=jnp.float32)


@jax.jit
def upsample2x_conv3x3(x_nhwc, weight_oihw, bias):
    """Nearest-2x upsample followed by a 3x3 'same' conv, fused in one kernel."""
    N, H, W, Cin = x_nhwc.shape
    Cout = weight_oihw.shape[0]
    out_dtype = x_nhwc.dtype

    tc = _pick_tile_cin(Cin, Cout)
    kb = Cin // tc
    th = _pick_tile_h_conv(H, W, tc, Cout, out_dtype.itemsize)
    hb = H // th
    wp = W + 2

    # ---- host-side prep (fuses under jit; only touches the SMALL input) ----
    # zero-pad by 1 px and gather overlapping row tiles (1-px halo per tile).
    xp = jnp.pad(x_nhwc, ((0, 0), (1, 1), (1, 1), (0, 0)))
    xt = jnp.stack([xp[:, i * th:i * th + th + 2] for i in range(hb)], axis=1)
    # xt: (N, hb, th+2, W+2, Cin)

    # Fold the 3x3 weights into per-(phase, tap) 2x2 weights, bf16 for the MXU:
    #   K[r,s,a,b] = sum_{dy,dx} FOLD[r,a,dy] * FOLD[s,b,dx] * W[dy,dx]
    w_hwio = jnp.transpose(weight_oihw, (2, 3, 1, 0)).astype(jnp.float32)
    wf = jnp.einsum("rad,sbe,deio->rsabio", _FOLD, _FOLD, w_hwio)
    wf = wf.reshape(16, Cin, Cout).astype(jnp.bfloat16)
    b2 = bias.reshape(1, Cout).astype(jnp.float32)

    kern = functools.partial(_up2x_conv3x3_kernel, TH=th, W=W, Cout=Cout)
    out = pl.pallas_call(
        kern,
        out_shape=jax.ShapeDtypeStruct((N, H, 2, W, 2 * Cout), out_dtype),
        grid_spec=pltpu.PrefetchScalarGridSpec(
            num_scalar_prefetch=0,
            grid=(N, hb, kb),
            in_specs=[
                pl.BlockSpec((1, 1, th + 2, wp, tc),
                             lambda n, i, k: (n, i, 0, 0, k)),
                pl.BlockSpec((16, tc, Cout), lambda n, i, k: (0, k, 0)),
                pl.BlockSpec((1, Cout), lambda n, i, k: (0, 0)),
            ],
            out_specs=pl.BlockSpec((1, th, 2, W, 2 * Cout),
                                   lambda n, i, k: (n, i, 0, 0, 0)),
            scratch_shapes=[pltpu.VMEM((2, 2, th * W, Cout), jnp.float32)],
        ),
        compiler_params=pltpu.CompilerParams(
            dimension_semantics=("parallel", "parallel", "arbitrary")),
    )(xt, wf, b2)
    # (N, H, 2, W, 2, Cout) row-major == (N, 2H, 2W, Cout): metadata-only reshape.
    return out.reshape(N, 2 * H, 2 * W, Cout)


# ----------------------------------------------------------------------------
# Module wrapper (mirrors simple_diffusion Upsample2D forward semantics).
# ----------------------------------------------------------------------------
class Upsample2D:
    def __init__(self, channels, use_conv=False, use_conv_transpose=False,
                 out_channels=None, *, key=None, dtype=jnp.float32):
        self.channels = channels
        self.out_channels = out_channels or channels
        self.use_conv = use_conv
        self.use_conv_transpose = use_conv_transpose
        if use_conv_transpose:
            # TODO(synk): ConvTranspose2d(kernel=4, stride=2, padding=1) path not
            # implemented as a Pallas kernel in this script.
            raise NotImplementedError("use_conv_transpose not supported")
        if use_conv:
            if key is None:
                key = jax.random.PRNGKey(42)
            kw, kb = jax.random.split(key)
            # deterministic synthetic init (PyTorch shape: (Cout, Cin, 3, 3))
            self.weight = (0.1 * jax.random.normal(
                kw, (self.out_channels, self.channels, 3, 3))).astype(dtype)
            self.bias = (0.1 * jax.random.normal(
                kb, (self.out_channels,))).astype(dtype)

    def __call__(self, hidden_states, output_size=None):
        # hidden_states: NCHW, like the PyTorch module.
        assert hidden_states.shape[1] == self.channels
        if output_size is not None:
            # TODO(synk): arbitrary `output_size` nearest resize not implemented;
            # only the default scale_factor=2.0 path is supported.
            raise NotImplementedError("output_size override not supported")
        # TODO(synk): the NCHW<->NHWC transposes could be folded into the kernel
        # DMAs; kept as XLA transposes outside the kernel for simplicity.
        x = jnp.transpose(hidden_states, (0, 2, 3, 1))       # NCHW -> NHWC
        if self.use_conv:
            x = upsample2x_conv3x3(x, self.weight, self.bias)
        else:
            x = nearest_upsample_2x(x)
        return jnp.transpose(x, (0, 3, 1, 2))                # NHWC -> NCHW


# ----------------------------------------------------------------------------
# Pure-JAX references for verification.
# ----------------------------------------------------------------------------
def _reference_conv(x_nchw, weight_oihw, bias):
    x = jnp.transpose(x_nchw, (0, 2, 3, 1))
    up = jnp.repeat(jnp.repeat(x, 2, axis=1), 2, axis=2)
    w_hwio = jnp.transpose(weight_oihw, (2, 3, 1, 0))
    y = jax.lax.conv_general_dilated(
        up, w_hwio, window_strides=(1, 1), padding="SAME",
        dimension_numbers=("NHWC", "HWIO", "NHWC"))
    y = y + bias
    return jnp.transpose(y, (0, 3, 1, 2))


def _reference_nearest(x_nchw):
    return jnp.repeat(jnp.repeat(x_nchw, 2, axis=2), 2, axis=3)


if __name__ == "__main__":
    key = jax.random.PRNGKey(0)
    kx, kp = jax.random.split(key)

    N, C, H, W = 2, 4, 16, 16
    x = jax.random.normal(kx, (N, C, H, W), dtype=jnp.float32)

    # conv path (upsample fused with 3x3 conv)
    module = Upsample2D(channels=C, use_conv=True, key=kp)
    out = jax.block_until_ready(module(x))
    assert out.shape == (N, C, 2 * H, 2 * W), out.shape
    ref = jax.block_until_ready(_reference_conv(x, module.weight, module.bias))
    max_err = float(jnp.max(jnp.abs(out - ref)))
    # bf16 matmul operands (f32 accumulation) vs. f32 reference -> relaxed tol.
    assert jnp.allclose(out, ref, atol=5e-2, rtol=5e-2), max_err

    # pure upsample path (exact)
    module_up = Upsample2D(channels=C, use_conv=False)
    out_up = jax.block_until_ready(module_up(x))
    assert out_up.shape == (N, C, 2 * H, 2 * W), out_up.shape
    assert jnp.array_equal(out_up, _reference_nearest(x))

    print("KERNEL_OK")
</pallas_src>

<mosaic_0001>
module attributes {stable_mosaic.version = 11 : i64} {
  func.func @_up2x_conv3x3_kernel(%arg0: i32, %arg1: i32, %arg2: i32, %arg3: memref<1x1x18x18x4xf32, #tpu.memory_space<vmem>>, %arg4: memref<16x4x4xbf16, #tpu.memory_space<vmem>>, %arg5: memref<1x4xf32, #tpu.memory_space<vmem>>, %arg6: memref<1x16x2x16x8xf32, #tpu.memory_space<vmem>>, %arg7: memref<2x2x256x4xf32, #tpu.memory_space<vmem>>) attributes {dimension_semantics = [#tpu.dimension_semantics<parallel>, #tpu.dimension_semantics<parallel>, #tpu.dimension_semantics<arbitrary>], iteration_bounds = array<i64: 2, 1, 1>, scalar_prefetch = 0 : i64, scratch_operands = 1 : i64, tpu.core_type = #tpu.core_type<tc>, window_params = [{transform_indices = @transform_0, window_bounds = array<i64: 1, 1, 18, 18, 4>}, {transform_indices = @transform_1, window_bounds = array<i64: 16, 4, 4>}, {pipeline_mode = #tpu.pipeline_mode<synchronous>, transform_indices = @transform_2, window_bounds = array<i64: 1, 4>}, {transform_indices = @transform_3, window_bounds = array<i64: 1, 16, 2, 16, 8>}]} {
    %c0_i32 = arith.constant 0 : i32
    %0 = arith.cmpi eq, %arg2, %c0_i32 : i32
    %1 = arith.extui %0 : i1 to i32
    %c0_i32_0 = arith.constant 0 : i32
    %2 = arith.cmpi ne, %1, %c0_i32_0 : i32
    scf.if %2 {
      %cst_193 = arith.constant 0.000000e+00 : f32
      %177 = vector.broadcast %cst_193 : f32 to vector<2x2x256x4xf32>
      %c0_194 = arith.constant 0 : index
      %c0_195 = arith.constant 0 : index
      %c0_196 = arith.constant 0 : index
      %c0_197 = arith.constant 0 : index
      %178 = vector.load %arg7[%c0_194, %c0_195, %c0_196, %c0_197] : memref<2x2x256x4xf32, #tpu.memory_space<vmem>>, vector<2x2x256x4xf32>
      tpu.vector_store %arg7[%c0_194, %c0_195, %c0_196, %c0_197], %177 {strides = array<i32>} : memref<2x2x256x4xf32, #tpu.memory_space<vmem>>, vector<2x2x256x4xf32>,
    } else {
    }
    %c0 = arith.constant 0 : index
    %c0_1 = arith.constant 0 : index
    %c0_2 = arith.constant 0 : index
    %c0_3 = arith.constant 0 : index
    %c0_4 = arith.constant 0 : index
    %3 = vector.load %arg3[%c0, %c0_1, %c0_2, %c0_3, %c0_4] : memref<1x1x18x18x4xf32, #tpu.memory_space<vmem>>, vector<1x1x18x16x4xf32>
    %4 = vector.shape_cast %3 : vector<1x1x18x16x4xf32> to vector<18x16x4xf32>
    %5 = arith.truncf %4 : vector<18x16x4xf32> to vector<18x16x4xbf16>
    %6 = vector.extract_strided_slice %5 {offsets = [0, 0, 0], sizes = [16, 16, 4], strides = [1, 1, 1]} : vector<18x16x4xbf16> to vector<16x16x4xbf16>
    %7 = vector.shape_cast %6 : vector<16x16x4xbf16> to vector<256x4xbf16>
    %c0_5 = arith.constant 0 : index
    %c0_6 = arith.constant 0 : index
    %c0_7 = arith.constant 0 : index
    %c0_8 = arith.constant 0 : index
    %8 = vector.load %arg7[%c0_5, %c0_6, %c0_7, %c0_8] : memref<2x2x256x4xf32, #tpu.memory_space<vmem>>, vector<1x1x256x4xf32>
    %9 = vector.shape_cast %8 : vector<1x1x256x4xf32> to vector<256x4xf32>
    %c0_9 = arith.constant 0 : index
    %c0_10 = arith.constant 0 : index
    %c0_11 = arith.constant 0 : index
    %10 = vector.load %arg4[%c0_9, %c0_10, %c0_11] : memref<16x4x4xbf16, #tpu.memory_space<vmem>>, vector<1x4x4xbf16>
    %11 = vector.shape_cast %10 : vector<1x4x4xbf16> to vector<4x4xbf16>
    %cst = arith.constant dense<0.000000e+00> : vector<256x4xf32>
    %12 = tpu.matmul %7, %11, %cst {dimension_numbers = #tpu.dot_dimension_numbers<[1], [0], [0], [1], [0, 0, 1, 1], [], []>} : vector<256x4xbf16>, vector<4x4xbf16>, vector<256x4xf32> -> vector<256x4xf32>
    %13 = arith.addf %9, %12 : vector<256x4xf32>
    %c0_12 = arith.constant 0 : index
    %c0_13 = arith.constant 0 : index
    %c0_14 = arith.constant 0 : index
    %c0_15 = arith.constant 0 : index
    %14 = vector.load %arg7[%c0_12, %c0_13, %c0_14, %c0_15] : memref<2x2x256x4xf32, #tpu.memory_space<vmem>>, vector<1x1x256x4xf32>
    %15 = vector.shape_cast %14 : vector<1x1x256x4xf32> to vector<256x4xf32>
    %16 = vector.shape_cast %13 : vector<256x4xf32> to vector<1x1x256x4xf32>
    tpu.vector_store %arg7[%c0_12, %c0_13, %c0_14, %c0_15], %16 {strides = array<i32>} : memref<2x2x256x4xf32, #tpu.memory_space<vmem>>, vector<1x1x256x4xf32>,
    %17 = vector.extract_strided_slice %5 {offsets = [1, 0, 0], sizes = [16, 16, 4], strides = [1, 1, 1]} : vector<18x16x4xbf16> to vector<16x16x4xbf16>
    %18 = vector.shape_cast %17 : vector<16x16x4xbf16> to vector<256x4xbf16>
    %c0_16 = arith.constant 0 : index
    %c0_17 = arith.constant 0 : index
    %c0_18 = arith.constant 0 : index
    %c0_19 = arith.constant 0 : index
    %19 = vector.load %arg7[%c0_16, %c0_17, %c0_18, %c0_19] : memref<2x2x256x4xf32, #tpu.memory_space<vmem>>, vector<1x1x256x4xf32>
    %20 = vector.shape_cast %19 : vector<1x1x256x4xf32> to vector<256x4xf32>
    %c2 = arith.constant 2 : index
    %c0_20 = arith.constant 0 : index
    %c0_21 = arith.constant 0 : index
    %21 = vector.load %arg4[%c2, %c0_20, %c0_21] : memref<16x4x4xbf16, #tpu.memory_space<vmem>>, vector<1x4x4xbf16>
    %22 = vector.shape_cast %21 : vector<1x4x4xbf16> to vector<4x4xbf16>
    %cst_22 = arith.constant dense<0.000000e+00> : vector<256x4xf32>
    %23 = tpu.matmul %18, %22, %cst_22 {dimension_numbers = #tpu.dot_dimension_numbers<[1], [0], [0], [1], [0, 0, 1, 1], [], []>} : vector<256x4xbf16>, vector<4x4xbf16>, vector<256x4xf32> -> vector<256x4xf32>
    %24 = arith.addf %20, %23 : vector<256x4xf32>
    %c0_23 = arith.constant 0 : index
    %c0_24 = arith.constant 0 : index
    %c0_25 = arith.constant 0 : index
    %c0_26 = arith.constant 0 : index
    %25 = vector.load %arg7[%c0_23, %c0_24, %c0_25, %c0_26] : memref<2x2x256x4xf32, #tpu.memory_space<vmem>>, vector<1x1x256x4xf32>
    %26 = vector.shape_cast %25 : vector<1x1x256x4xf32> to vector<256x4xf32>
    %27 = vector.shape_cast %24 : vector<256x4xf32> to vector<1x1x256x4xf32>
    tpu.vector_store %arg7[%c0_23, %c0_24, %c0_25, %c0_26], %27 {strides = array<i32>} : memref<2x2x256x4xf32, #tpu.memory_space<vmem>>, vector<1x1x256x4xf32>,
    %c1 = arith.constant 1 : index
    %c0_27 = arith.constant 0 : index
    %c0_28 = arith.constant 0 : index
    %c0_29 = arith.constant 0 : index
    %28 = vector.load %arg7[%c1, %c0_27, %c0_28, %c0_29] : memref<2x2x256x4xf32, #tpu.memory_space<vmem>>, vector<1x1x256x4xf32>
    %29 = vector.shape_cast %28 : vector<1x1x256x4xf32> to vector<256x4xf32>
    %c8 = arith.constant 8 : index
    %c0_30 = arith.constant 0 : index
    %c0_31 = arith.constant 0 : index
    %30 = vector.load %arg4[%c8, %c0_30, %c0_31] : memref<16x4x4xbf16, #tpu.memory_space<vmem>>, vector<1x4x4xbf16>
    %31 = vector.shape_cast %30 : vector<1x4x4xbf16> to vector<4x4xbf16>
    %cst_32 = arith.constant dense<0.000000e+00> : vector<256x4xf32>
    %32 = tpu.matmul %18, %31, %cst_32 {dimension_numbers = #tpu.dot_dimension_numbers<[1], [0], [0], [1], [0, 0, 1, 1], [], []>} : vector<256x4xbf16>, vector<4x4xbf16>, vector<256x4xf32> -> vector<256x4xf32>
    %33 = arith.addf %29, %32 : vector<256x4xf32>
    %c1_33 = arith.constant 1 : index
    %c0_34 = arith.constant 0 : index
    %c0_35 = arith.constant 0 : index
    %c0_36 = arith.constant 0 : index
    %34 = vector.load %arg7[%c1_33, %c0_34, %c0_35, %c0_36] : memref<2x2x256x4xf32, #tpu.memory_space<vmem>>, vector<1x1x256x4xf32>
    %35 = vector.shape_cast %34 : vector<1x1x256x4xf32> to vector<256x4xf32>
    %36 = vector.shape_cast %33 : vector<256x4xf32> to vector<1x1x256x4xf32>
    tpu.vector_store %arg7[%c1_33, %c0_34, %c0_35, %c0_36], %36 {strides = array<i32>} : memref<2x2x256x4xf32, #tpu.memory_space<vmem>>, vector<1x1x256x4xf32>,
    %37 = vector.extract_strided_slice %5 {offsets = [2, 0, 0], sizes = [16, 16, 4], strides = [1, 1, 1]} : vector<18x16x4xbf16> to vector<16x16x4xbf16>
    %38 = vector.shape_cast %37 : vector<16x16x4xbf16> to vector<256x4xbf16>
    %c1_37 = arith.constant 1 : index
    %c0_38 = arith.constant 0 : index
    %c0_39 = arith.constant 0 : index
    %c0_40 = arith.constant 0 : index
    %39 = vector.load %arg7[%c1_37, %c0_38, %c0_39, %c0_40] : memref<2x2x256x4xf32, #tpu.memory_space<vmem>>, vector<1x1x256x4xf32>
    %40 = vector.shape_cast %39 : vector<1x1x256x4xf32> to vector<256x4xf32>
    %c10 = arith.constant 10 : index
    %c0_41 = arith.constant 0 : index
    %c0_42 = arith.constant 0 : index
    %41 = vector.load %arg4[%c10, %c0_41, %c0_42] : memref<16x4x4xbf16, #tpu.memory_space<vmem>>, vector<1x4x4xbf16>
    %42 = vector.shape_cast %41 : vector<1x4x4xbf16> to vector<4x4xbf16>
    %cst_43 = arith.constant dense<0.000000e+00> : vector<256x4xf32>
    %43 = tpu.matmul %38, %42, %cst_43 {dimension_numbers = #tpu.dot_dimension_numbers<[1], [0], [0], [1], [0, 0, 1, 1], [], []>} : vector<256x4xbf16>, vector<4x4xbf16>, vector<256x4xf32> -> vector<256x4xf32>
    %44 = arith.addf %40, %43 : vector<256x4xf32>
    %c1_44 = arith.constant 1 : index
    %c0_45 = arith.constant 0 : index
    %c0_46 = arith.constant 0 : index
    %c0_47 = arith.constant 0 : index
    %45 = vector.load %arg7[%c1_44, %c0_45, %c0_46, %c0_47] : memref<2x2x256x4xf32, #tpu.memory_space<vmem>>, vector<1x1x256x4xf32>
    %46 = vector.shape_cast %45 : vector<1x1x256x4xf32> to vector<256x4xf32>
    %47 = vector.shape_cast %44 : vector<256x4xf32> to vector<1x1x256x4xf32>
    tpu.vector_store %arg7[%c1_44, %c0_45, %c0_46, %c0_47], %47 {strides = array<i32>} : memref<2x2x256x4xf32, #tpu.memory_space<vmem>>, vector<1x1x256x4xf32>,
    %c0_48 = arith.constant 0 : index
    %c0_49 = arith.constant 0 : index
    %c0_50 = arith.constant 0 : index
    %c1_51 = arith.constant 1 : index
    %c0_52 = arith.constant 0 : index
    %48 = vector.load %arg3[%c0_48, %c0_49, %c0_50, %c1_51, %c0_52] : memref<1x1x18x18x4xf32, #tpu.memory_space<vmem>>, vector<1x1x18x16x4xf32>
    %49 = vector.shape_cast %48 : vector<1x1x18x16x4xf32> to vector<18x16x4xf32>
    %50 = arith.truncf %49 : vector<18x16x4xf32> to vector<18x16x4xbf16>
    %51 = vector.extract_strided_slice %50 {offsets = [0, 0, 0], sizes = [16, 16, 4], strides = [1, 1, 1]} : vector<18x16x4xbf16> to vector<16x16x4xbf16>
    %52 = vector.shape_cast %51 : vector<16x16x4xbf16> to vector<256x4xbf16>
    %c0_53 = arith.constant 0 : index
    %c0_54 = arith.constant 0 : index
    %c0_55 = arith.constant 0 : index
    %c0_56 = arith.constant 0 : index
    %53 = vector.load %arg7[%c0_53, %c0_54, %c0_55, %c0_56] : memref<2x2x256x4xf32, #tpu.memory_space<vmem>>, vector<1x1x256x4xf32>
    %54 = vector.shape_cast %53 : vector<1x1x256x4xf32> to vector<256x4xf32>
    %c1_57 = arith.constant 1 : index
    %c0_58 = arith.constant 0 : index
    %c0_59 = arith.constant 0 : index
    %55 = vector.load %arg4[%c1_57, %c0_58, %c0_59] : memref<16x4x4xbf16, #tpu.memory_space<vmem>>, vector<1x4x4xbf16>
    %56 = vector.shape_cast %55 : vector<1x4x4xbf16> to vector<4x4xbf16>
    %cst_60 = arith.constant dense<0.000000e+00> : vector<256x4xf32>
    %57 = tpu.matmul %52, %56, %cst_60 {dimension_numbers = #tpu.dot_dimension_numbers<[1], [0], [0], [1], [0, 0, 1, 1], [], []>} : vector<256x4xbf16>, vector<4x4xbf16>, vector<256x4xf32> -> vector<256x4xf32>
    %58 = arith.addf %54, %57 : vector<256x4xf32>
    %c0_61 = arith.constant 0 : index
    %c0_62 = arith.constant 0 : index
    %c0_63 = arith.constant 0 : index
    %c0_64 = arith.constant 0 : index
    %59 = vector.load %arg7[%c0_61, %c0_62, %c0_63, %c0_64] : memref<2x2x256x4xf32, #tpu.memory_space<vmem>>, vector<1x1x256x4xf32>
    %60 = vector.shape_cast %59 : vector<1x1x256x4xf32> to vector<256x4xf32>
    %61 = vector.shape_cast %58 : vector<256x4xf32> to vector<1x1x256x4xf32>
    tpu.vector_store %arg7[%c0_61, %c0_62, %c0_63, %c0_64], %61 {strides = array<i32>} : memref<2x2x256x4xf32, #tpu.memory_space<vmem>>, vector<1x1x256x4xf32>,
    %c0_65 = arith.constant 0 : index
    %c1_66 = arith.constant 1 : index
    %c0_67 = arith.constant 0 : index
    %c0_68 = arith.constant 0 : index
    %62 = vector.load %arg7[%c0_65, %c1_66, %c0_67, %c0_68] : memref<2x2x256x4xf32, #tpu.memory_space<vmem>>, vector<1x1x256x4xf32>
    %63 = vector.shape_cast %62 : vector<1x1x256x4xf32> to vector<256x4xf32>
    %c4 = arith.constant 4 : index
    %c0_69 = arith.constant 0 : index
    %c0_70 = arith.constant 0 : index
    %64 = vector.load %arg4[%c4, %c0_69, %c0_70] : memref<16x4x4xbf16, #tpu.memory_space<vmem>>, vector<1x4x4xbf16>
    %65 = vector.shape_cast %64 : vector<1x4x4xbf16> to vector<4x4xbf16>
    %cst_71 = arith.constant dense<0.000000e+00> : vector<256x4xf32>
    %66 = tpu.matmul %52, %65, %cst_71 {dimension_numbers = #tpu.dot_dimension_numbers<[1], [0], [0], [1], [0, 0, 1, 1], [], []>} : vector<256x4xbf16>, vector<4x4xbf16>, vector<256x4xf32> -> vector<256x4xf32>
    %67 = arith.addf %63, %66 : vector<256x4xf32>
    %c0_72 = arith.constant 0 : index
    %c1_73 = arith.constant 1 : index
    %c0_74 = arith.constant 0 : index
    %c0_75 = arith.constant 0 : index
    %68 = vector.load %arg7[%c0_72, %c1_73, %c0_74, %c0_75] : memref<2x2x256x4xf32, #tpu.memory_space<vmem>>, vector<1x1x256x4xf32>
    %69 = vector.shape_cast %68 : vector<1x1x256x4xf32> to vector<256x4xf32>
    %70 = vector.shape_cast %67 : vector<256x4xf32> to vector<1x1x256x4xf32>
    tpu.vector_store %arg7[%c0_72, %c1_73, %c0_74, %c0_75], %70 {strides = array<i32>} : memref<2x2x256x4xf32, #tpu.memory_space<vmem>>, vector<1x1x256x4xf32>,
    %71 = vector.extract_strided_slice %50 {offsets = [1, 0, 0], sizes = [16, 16, 4], strides = [1, 1, 1]} : vector<18x16x4xbf16> to vector<16x16x4xbf16>
    %72 = vector.shape_cast %71 : vector<16x16x4xbf16> to vector<256x4xbf16>
    %c0_76 = arith.constant 0 : index
    %c0_77 = arith.constant 0 : index
    %c0_78 = arith.constant 0 : index
    %c0_79 = arith.constant 0 : index
    %73 = vector.load %arg7[%c0_76, %c0_77, %c0_78, %c0_79] : memref<2x2x256x4xf32, #tpu.memory_space<vmem>>, vector<1x1x256x4xf32>
    %74 = vector.shape_cast %73 : vector<1x1x256x4xf32> to vector<256x4xf32>
    %c3 = arith.constant 3 : index
    %c0_80 = arith.constant 0 : index
    %c0_81 = arith.constant 0 : index
    %75 = vector.load %arg4[%c3, %c0_80, %c0_81] : memref<16x4x4xbf16, #tpu.memory_space<vmem>>, vector<1x4x4xbf16>
    %76 = vector.shape_cast %75 : vector<1x4x4xbf16> to vector<4x4xbf16>
    %cst_82 = arith.constant dense<0.000000e+00> : vector<256x4xf32>
    %77 = tpu.matmul %72, %76, %cst_82 {dimension_numbers = #tpu.dot_dimension_numbers<[1], [0], [0], [1], [0, 0, 1, 1], [], []>} : vector<256x4xbf16>, vector<4x4xbf16>, vector<256x4xf32> -> vector<256x4xf32>
    %78 = arith.addf %74, %77 : vector<256x4xf32>
    %c0_83 = arith.constant 0 : index
    %c0_84 = arith.constant 0 : index
    %c0_85 = arith.constant 0 : index
    %c0_86 = arith.constant 0 : index
    %79 = vector.load %arg7[%c0_83, %c0_84, %c0_85, %c0_86] : memref<2x2x256x4xf32, #tpu.memory_space<vmem>>, vector<1x1x256x4xf32>
    %80 = vector.shape_cast %79 : vector<1x1x256x4xf32> to vector<256x4xf32>
    %81 = vector.shape_cast %78 : vector<256x4xf32> to vector<1x1x256x4xf32>
    tpu.vector_store %arg7[%c0_83, %c0_84, %c0_85, %c0_86], %81 {strides = array<i32>} : memref<2x2x256x4xf32, #tpu.memory_space<vmem>>, vector<1x1x256x4xf32>,
    %c0_87 = arith.constant 0 : index
    %c1_88 = arith.constant 1 : index
    %c0_89 = arith.constant 0 : index
    %c0_90 = arith.constant 0 : index
    %82 = vector.load %arg7[%c0_87, %c1_88, %c0_89, %c0_90] : memref<2x2x256x4xf32, #tpu.memory_space<vmem>>, vector<1x1x256x4xf32>
    %83 = vector.shape_cast %82 : vector<1x1x256x4xf32> to vector<256x4xf32>
    %c6 = arith.constant 6 : index
    %c0_91 = arith.constant 0 : index
    %c0_92 = arith.constant 0 : index
    %84 = vector.load %arg4[%c6, %c0_91, %c0_92] : memref<16x4x4xbf16, #tpu.memory_space<vmem>>, vector<1x4x4xbf16>
    %85 = vector.shape_cast %84 : vector<1x4x4xbf16> to vector<4x4xbf16>
    %cst_93 = arith.constant dense<0.000000e+00> : vector<256x4xf32>
    %86 = tpu.matmul %72, %85, %cst_93 {dimension_numbers = #tpu.dot_dimension_numbers<[1], [0], [0], [1], [0, 0, 1, 1], [], []>} : vector<256x4xbf16>, vector<4x4xbf16>, vector<256x4xf32> -> vector<256x4xf32>
    %87 = arith.addf %83, %86 : vector<256x4xf32>
    %c0_94 = arith.constant 0 : index
    %c1_95 = arith.constant 1 : index
    %c0_96 = arith.constant 0 : index
    %c0_97 = arith.constant 0 : index
    %88 = vector.load %arg7[%c0_94, %c1_95, %c0_96, %c0_97] : memref<2x2x256x4xf32, #tpu.memory_space<vmem>>, vector<1x1x256x4xf32>
    %89 = vector.shape_cast %88 : vector<1x1x256x4xf32> to vector<256x4xf32>
    %90 = vector.shape_cast %87 : vector<256x4xf32> to vector<1x1x256x4xf32>
    tpu.vector_store %arg7[%c0_94, %c1_95, %c0_96, %c0_97], %90 {strides = array<i32>} : memref<2x2x256x4xf32, #tpu.memory_space<vmem>>, vector<1x1x256x4xf32>,
    %c1_98 = arith.constant 1 : index
    %c0_99 = arith.constant 0 : index
    %c0_100 = arith.constant 0 : index
    %c0_101 = arith.constant 0 : index
    %91 = vector.load %arg7[%c1_98, %c0_99, %c0_100, %c0_101] : memref<2x2x256x4xf32, #tpu.memory_space<vmem>>, vector<1x1x256x4xf32>
    %92 = vector.shape_cast %91 : vector<1x1x256x4xf32> to vector<256x4xf32>
    %c9 = arith.constant 9 : index
    %c0_102 = arith.constant 0 : index
    %c0_103 = arith.constant 0 : index
    %93 = vector.load %arg4[%c9, %c0_102, %c0_103] : memref<16x4x4xbf16, #tpu.memory_space<vmem>>, vector<1x4x4xbf16>
    %94 = vector.shape_cast %93 : vector<1x4x4xbf16> to vector<4x4xbf16>
    %cst_104 = arith.constant dense<0.000000e+00> : vector<256x4xf32>
    %95 = tpu.matmul %72, %94, %cst_104 {dimension_numbers = #tpu.dot_dimension_numbers<[1], [0], [0], [1], [0, 0, 1, 1], [], []>} : vector<256x4xbf16>, vector<4x4xbf16>, vector<256x4xf32> -> vector<256x4xf32>
    %96 = arith.addf %92, %95 : vector<256x4xf32>
    %c1_105 = arith.constant 1 : index
    %c0_106 = arith.constant 0 : index
    %c0_107 = arith.constant 0 : index
    %c0_108 = arith.constant 0 : index
    %97 = vector.load %arg7[%c1_105, %c0_106, %c0_107, %c0_108] : memref<2x2x256x4xf32, #tpu.memory_space<vmem>>, vector<1x1x256x4xf32>
    %98 = vector.shape_cast %97 : vector<1x1x256x4xf32> to vector<256x4xf32>
    %99 = vector.shape_cast %96 : vector<256x4xf32> to vector<1x1x256x4xf32>
    tpu.vector_store %arg7[%c1_105, %c0_106, %c0_107, %c0_108], %99 {strides = array<i32>} : memref<2x2x256x4xf32, #tpu.memory_space<vmem>>, vector<1x1x256x4xf32>,
    %c1_109 = arith.constant 1 : index
    %c1_110 = arith.constant 1 : index
    %c0_111 = arith.constant 0 : index
    %c0_112 = arith.constant 0 : index
    %100 = vector.load %arg7[%c1_109, %c1_110, %c0_111, %c0_112] : memref<2x2x256x4xf32, #tpu.memory_space<vmem>>, vector<1x1x256x4xf32>
    %101 = vector.shape_cast %100 : vector<1x1x256x4xf32> to vector<256x4xf32>
    %c12 = arith.constant 12 : index
    %c0_113 = arith.constant 0 : index
    %c0_114 = arith.constant 0 : index
    %102 = vector.load %arg4[%c12, %c0_113, %c0_114] : memref<16x4x4xbf16, #tpu.memory_space<vmem>>, vector<1x4x4xbf16>
    %103 = vector.shape_cast %102 : vector<1x4x4xbf16> to vector<4x4xbf16>
    %cst_115 = arith.constant dense<0.000000e+00> : vector<256x4xf32>
    %104 = tpu.matmul %72, %103, %cst_115 {dimension_numbers = #tpu.dot_dimension_numbers<[1], [0], [0], [1], [0, 0, 1, 1], [], []>} : vector<256x4xbf16>, vector<4x4xbf16>, vector<256x4xf32> -> vector<256x4xf32>
    %105 = arith.addf %101, %104 : vector<256x4xf32>
    %c1_116 = arith.constant 1 : index
    %c1_117 = arith.constant 1 : index
    %c0_118 = arith.constant 0 : index
    %c0_119 = arith.constant 0 : index
    %106 = vector.load %arg7[%c1_116, %c1_117, %c0_118, %c0_119] : memref<2x2x256x4xf32, #tpu.memory_space<vmem>>, vector<1x1x256x4xf32>
    %107 = vector.shape_cast %106 : vector<1x1x256x4xf32> to vector<256x4xf32>
    %108 = vector.shape_cast %105 : vector<256x4xf32> to vector<1x1x256x4xf32>
    tpu.vector_store %arg7[%c1_116, %c1_117, %c0_118, %c0_119], %108 {strides = array<i32>} : memref<2x2x256x4xf32, #tpu.memory_space<vmem>>, vector<1x1x256x4xf32>,
    %109 = vector.extract_strided_slice %50 {offsets = [2, 0, 0], sizes = [16, 16, 4], strides = [1, 1, 1]} : vector<18x16x4xbf16> to vector<16x16x4xbf16>
    %110 = vector.shape_cast %109 : vector<16x16x4xbf16> to vector<256x4xbf16>
    %c1_120 = arith.constant 1 : index
    %c0_121 = arith.constant 0 : index
    %c0_122 = arith.constant 0 : index
    %c0_123 = arith.constant 0 : index
    %111 = vector.load %arg7[%c1_120, %c0_121, %c0_122, %c0_123] : memref<2x2x256x4xf32, #tpu.memory_space<vmem>>, vector<1x1x256x4xf32>
    %112 = vector.shape_cast %111 : vector<1x1x256x4xf32> to vector<256x4xf32>
    %c11 = arith.constant 11 : index
    %c0_124 = arith.constant 0 : index
    %c0_125 = arith.constant 0 : index
    %113 = vector.load %arg4[%c11, %c0_124, %c0_125] : memref<16x4x4xbf16, #tpu.memory_space<vmem>>, vector<1x4x4xbf16>
    %114 = vector.shape_cast %113 : vector<1x4x4xbf16> to vector<4x4xbf16>
    %cst_126 = arith.constant dense<0.000000e+00> : vector<256x4xf32>
    %115 = tpu.matmul %110, %114, %cst_126 {dimension_numbers = #tpu.dot_dimension_numbers<[1], [0], [0], [1], [0, 0, 1, 1], [], []>} : vector<256x4xbf16>, vector<4x4xbf16>, vector<256x4xf32> -> vector<256x4xf32>
    %116 = arith.addf %112, %115 : vector<256x4xf32>
    %c1_127 = arith.constant 1 : index
    %c0_128 = arith.constant 0 : index
    %c0_129 = arith.constant 0 : index
    %c0_130 = arith.constant 0 : index
    %117 = vector.load %arg7[%c1_127, %c0_128, %c0_129, %c0_130] : memref<2x2x256x4xf32, #tpu.memory_space<vmem>>, vector<1x1x256x4xf32>
    %118 = vector.shape_cast %117 : vector<1x1x256x4xf32> to vector<256x4xf32>
    %119 = vector.shape_cast %116 : vector<256x4xf32> to vector<1x1x256x4xf32>
    tpu.vector_store %arg7[%c1_127, %c0_128, %c0_129, %c0_130], %119 {strides = array<i32>} : memref<2x2x256x4xf32, #tpu.memory_space<vmem>>, vector<1x1x256x4xf32>,
    %c1_131 = arith.constant 1 : index
    %c1_132 = arith.constant 1 : index
    %c0_133 = arith.constant 0 : index
    %c0_134 = arith.constant 0 : index
    %120 = vector.load %arg7[%c1_131, %c1_132, %c0_133, %c0_134] : memref<2x2x256x4xf32, #tpu.memory_space<vmem>>, vector<1x1x256x4xf32>
    %121 = vector.shape_cast %120 : vector<1x1x256x4xf32> to vector<256x4xf32>
    %c14 = arith.constant 14 : index
    %c0_135 = arith.constant 0 : index
    %c0_136 = arith.constant 0 : index
    %122 = vector.load %arg4[%c14, %c0_135, %c0_136] : memref<16x4x4xbf16, #tpu.memory_space<vmem>>, vector<1x4x4xbf16>
    %123 = vector.shape_cast %122 : vector<1x4x4xbf16> to vector<4x4xbf16>
    %cst_137 = arith.constant dense<0.000000e+00> : vector<256x4xf32>
    %124 = tpu.matmul %110, %123, %cst_137 {dimension_numbers = #tpu.dot_dimension_numbers<[1], [0], [0], [1], [0, 0, 1, 1], [], []>} : vector<256x4xbf16>, vector<4x4xbf16>, vector<256x4xf32> -> vector<256x4xf32>
    %125 = arith.addf %121, %124 : vector<256x4xf32>
    %c1_138 = arith.constant 1 : index
    %c1_139 = arith.constant 1 : index
    %c0_140 = arith.constant 0 : index
    %c0_141 = arith.constant 0 : index
    %126 = vector.load %arg7[%c1_138, %c1_139, %c0_140, %c0_141] : memref<2x2x256x4xf32, #tpu.memory_space<vmem>>, vector<1x1x256x4xf32>
    %127 = vector.shape_cast %126 : vector<1x1x256x4xf32> to vector<256x4xf32>
    %128 = vector.shape_cast %125 : vector<256x4xf32> to vector<1x1x256x4xf32>
    tpu.vector_store %arg7[%c1_138, %c1_139, %c0_140, %c0_141], %128 {strides = array<i32>} : memref<2x2x256x4xf32, #tpu.memory_space<vmem>>, vector<1x1x256x4xf32>,
    %c0_142 = arith.constant 0 : index
    %c0_143 = arith.constant 0 : index
    %c0_144 = arith.constant 0 : index
    %c2_145 = arith.constant 2 : index
    %c0_146 = arith.constant 0 : index
    %129 = vector.load %arg3[%c0_142, %c0_143, %c0_144, %c2_145, %c0_146] : memref<1x1x18x18x4xf32, #tpu.memory_space<vmem>>, vector<1x1x18x16x4xf32>
    %130 = vector.shape_cast %129 : vector<1x1x18x16x4xf32> to vector<18x16x4xf32>
    %131 = arith.truncf %130 : vector<18x16x4xf32> to vector<18x16x4xbf16>
    %132 = vector.extract_strided_slice %131 {offsets = [0, 0, 0], sizes = [16, 16, 4], strides = [1, 1, 1]} : vector<18x16x4xbf16> to vector<16x16x4xbf16>
    %133 = vector.shape_cast %132 : vector<16x16x4xbf16> to vector<256x4xbf16>
    %c0_147 = arith.constant 0 : index
    %c1_148 = arith.constant 1 : index
    %c0_149 = arith.constant 0 : index
    %c0_150 = arith.constant 0 : index
    %134 = vector.load %arg7[%c0_147, %c1_148, %c0_149, %c0_150] : memref<2x2x256x4xf32, #tpu.memory_space<vmem>>, vector<1x1x256x4xf32>
    %135 = vector.shape_cast %134 : vector<1x1x256x4xf32> to vector<256x4xf32>
    %c5 = arith.constant 5 : index
    %c0_151 = arith.constant 0 : index
    %c0_152 = arith.constant 0 : index
    %136 = vector.load %arg4[%c5, %c0_151, %c0_152] : memref<16x4x4xbf16, #tpu.memory_space<vmem>>, vector<1x4x4xbf16>
    %137 = vector.shape_cast %136 : vector<1x4x4xbf16> to vector<4x4xbf16>
    %cst_153 = arith.constant dense<0.000000e+00> : vector<256x4xf32>
    %138 = tpu.matmul %133, %137, %cst_153 {dimension_numbers = #tpu.dot_dimension_numbers<[1], [0], [0], [1], [0, 0, 1, 1], [], []>} : vector<256x4xbf16>, vector<4x4xbf16>, vector<256x4xf32> -> vector<256x4xf32>
    %139 = arith.addf %135, %138 : vector<256x4xf32>
    %c0_154 = arith.constant 0 : index
    %c1_155 = arith.constant 1 : index
    %c0_156 = arith.constant 0 : index
    %c0_157 = arith.constant 0 : index
    %140 = vector.load %arg7[%c0_154, %c1_155, %c0_156, %c0_157] : memref<2x2x256x4xf32, #tpu.memory_space<vmem>>, vector<1x1x256x4xf32>
    %141 = vector.shape_cast %140 : vector<1x1x256x4xf32> to vector<256x4xf32>
    %142 = vector.shape_cast %139 : vector<256x4xf32> to vector<1x1x256x4xf32>
    tpu.vector_store %arg7[%c0_154, %c1_155, %c0_156, %c0_157], %142 {strides = array<i32>} : memref<2x2x256x4xf32, #tpu.memory_space<vmem>>, vector<1x1x256x4xf32>,
    %143 = vector.extract_strided_slice %131 {offsets = [1, 0, 0], sizes = [16, 16, 4], strides = [1, 1, 1]} : vector<18x16x4xbf16> to vector<16x16x4xbf16>
    %144 = vector.shape_cast %143 : vector<16x16x4xbf16> to vector<256x4xbf16>
    %c0_158 = arith.constant 0 : index
    %c1_159 = arith.constant 1 : index
    %c0_160 = arith.constant 0 : index
    %c0_161 = arith.constant 0 : index
    %145 = vector.load %arg7[%c0_158, %c1_159, %c0_160, %c0_161] : memref<2x2x256x4xf32, #tpu.memory_space<vmem>>, vector<1x1x256x4xf32>
    %146 = vector.shape_cast %145 : vector<1x1x256x4xf32> to vector<256x4xf32>
    %c7 = arith.constant 7 : index
    %c0_162 = arith.constant 0 : index
    %c0_163 = arith.constant 0 : index
    %147 = vector.load %arg4[%c7, %c0_162, %c0_163] : memref<16x4x4xbf16, #tpu.memory_space<vmem>>, vector<1x4x4xbf16>
    %148 = vector.shape_cast %147 : vector<1x4x4xbf16> to vector<4x4xbf16>
    %cst_164 = arith.constant dense<0.000000e+00> : vector<256x4xf32>
    %149 = tpu.matmul %144, %148, %cst_164 {dimension_numbers = #tpu.dot_dimension_numbers<[1], [0], [0], [1], [0, 0, 1, 1], [], []>} : vector<256x4xbf16>, vector<4x4xbf16>, vector<256x4xf32> -> vector<256x4xf32>
    %150 = arith.addf %146, %149 : vector<256x4xf32>
    %c0_165 = arith.constant 0 : index
    %c1_166 = arith.constant 1 : index
    %c0_167 = arith.constant 0 : index
    %c0_168 = arith.constant 0 : index
    %151 = vector.load %arg7[%c0_165, %c1_166, %c0_167, %c0_168] : memref<2x2x256x4xf32, #tpu.memory_space<vmem>>, vector<1x1x256x4xf32>
    %152 = vector.shape_cast %151 : vector<1x1x256x4xf32> to vector<256x4xf32>
    %153 = vector.shape_cast %150 : vector<256x4xf32> to vector<1x1x256x4xf32>
    tpu.vector_store %arg7[%c0_165, %c1_166, %c0_167, %c0_168], %153 {strides = array<i32>} : memref<2x2x256x4xf32, #tpu.memory_space<vmem>>, vector<1x1x256x4xf32>,
    %c1_169 = arith.constant 1 : index
    %c1_170 = arith.constant 1 : index
    %c0_171 = arith.constant 0 : index
    %c0_172 = arith.constant 0 : index
    %154 = vector.load %arg7[%c1_169, %c1_170, %c0_171, %c0_172] : memref<2x2x256x4xf32, #tpu.memory_space<vmem>>, vector<1x1x256x4xf32>
    %155 = vector.shape_cast %154 : vector<1x1x256x4xf32> to vector<256x4xf32>
    %c13 = arith.constant 13 : index
    %c0_173 = arith.constant 0 : index
    %c0_174 = arith.constant 0 : index
    %156 = vector.load %arg4[%c13, %c0_173, %c0_174] : memref<16x4x4xbf16, #tpu.memory_space<vmem>>, vector<1x4x4xbf16>
    %157 = vector.shape_cast %156 : vector<1x4x4xbf16> to vector<4x4xbf16>
    %cst_175 = arith.constant dense<0.000000e+00> : vector<256x4xf32>
    %158 = tpu.matmul %144, %157, %cst_175 {dimension_numbers = #tpu.dot_dimension_numbers<[1], [0], [0], [1], [0, 0, 1, 1], [], []>} : vector<256x4xbf16>, vector<4x4xbf16>, vector<256x4xf32> -> vector<256x4xf32>
    %159 = arith.addf %155, %158 : vector<256x4xf32>
    %c1_176 = arith.constant 1 : index
    %c1_177 = arith.constant 1 : index
    %c0_178 = arith.constant 0 : index
    %c0_179 = arith.constant 0 : index
    %160 = vector.load %arg7[%c1_176, %c1_177, %c0_178, %c0_179] : memref<2x2x256x4xf32, #tpu.memory_space<vmem>>, vector<1x1x256x4xf32>
    %161 = vector.shape_cast %160 : vector<1x1x256x4xf32> to vector<256x4xf32>
    %162 = vector.shape_cast %159 : vector<256x4xf32> to vector<1x1x256x4xf32>
    tpu.vector_store %arg7[%c1_176, %c1_177, %c0_178, %c0_179], %162 {strides = array<i32>} : memref<2x2x256x4xf32, #tpu.memory_space<vmem>>, vector<1x1x256x4xf32>,
    %163 = vector.extract_strided_slice %131 {offsets = [2, 0, 0], sizes = [16, 16, 4], strides = [1, 1, 1]} : vector<18x16x4xbf16> to vector<16x16x4xbf16>
    %164 = vector.shape_cast %163 : vector<16x16x4xbf16> to vector<256x4xbf16>
    %c1_180 = arith.constant 1 : index
    %c1_181 = arith.constant 1 : index
    %c0_182 = arith.constant 0 : index
    %c0_183 = arith.constant 0 : index
    %165 = vector.load %arg7[%c1_180, %c1_181, %c0_182, %c0_183] : memref<2x2x256x4xf32, #tpu.memory_space<vmem>>, vector<1x1x256x4xf32>
    %166 = vector.shape_cast %165 : vector<1x1x256x4xf32> to vector<256x4xf32>
    %c15 = arith.constant 15 : index
    %c0_184 = arith.constant 0 : index
    %c0_185 = arith.constant 0 : index
    %167 = vector.load %arg4[%c15, %c0_184, %c0_185] : memref<16x4x4xbf16, #tpu.memory_space<vmem>>, vector<1x4x4xbf16>
    %168 = vector.shape_cast %167 : vector<1x4x4xbf16> to vector<4x4xbf16>
    %cst_186 = arith.constant dense<0.000000e+00> : vector<256x4xf32>
    %169 = tpu.matmul %164, %168, %cst_186 {dimension_numbers = #tpu.dot_dimension_numbers<[1], [0], [0], [1], [0, 0, 1, 1], [], []>} : vector<256x4xbf16>, vector<4x4xbf16>, vector<256x4xf32> -> vector<256x4xf32>
    %170 = arith.addf %166, %169 : vector<256x4xf32>
    %c1_187 = arith.constant 1 : index
    %c1_188 = arith.constant 1 : index
    %c0_189 = arith.constant 0 : index
    %c0_190 = arith.constant 0 : index
    %171 = vector.load %arg7[%c1_187, %c1_188, %c0_189, %c0_190] : memref<2x2x256x4xf32, #tpu.memory_space<vmem>>, vector<1x1x256x4xf32>
    %172 = vector.shape_cast %171 : vector<1x1x256x4xf32> to vector<256x4xf32>
    %173 = vector.shape_cast %170 : vector<256x4xf32> to vector<1x1x256x4xf32>
    tpu.vector_store %arg7[%c1_187, %c1_188, %c0_189, %c0_190], %173 {strides = array<i32>} : memref<2x2x256x4xf32, #tpu.memory_space<vmem>>, vector<1x1x256x4xf32>,
    %c0_i32_191 = arith.constant 0 : i32
    %174 = arith.cmpi eq, %arg2, %c0_i32_191 : i32
    %175 = arith.extui %174 : i1 to i32
    %c0_i32_192 = arith.constant 0 : i32
    %176 = arith.cmpi ne, %175, %c0_i32_192 : i32
    scf.if %176 {
      %c0_193 = arith.constant 0 : index
      %c0_194 = arith.constant 0 : index
      %177 = vector.load %arg5[%c0_193, %c0_194] : memref<1x4xf32, #tpu.memory_space<vmem>>, vector<1x4xf32>
      %c0_195 = arith.constant 0 : index
      %c0_196 = arith.constant 0 : index
      %c0_197 = arith.constant 0 : index
      %c0_198 = arith.constant 0 : index
      %178 = vector.load %arg7[%c0_195, %c0_196, %c0_197, %c0_198] : memref<2x2x256x4xf32, #tpu.memory_space<vmem>>, vector<1x1x256x4xf32>
      %179 = vector.shape_cast %178 : vector<1x1x256x4xf32> to vector<256x4xf32>
      %180 = vector.broadcast %177 : vector<1x4xf32> to vector<256x4xf32>
      %181 = arith.addf %179, %180 : vector<256x4xf32>
      %182 = vector.shape_cast %181 : vector<256x4xf32> to vector<16x16x4xf32>
      %c0_199 = arith.constant 0 : index
      %c0_200 = arith.constant 0 : index
      %c0_201 = arith.constant 0 : index
      %c0_202 = arith.constant 0 : index
      %c0_203 = arith.constant 0 : index
      %183 = vector.load %arg6[%c0_199, %c0_200, %c0_201, %c0_202, %c0_203] : memref<1x16x2x16x8xf32, #tpu.memory_space<vmem>>, vector<1x16x1x16x4xf32>
      %184 = vector.shape_cast %183 : vector<1x16x1x16x4xf32> to vector<16x16x4xf32>
      %185 = vector.shape_cast %182 : vector<16x16x4xf32> to vector<1x16x1x16x4xf32>
      tpu.vector_store %arg6[%c0_199, %c0_200, %c0_201, %c0_202, %c0_203], %185 {strides = array<i32>} : memref<1x16x2x16x8xf32, #tpu.memory_space<vmem>>, vector<1x16x1x16x4xf32>,
      %c0_204 = arith.constant 0 : index
      %c1_205 = arith.constant 1 : index
      %c0_206 = arith.constant 0 : index
      %c0_207 = arith.constant 0 : index
      %186 = vector.load %arg7[%c0_204, %c1_205, %c0_206, %c0_207] : memref<2x2x256x4xf32, #tpu.memory_space<vmem>>, vector<1x1x256x4xf32>
      %187 = vector.shape_cast %186 : vector<1x1x256x4xf32> to vector<256x4xf32>
      %188 = vector.broadcast %177 : vector<1x4xf32> to vector<256x4xf32>
      %189 = arith.addf %187, %188 : vector<256x4xf32>
      %190 = vector.shape_cast %189 : vector<256x4xf32> to vector<16x16x4xf32>
      %c0_208 = arith.constant 0 : index
      %c0_209 = arith.constant 0 : index
      %c0_210 = arith.constant 0 : index
      %c0_211 = arith.constant 0 : index
      %c4_212 = arith.constant 4 : index
      %191 = vector.load %arg6[%c0_208, %c0_209, %c0_210, %c0_211, %c4_212] : memref<1x16x2x16x8xf32, #tpu.memory_space<vmem>>, vector<1x16x1x16x4xf32>
      %192 = vector.shape_cast %191 : vector<1x16x1x16x4xf32> to vector<16x16x4xf32>
      %193 = vector.shape_cast %190 : vector<16x16x4xf32> to vector<1x16x1x16x4xf32>
      tpu.vector_store %arg6[%c0_208, %c0_209, %c0_210, %c0_211, %c4_212], %193 {strides = array<i32>} : memref<1x16x2x16x8xf32, #tpu.memory_space<vmem>>, vector<1x16x1x16x4xf32>,
      %c1_213 = arith.constant 1 : index
      %c0_214 = arith.constant 0 : index
      %c0_215 = arith.constant 0 : index
      %c0_216 = arith.constant 0 : index
      %194 = vector.load %arg7[%c1_213, %c0_214, %c0_215, %c0_216] : memref<2x2x256x4xf32, #tpu.memory_space<vmem>>, vector<1x1x256x4xf32>
      %195 = vector.shape_cast %194 : vector<1x1x256x4xf32> to vector<256x4xf32>
      %196 = vector.broadcast %177 : vector<1x4xf32> to vector<256x4xf32>
      %197 = arith.addf %195, %196 : vector<256x4xf32>
      %198 = vector.shape_cast %197 : vector<256x4xf32> to vector<16x16x4xf32>
      %c0_217 = arith.constant 0 : index
      %c0_218 = arith.constant 0 : index
      %c1_219 = arith.constant 1 : index
      %c0_220 = arith.constant 0 : index
      %c0_221 = arith.constant 0 : index
      %199 = vector.load %arg6[%c0_217, %c0_218, %c1_219, %c0_220, %c0_221] : memref<1x16x2x16x8xf32, #tpu.memory_space<vmem>>, vector<1x16x1x16x4xf32>
      %200 = vector.shape_cast %199 : vector<1x16x1x16x4xf32> to vector<16x16x4xf32>
      %201 = vector.shape_cast %198 : vector<16x16x4xf32> to vector<1x16x1x16x4xf32>
      tpu.vector_store %arg6[%c0_217, %c0_218, %c1_219, %c0_220, %c0_221], %201 {strides = array<i32>} : memref<1x16x2x16x8xf32, #tpu.memory_space<vmem>>, vector<1x16x1x16x4xf32>,
      %c1_222 = arith.constant 1 : index
      %c1_223 = arith.constant 1 : index
      %c0_224 = arith.constant 0 : index
      %c0_225 = arith.constant 0 : index
      %202 = vector.load %arg7[%c1_222, %c1_223, %c0_224, %c0_225] : memref<2x2x256x4xf32, #tpu.memory_space<vmem>>, vector<1x1x256x4xf32>
      %203 = vector.shape_cast %202 : vector<1x1x256x4xf32> to vector<256x4xf32>
      %204 = vector.broadcast %177 : vector<1x4xf32> to vector<256x4xf32>
      %205 = arith.addf %203, %204 : vector<256x4xf32>
      %206 = vector.shape_cast %205 : vector<256x4xf32> to vector<16x16x4xf32>
      %c0_226 = arith.constant 0 : index
      %c0_227 = arith.constant 0 : index
      %c1_228 = arith.constant 1 : index
      %c0_229 = arith.constant 0 : index
      %c4_230 = arith.constant 4 : index
      %207 = vector.load %arg6[%c0_226, %c0_227, %c1_228, %c0_229, %c4_230] : memref<1x16x2x16x8xf32, #tpu.memory_space<vmem>>, vector<1x16x1x16x4xf32>
      %208 = vector.shape_cast %207 : vector<1x16x1x16x4xf32> to vector<16x16x4xf32>
      %209 = vector.shape_cast %206 : vector<16x16x4xf32> to vector<1x16x1x16x4xf32>
      tpu.vector_store %arg6[%c0_226, %c0_227, %c1_228, %c0_229, %c4_230], %209 {strides = array<i32>} : memref<1x16x2x16x8xf32, #tpu.memory_space<vmem>>, vector<1x16x1x16x4xf32>,
    } else {
    }
    return
  }
  func.func @transform_0(%arg0: i32, %arg1: i32, %arg2: i32) -> (i32, i32, i32, i32, i32) {
    %c0_i32 = arith.constant 0 : i32
    %c0_i32_0 = arith.constant 0 : i32
    %c0_i32_1 = arith.constant 0 : i32
    return %arg0, %arg1, %c0_i32, %c0_i32_0, %arg2 : i32, i32, i32, i32, i32
  }
  func.func @transform_1(%arg0: i32, %arg1: i32, %arg2: i32) -> (i32, i32, i32) {
    %c0_i32 = arith.constant 0 : i32
    %c0_i32_0 = arith.constant 0 : i32
    %c0_i32_1 = arith.constant 0 : i32
    return %c0_i32, %arg2, %c0_i32_0 : i32, i32, i32
  }
  func.func @transform_2(%arg0: i32, %arg1: i32, %arg2: i32) -> (i32, i32) {
    %c0_i32 = arith.constant 0 : i32
    %c0_i32_0 = arith.constant 0 : i32
    %c0_i32_1 = arith.constant 0 : i32
    return %c0_i32, %c0_i32_0 : i32, i32
  }
  func.func @transform_3(%arg0: i32, %arg1: i32, %arg2: i32) -> (i32, i32, i32, i32, i32) {
    %c0_i32 = arith.constant 0 : i32
    %c0_i32_0 = arith.constant 0 : i32
    %c0_i32_1 = arith.constant 0 : i32
    %c0_i32_2 = arith.constant 0 : i32
    return %arg0, %arg1, %c0_i32, %c0_i32_0, %c0_i32_1 : i32, i32, i32, i32, i32
  }
}

</mosaic_0001>

<bundles_post_ra>
// kernel: upsample2x_conv3x3.1
= control target key start
LH: loop header
LB: loop body
LE: loop exit
PB: predicated region body
PF: predicated region fallthrough
CT: control target
= control target key end

     0   :  { %s6923_s12 = smov 0   ;;  %s6925_s13 = smov 0   ;;  %s9023_s0 = inlined_call_operand.vmem [shape: f32[2,1,18,18,4], index: 0, kind: input, shape index: {}]   ;;  %s9024_s1 = inlined_call_operand.vmem [shape: bf16[16,4,4], index: 1, kind: input, shape index: {}]   ;;  %s9025_s2 = inlined_call_operand.vmem [shape: f32[1,4], index: 2, kind: input, shape index: {}]   ;;  %s9026_s3 = inlined_call_operand.vmem [shape: f32[2,16,2,16,8], index: 3, kind: output, shape index: {}]  }
   0x1   :  { %s6927_s14 = smov 0  }
   0x2 LB: > { %s32_s15 = sadd.s32 1, %s6895_s13  ;;  %p5673_p0 = scmp.ge.s32.totalorder %s6899_s14, 1  ;;  %s6899_s14 = sphi %s6927_s14, %s13_s14   ;;  %s6895_s13 = sphi %s6925_s13, %s9028_s13   ;;  %s6891_s12 = sphi %s6923_s12, %s9027_s12  }
   0x3   : > { %p34_p1 = scmp.ge.s32.totalorder %s32_s15, 2  ;;  %p178_p2 = scmp.lt.s32.totalorder %s6899_s14, 3 }
   0x5   : > { %s9030_s15 = smov (%p34_p1, %s32_s15), 0  ;;  %p179_p3 = pnand %p5673_p0, %p178_p2 }
   0x6   : > { %p218_p4 = scmp.lt.s32.totalorder (!%p179_p3), %s6891_s12, 1  ;;  %s6902_s9 = smov (!%p179_p3), 4  }
   0x7   : > { %182 = sbr.rel (%p179_p3) target bundleno = 866 (0x362), region = 32 }
   0xc   : > { %v465_v0 = vld [vmem:[%s9024_s1] sm:$0x3]  ;;  %vm515_vm0 = vcmask 1041408   ;;  %v5693_v1 = vld [vmem:[%s9024_s1 + $0x4] sm:$0x3]  ;;  %s9032_s12 = smov (!%p218_p4, %s6891_s12), 1 }
   0xd   : > { %6832 = vmatprep.subr.msk.bf16.mxu0 %vm515_vm0, %v465_v0  ;;  %v517_v2 = vsel %vm515_vm0, %v465_v0, 0  ;;  %6833 = vmatprep.subr.msk.bf16.mxu1 %vm515_vm0, %v5693_v1  ;;  %v782_v3 = vsel %vm515_vm0, %v5693_v1, 0  ;;  %v5710_v4 = vld [vmem:[%s9024_s1 + $0x10] sm:$0x3]  ;;  %v5727_v5 = vld [vmem:[%s9024_s1 + $0x14] sm:$0x3] }
   0xe   : > { %6289 = vmatpush3.bf16.msra.mxu0 %v517_v2  ;;  %6323 = vmatpush3.bf16.msra.mxu1 %v782_v3  ;;  %s6848_s24 = smul.u32 432, %s9032_s12  ;;  %vm250_vm1 = vcmask 31744   ;;  %v1045_v15 = vsel %vm515_vm0, %v5710_v4, 0  ;;  %v1310_v19 = vsel %vm515_vm0, %v5727_v5, 0  ;;  %v6991_v20 = vld [vmem:[%s9024_s1 + $0x2] sm:$0x3] }
   0xf   : > { %6834 = vmatprep.subr.msk.bf16.mxu0 %vm515_vm0, %v5710_v4  ;;  %6835 = vmatprep.subr.msk.bf16.mxu1 %vm515_vm0, %v5727_v5  ;;  %v6998_v21 = vld [vmem:[%s9024_s1 + $0x8] sm:$0x3]  ;;  %v6901_v61 = vmov 0.0   ;;  %v1674_v62 = vsel %vm515_vm0, %v6991_v20, 0  ;;  %v5778_v0 = vld [vmem:[%s9024_s1 + $0x6] sm:$0x3] }
  0x10   : > { %s6965_s27 = scalar_lea.vmem %s9023_s0, %s6848_s24  ;;  %253 = vst.msk [vmem:[#allocation2 + $0x10] sm:$0xff] %vm250_vm1, %v6901_v61  ;;  %251 = vst.msk [vmem:[#allocation2] sm:$0xff] %vm250_vm1, %v6901_v61  ;;  %v1937_v63 = vsel %vm515_vm0, %v6998_v21, 0  ;;  %v5795_v1 = vld [vmem:[%s9024_s1 + $0xc] sm:$0x3]  ;;  %s6015_s30 = sshll.u32 %s9032_s12, 9 }
  0x11   : > { %v379_v6 = vld [vmem:[%s6965_s27] sm:$0xff]  ;;  %v380_v7 = vld [vmem:[%s6965_s27 + $0x8] sm:$0xff]  ;;  %v381_v8 = vld [vmem:[%s6965_s27 + $0x18] sm:$0xff]  ;;  %252 = vst.msk [vmem:[#allocation2 + $0x8] sm:$0xff] %vm250_vm1, %v6901_v61  ;;  %s8087_s7 = scalar_lea.vmem %s9026_s3, %s6015_s30  ;;  %vm5197_vm2 = vcmask 64544  }
  0x12   : > { %v415_v9 = vpack.c.bf16 %v380_v7, %v379_v6  ;;  %v382_v10 = vld [vmem:[%s6965_s27 + $0x20] sm:$0xff]  ;;  %v383_v11 = vld [vmem:[%s6965_s27 + $0x30] sm:$0xff]  ;;  %v384_v12 = vld [vmem:[%s6965_s27 + $0x38] sm:$0xff]  ;;  %254 = vst.msk [vmem:[#allocation2 + $0x18] sm:$0xff] %vm250_vm1, %v6901_v61 }
  0x13   : > { %v6973_v13 = vpack.c.bf16 %v382_v10, %v381_v8  ;;  %v6975_v14 = vpack.c.bf16 %v384_v12, %v383_v11  ;;  %v385_v16 = vld [vmem:[%s6965_s27 + $0x48] sm:$0xff]  ;;  %v386_v17 = vld [vmem:[%s6965_s27 + $0x50] sm:$0xff]  ;;  %v387_v22 = vld [vmem:[%s6965_s27 + $0x60] sm:$0xff]  ;;  %255 = vst.msk [vmem:[#allocation2 + $0x20] sm:$0xff] %vm250_vm1, %v6901_v61 }
  0x14   : > { %6290 = vmatprep.mubr.msk.bf16.mxu0 %vm250_vm1, %v415_v9  ;;  %v6981_v18 = vpack.c.bf16 %v386_v17, %v385_v16  ;;  %v388_v23 = vld [vmem:[%s6965_s27 + $0x68] sm:$0xff]  ;;  %v389_v24 = vld [vmem:[%s6965_s27 + $0x78] sm:$0xff]  ;;  %v390_v25 = vld [vmem:[%s6965_s27 + $0x80] sm:$0xff]  ;;  %256 = vst.msk [vmem:[#allocation2 + $0x28] sm:$0xff] %vm250_vm1, %v6901_v61 }
  0x15   : > { %6324 = vmatprep.mubr.msk.bf16.mxu1 %vm250_vm1, %v6973_v13  ;;  %6291 = vmatmul.mubr.msk.bf16.vlgmr.msra.gmra.mxu0 %vm250_vm1, %v6973_v13  ;;  %v7012_v26 = vpack.c.bf16 %v388_v23, %v387_v22  ;;  %v7014_v27 = vpack.c.bf16 %v390_v25, %v389_v24  ;;  %v391_v28 = vld [vmem:[%s6965_s27 + $0x90] sm:$0xff]  ;;  %v392_v29 = vld [vmem:[%s6965_s27 + $0x98] sm:$0xff]  ;;  %v393_v30 = vld [vmem:[%s6965_s27 + $0xa8] sm:$0xff]  ;;  %257 = vst.msk [vmem:[#allocation2 + $0x30] sm:$0xff] %vm250_vm1, %v6901_v61 }
  0x16   : > { %6325 = vmatmul.mubr.msk.bf16.vlgmr.msra.gmra.mxu1 %vm250_vm1, %v6975_v14  ;;  %6357 = vmatpush3.bf16.msra.mxu0 %v1045_v15  ;;  %v394_v31 = vld [vmem:[%s6965_s27 + $0xb0] sm:$0xff]  ;;  %v7028_v32 = vpack.c.bf16 %v392_v29, %v391_v28  ;;  %v395_v34 = vld [vmem:[%s6965_s27 + $0xc0] sm:$0xff]  ;;  %v396_v35 = vld [vmem:[%s6965_s27 + $0xc8] sm:$0xff]  ;;  %258 = vst.msk [vmem:[#allocation2 + $0x38] sm:$0xff] %vm250_vm1, %v6901_v61  ;;  %v2464_v15 = vsel %vm515_vm0, %v5795_v1, 0 }
  0x17   : > { %6294 = vmatprep.mubr.msk.bf16.mxu0 %vm250_vm1, %v6975_v14  ;;  %6328 = vmatprep.mubr.msk.bf16.mxu1 %vm250_vm1, %v6981_v18  ;;  %v7030_v33 = vpack.c.bf16 %v394_v31, %v393_v30  ;;  %v397_v36 = vld [vmem:[%s6965_s27 + $0xd8] sm:$0xff]  ;;  %v398_v37 = vld [vmem:[%s6965_s27 + $0xe0] sm:$0xff]  ;;  %v7044_v38 = vpack.c.bf16 %v396_v35, %v395_v34  ;;  %v399_v40 = vld [vmem:[%s6965_s27 + $0xf0] sm:$0xff]  ;;  %259 = vst.msk [vmem:[#allocation2 + $0x40] sm:$0xff] %vm250_vm1, %v6901_v61 }
  0x18   : > { %6391 = vmatpush3.bf16.msra.mxu1 %v1310_v19  ;;  %6836 = vmatprep.subr.msk.bf16.mxu0 %vm515_vm0, %v6991_v20  ;;  %v7046_v39 = vpack.c.bf16 %v398_v37, %v397_v36  ;;  %v400_v41 = vld [vmem:[%s6965_s27 + $0xf8] sm:$0xff]  ;;  %v401_v42 = vld [vmem:[%s6965_s27 + $0x108] sm:$0xff]  ;;  %v402_v43 = vld [vmem:[%s6965_s27 + $0x110] sm:$0xff]  ;;  %260 = vst.msk [vmem:[#allocation2 + $0x48] sm:$0xff] %vm250_vm1, %v6901_v61 }
  0x19   : > { %6837 = vmatprep.subr.msk.bf16.mxu1 %vm515_vm0, %v6998_v21  ;;  %v7060_v44 = vpack.c.bf16 %v400_v41, %v399_v40  ;;  %v7062_v45 = vpack.c.bf16 %v402_v43, %v401_v42  ;;  %v403_v46 = vld [vmem:[%s6965_s27 + $0x120] sm:$0xff]  ;;  %v404_v47 = vld [vmem:[%s6965_s27 + $0x128] sm:$0xff]  ;;  %v405_v48 = vld [vmem:[%s6965_s27 + $0x138] sm:$0xff]  ;;  %261 = vst.msk [vmem:[#allocation2 + $0x50] sm:$0xff] %vm250_vm1, %v6901_v61 }
  0x1a   : > { %v406_v49 = vld [vmem:[%s6965_s27 + $0x140] sm:$0xff]  ;;  %v7076_v50 = vpack.c.bf16 %v404_v47, %v403_v46  ;;  %v407_v52 = vld [vmem:[%s6965_s27 + $0x150] sm:$0xff]  ;;  %v408_v53 = vld [vmem:[%s6965_s27 + $0x158] sm:$0xff]  ;;  %262 = vst.msk [vmem:[#allocation2 + $0x58] sm:$0xff] %vm250_vm1, %v6901_v61 }
  0x1b   : > { %v7078_v51 = vpack.c.bf16 %v406_v49, %v405_v48  ;;  %v409_v54 = vld [vmem:[%s6965_s27 + $0x168] sm:$0xff]  ;;  %v410_v55 = vld [vmem:[%s6965_s27 + $0x170] sm:$0xff]  ;;  %v7092_v56 = vpack.c.bf16 %v408_v53, %v407_v52  ;;  %v411_v58 = vld [vmem:[%s6965_s27 + $0x180] sm:$0xff]  ;;  %263 = vst.msk [vmem:[#allocation2 + $0x60] sm:$0xff] %vm250_vm1, %v6901_v61 }
  0x1c   : > { %v7094_v57 = vpack.c.bf16 %v410_v55, %v409_v54  ;;  %v412_v59 = vld [vmem:[%s6965_s27 + $0x188] sm:$0xff]  ;;  %264 = vst.msk [vmem:[#allocation2 + $0x68] sm:$0xff] %vm250_vm1, %v6901_v61  ;;  %265 = vst.msk [vmem:[#allocation2 + $0x70] sm:$0xff] %vm250_vm1, %v6901_v61  ;;  %v413_v2 = vld [vmem:[%s6965_s27 + $0x198] sm:$0xff] }
  0x1d   : > { %6295 = vmatmul.mubr.msk.bf16.gmra.mxu0 %vm250_vm1, %v6981_v18  ;;  %v7106_v60 = vpack.c.bf16 %v412_v59, %v411_v58  ;;  %266 = vst.msk [vmem:[#allocation2 + $0x78] sm:$0xff] %vm250_vm1, %v6901_v61  ;;  %267 = vst.msk [vmem:[#allocation2 + $0x80] sm:$0xff] %vm250_vm1, %v6901_v61  ;;  %v414_v3 = vld [vmem:[%s6965_s27 + $0x1a0] sm:$0xff]  ;;  %v1538_v5 = vld [vmem:[%s6965_s27 + $0x9] sm:$0xff] }
  0x1e   : > { %6329 = vmatmul.mubr.msk.bf16.gmra.mxu1 %vm250_vm1, %v7012_v26  ;;  %6298 = vmatprep.mubr.msk.bf16.mxu0 %vm250_vm1, %v7012_v26  ;;  %268 = vst.msk [vmem:[#allocation2 + $0x88] sm:$0xff] %vm250_vm1, %v6901_v61  ;;  %269 = vst.msk [vmem:[#allocation2 + $0x90] sm:$0xff] %vm250_vm1, %v6901_v61  ;;  %v1537_v4 = vld [vmem:[%s6965_s27 + $0x1] sm:$0xff]  ;;  %v432_v6 = vpack.c.bf16 %v414_v3, %v413_v2  ;;  %v1539_v8 = vld [vmem:[%s6965_s27 + $0x19] sm:$0xff] }
  0x1f   : > { %6332 = vmatprep.mubr.msk.bf16.mxu1 %vm250_vm1, %v7014_v27  ;;  %270 = vst.msk [vmem:[#allocation2 + $0x98] sm:$0xff] %vm250_vm1, %v6901_v61  ;;  %271 = vst.msk [vmem:[#allocation2 + $0xa0] sm:$0xff] %vm250_vm1, %v6901_v61  ;;  %v1573_v7 = vpack.c.bf16 %v1538_v5, %v1537_v4  ;;  %v1540_v9 = vld [vmem:[%s6965_s27 + $0x21] sm:$0xff]  ;;  %v1541_v10 = vld [vmem:[%s6965_s27 + $0x31] sm:$0xff] }
  0x20   : > { %272 = vst.msk [vmem:[#allocation2 + $0xa8] sm:$0xff] %vm250_vm1, %v6901_v61  ;;  %273 = vst.msk [vmem:[#allocation2 + $0xb0] sm:$0xff] %vm250_vm1, %v6901_v61  ;;  %v1542_v11 = vld [vmem:[%s6965_s27 + $0x39] sm:$0xff]  ;;  %v7453_v12 = vpack.c.bf16 %v1540_v9, %v1539_v8  ;;  %v7464_v16 = vld [vmem:[%s9024_s1 + $0x12] sm:$0x3] }
  0x21   : > { %274 = vst.msk [vmem:[#allocation2 + $0xb8] sm:$0xff] %vm250_vm1, %v6901_v61  ;;  %275 = vst.msk [vmem:[#allocation2 + $0xc0] sm:$0xff] %vm250_vm1, %v6901_v61  ;;  %v1543_v17 = vld [vmem:[%s6965_s27 + $0x49] sm:$0xff]  ;;  %v7473_v19 = vld [vmem:[%s9024_s1 + $0x18] sm:$0x3]  ;;  %v2726_v58 = vsel %vm515_vm0, %v7464_v16, 0 }
  0x22   : > { %276 = vst.msk [vmem:[#allocation2 + $0xc8] sm:$0xff] %vm250_vm1, %v6901_v61  ;;  %277 = vst.msk [vmem:[#allocation2 + $0xd0] sm:$0xff] %vm250_vm1, %v6901_v61  ;;  %v1545_v20 = vld [vmem:[%s6965_s27 + $0x61] sm:$0xff]  ;;  %v1546_v21 = vld [vmem:[%s6965_s27 + $0x69] sm:$0xff] }
  0x23   : > { %278 = vst.msk [vmem:[#allocation2 + $0xd8] sm:$0xff] %vm250_vm1, %v6901_v61  ;;  %279 = vst.msk [vmem:[#allocation2 + $0xe0] sm:$0xff] %vm250_vm1, %v6901_v61  ;;  %v7487_v23 = vpack.c.bf16 %v1546_v21, %v1545_v20  ;;  %v1547_v24 = vld [vmem:[%s6965_s27 + $0x79] sm:$0xff]  ;;  %v1548_v25 = vld [vmem:[%s6965_s27 + $0x81] sm:$0xff] }
  0x24   : > { %280 = vst.msk [vmem:[#allocation2 + $0xe8] sm:$0xff] %vm250_vm1, %v6901_v61  ;;  %281 = vst.msk [vmem:[#allocation2 + $0xf0] sm:$0xff] %vm250_vm1, %v6901_v61  ;;  %v7501_v28 = vpack.c.bf16 %v1548_v25, %v1547_v24  ;;  %v1551_v30 = vld [vmem:[%s6965_s27 + $0xa9] sm:$0xff]  ;;  %v1552_v31 = vld [vmem:[%s6965_s27 + $0xb1] sm:$0xff] }
  0x25   : > { %6299 = vmatmul.mubr.msk.bf16.gmra.mxu0 %vm250_vm1, %v7014_v27  ;;  %282 = vst.msk [vmem:[#allocation2 + $0xf8] sm:$0xff] %vm250_vm1, %v6901_v61  ;;  %283 = vst.msk [vmem:[#allocation2 + $0x100] sm:$0xff] %vm250_vm1, %v6901_v61  ;;  %v7517_v34 = vpack.c.bf16 %v1552_v31, %v1551_v30  ;;  %v1555_v36 = vld [vmem:[%s6965_s27 + $0xd9] sm:$0xff]  ;;  %v1556_v37 = vld [vmem:[%s6965_s27 + $0xe1] sm:$0xff] }
  0x26   : > { %6333 = vmatmul.mubr.msk.bf16.gmra.mxu1 %vm250_vm1, %v7028_v32  ;;  %6302 = vmatprep.mubr.msk.bf16.mxu0 %vm250_vm1, %v7028_v32  ;;  %284 = vst.msk [vmem:[#allocation2 + $0x108] sm:$0xff] %vm250_vm1, %v6901_v61  ;;  %285 = vst.msk [vmem:[#allocation2 + $0x110] sm:$0xff] %vm250_vm1, %v6901_v61  ;;  %v7533_v40 = vpack.c.bf16 %v1556_v37, %v1555_v36  ;;  %v1559_v42 = vld [vmem:[%s6965_s27 + $0x109] sm:$0xff]  ;;  %v1560_v43 = vld [vmem:[%s6965_s27 + $0x111] sm:$0xff] }
  0x27   : > { %6336 = vmatprep.mubr.msk.bf16.mxu1 %vm250_vm1, %v7030_v33  ;;  %286 = vst.msk [vmem:[#allocation2 + $0x118] sm:$0xff] %vm250_vm1, %v6901_v61  ;;  %287 = vst.msk [vmem:[#allocation2 + $0x120] sm:$0xff] %vm250_vm1, %v6901_v61  ;;  %v7549_v46 = vpack.c.bf16 %v1560_v43, %v1559_v42  ;;  %v1563_v48 = vld [vmem:[%s6965_s27 + $0x139] sm:$0xff]  ;;  %v1564_v49 = vld [vmem:[%s6965_s27 + $0x141] sm:$0xff] }
  0x28   : > { %288 = vst.msk [vmem:[#allocation2 + $0x128] sm:$0xff] %vm250_vm1, %v6901_v61  ;;  %289 = vst.msk [vmem:[#allocation2 + $0x130] sm:$0xff] %vm250_vm1, %v6901_v61  ;;  %v7565_v52 = vpack.c.bf16 %v1564_v49, %v1563_v48  ;;  %v1567_v54 = vld [vmem:[%s6965_s27 + $0x169] sm:$0xff]  ;;  %v1568_v55 = vld [vmem:[%s6965_s27 + $0x171] sm:$0xff] }
  0x29   : > { %290 = vst.msk [vmem:[#allocation2 + $0x138] sm:$0xff] %vm250_vm1, %v6901_v61  ;;  %291 = vst.msk [vmem:[#allocation2 + $0x140] sm:$0xff] %vm250_vm1, %v6901_v61  ;;  %v436_v3 = vld [vmem:[#allocation2 + $0x18] sm:$0xff]  ;;  %v443_v42 = vld [vmem:[#allocation2 + $0x50] sm:$0xff] }
  0x2a   : > { %292 = vst.msk [vmem:[#allocation2 + $0x148] sm:$0xff] %vm250_vm1, %v6901_v61  ;;  %293 = vst.msk [vmem:[#allocation2 + $0x150] sm:$0xff] %vm250_vm1, %v6901_v61  ;;  %v440_v24 = vld [vmem:[#allocation2 + $0x38] sm:$0xff] }
  0x2b   : > { %294 = vst.msk [vmem:[#allocation2 + $0x158] sm:$0xff] %vm250_vm1, %v6901_v61  ;;  %295 = vst.msk [vmem:[#allocation2 + $0x160] sm:$0xff] %vm250_vm1, %v6901_v61 }
  0x2c   : > { %296 = vst.msk [vmem:[#allocation2 + $0x168] sm:$0xff] %vm250_vm1, %v6901_v61  ;;  %297 = vst.msk [vmem:[#allocation2 + $0x170] sm:$0xff] %vm250_vm1, %v6901_v61 }
  0x2d   : > { %6303 = vmatmul.mubr.msk.bf16.gmra.mxu0 %vm250_vm1, %v7030_v33  ;;  %298 = vst.msk [vmem:[#allocation2 + $0x178] sm:$0xff] %vm250_vm1, %v6901_v61  ;;  %299 = vst.msk [vmem:[#allocation2 + $0x180] sm:$0xff] %vm250_vm1, %v6901_v61 }
  0x2e   : > { %6337 = vmatmul.mubr.msk.bf16.gmra.mxu1 %vm250_vm1, %v7044_v38  ;;  %6306 = vmatprep.mubr.msk.bf16.mxu0 %vm250_vm1, %v7044_v38  ;;  %300 = vst.msk [vmem:[#allocation2 + $0x188] sm:$0xff] %vm250_vm1, %v6901_v61  ;;  %301 = vst.msk [vmem:[#allocation2 + $0x190] sm:$0xff] %vm250_vm1, %v6901_v61 }
  0x2f   : > { %6340 = vmatprep.mubr.msk.bf16.mxu1 %vm250_vm1, %v7046_v39  ;;  %302 = vst.msk [vmem:[#allocation2 + $0x198] sm:$0xff] %vm250_vm1, %v6901_v61  ;;  %303 = vst.msk [vmem:[#allocation2 + $0x1a0] sm:$0xff] %vm250_vm1, %v6901_v61 }
  0x30   : > { %304 = vst.msk [vmem:[#allocation2 + $0x1a8] sm:$0xff] %vm250_vm1, %v6901_v61  ;;  %305 = vst.msk [vmem:[#allocation2 + $0x1b0] sm:$0xff] %vm250_vm1, %v6901_v61 }
  0x31   : > { %306 = vst.msk [vmem:[#allocation2 + $0x1b8] sm:$0xff] %vm250_vm1, %v6901_v61  ;;  %307 = vst.msk [vmem:[#allocation2 + $0x1c0] sm:$0xff] %vm250_vm1, %v6901_v61 }
  0x32   : > { %308 = vst.msk [vmem:[#allocation2 + $0x1c8] sm:$0xff] %vm250_vm1, %v6901_v61  ;;  %309 = vst.msk [vmem:[#allocation2 + $0x1d0] sm:$0xff] %vm250_vm1, %v6901_v61 }
  0x33   : > { %310 = vst.msk [vmem:[#allocation2 + $0x1d8] sm:$0xff] %vm250_vm1, %v6901_v61  ;;  %311 = vst.msk [vmem:[#allocation2 + $0x1e0] sm:$0xff] %vm250_vm1, %v6901_v61 }
  0x34   : > { %312 = vst.msk [vmem:[#allocation2 + $0x1e8] sm:$0xff] %vm250_vm1, %v6901_v61  ;;  %313 = vst.msk [vmem:[#allocation2 + $0x1f0] sm:$0xff] %vm250_vm1, %v6901_v61 }
  0x35   : > { %6307 = vmatmul.mubr.msk.bf16.gmra.mxu0 %vm250_vm1, %v7046_v39  ;;  %314 = vst.msk [vmem:[#allocation2 + $0x1f8] sm:$0xff] %vm250_vm1, %v6901_v61  ;;  %315 = vst.msk [vmem:[#allocation2 + $0x200] sm:$0xff] %vm250_vm1, %v6901_v61 }
  0x36   : > { %6341 = vmatmul.mubr.msk.bf16.gmra.mxu1 %vm250_vm1, %v7060_v44  ;;  %6310 = vmatprep.mubr.msk.bf16.mxu0 %vm250_vm1, %v7060_v44  ;;  %316 = vst.msk [vmem:[#allocation2 + $0x208] sm:$0xff] %vm250_vm1, %v6901_v61  ;;  %317 = vst.msk [vmem:[#allocation2 + $0x210] sm:$0xff] %vm250_vm1, %v6901_v61 }
  0x37   : > { %6344 = vmatprep.mubr.msk.bf16.mxu1 %vm250_vm1, %v7062_v45  ;;  %318 = vst.msk [vmem:[#allocation2 + $0x218] sm:$0xff] %vm250_vm1, %v6901_v61  ;;  %319 = vst.msk [vmem:[#allocation2 + $0x220] sm:$0xff] %vm250_vm1, %v6901_v61 }
  0x38   : > { %320 = vst.msk [vmem:[#allocation2 + $0x228] sm:$0xff] %vm250_vm1, %v6901_v61  ;;  %321 = vst.msk [vmem:[#allocation2 + $0x230] sm:$0xff] %vm250_vm1, %v6901_v61 }
  0x39   : > { %322 = vst.msk [vmem:[#allocation2 + $0x238] sm:$0xff] %vm250_vm1, %v6901_v61  ;;  %323 = vst.msk [vmem:[#allocation2 + $0x240] sm:$0xff] %vm250_vm1, %v6901_v61 }
  0x3a   : > { %324 = vst.msk [vmem:[#allocation2 + $0x248] sm:$0xff] %vm250_vm1, %v6901_v61  ;;  %325 = vst.msk [vmem:[#allocation2 + $0x250] sm:$0xff] %vm250_vm1, %v6901_v61 }
  0x3b   : > { %326 = vst.msk [vmem:[#allocation2 + $0x258] sm:$0xff] %vm250_vm1, %v6901_v61  ;;  %327 = vst.msk [vmem:[#allocation2 + $0x260] sm:$0xff] %vm250_vm1, %v6901_v61 }
  0x3c   : > { %328 = vst.msk [vmem:[#allocation2 + $0x268] sm:$0xff] %vm250_vm1, %v6901_v61  ;;  %329 = vst.msk [vmem:[#allocation2 + $0x270] sm:$0xff] %vm250_vm1, %v6901_v61 }
  0x3d   : > { %6311 = vmatmul.mubr.msk.bf16.gmra.mxu0 %vm250_vm1, %v7062_v45  ;;  %330 = vst.msk [vmem:[#allocation2 + $0x278] sm:$0xff] %vm250_vm1, %v6901_v61  ;;  %331 = vst.msk [vmem:[#allocation2 + $0x280] sm:$0xff] %vm250_vm1, %v6901_v61 }
  0x3e   : > { %6345 = vmatmul.mubr.msk.bf16.gmra.mxu1 %vm250_vm1, %v7076_v50  ;;  %6314 = vmatprep.mubr.msk.bf16.mxu0 %vm250_vm1, %v7076_v50  ;;  %332 = vst.msk [vmem:[#allocation2 + $0x288] sm:$0xff] %vm250_vm1, %v6901_v61  ;;  %333 = vst.msk [vmem:[#allocation2 + $0x290] sm:$0xff] %vm250_vm1, %v6901_v61 }
  0x3f   : > { %6348 = vmatprep.mubr.msk.bf16.mxu1 %vm250_vm1, %v7078_v51  ;;  %334 = vst.msk [vmem:[#allocation2 + $0x298] sm:$0xff] %vm250_vm1, %v6901_v61  ;;  %335 = vst.msk [vmem:[#allocation2 + $0x2a0] sm:$0xff] %vm250_vm1, %v6901_v61 }
  0x40   : > { %336 = vst.msk [vmem:[#allocation2 + $0x2a8] sm:$0xff] %vm250_vm1, %v6901_v61  ;;  %337 = vst.msk [vmem:[#allocation2 + $0x2b0] sm:$0xff] %vm250_vm1, %v6901_v61 }
  0x41   : > { %338 = vst.msk [vmem:[#allocation2 + $0x2b8] sm:$0xff] %vm250_vm1, %v6901_v61  ;;  %339 = vst.msk [vmem:[#allocation2 + $0x2c0] sm:$0xff] %vm250_vm1, %v6901_v61 }
  0x42   : > { %340 = vst.msk [vmem:[#allocation2 + $0x2c8] sm:$0xff] %vm250_vm1, %v6901_v61  ;;  %341 = vst.msk [vmem:[#allocation2 + $0x2d0] sm:$0xff] %vm250_vm1, %v6901_v61 }
  0x43   : > { %342 = vst.msk [vmem:[#allocation2 + $0x2d8] sm:$0xff] %vm250_vm1, %v6901_v61  ;;  %343 = vst.msk [vmem:[#allocation2 + $0x2e0] sm:$0xff] %vm250_vm1, %v6901_v61 }
  0x44   : > { %344 = vst.msk [vmem:[#allocation2 + $0x2e8] sm:$0xff] %vm250_vm1, %v6901_v61  ;;  %345 = vst.msk [vmem:[#allocation2 + $0x2f0] sm:$0xff] %vm250_vm1, %v6901_v61 }
  0x45   : > { %6315 = vmatmul.mubr.msk.bf16.gmra.mxu0 %vm250_vm1, %v7078_v51  ;;  %346 = vst.msk [vmem:[#allocation2 + $0x2f8] sm:$0xff] %vm250_vm1, %v6901_v61  ;;  %347 = vst.msk [vmem:[#allocation2 + $0x300] sm:$0xff] %vm250_vm1, %v6901_v61 }
  0x46   : > { %6349 = vmatmul.mubr.msk.bf16.gmra.mxu1 %vm250_vm1, %v7092_v56  ;;  %6318 = vmatprep.mubr.msk.bf16.mxu0 %vm250_vm1, %v7092_v56  ;;  %348 = vst.msk [vmem:[#allocation2 + $0x308] sm:$0xff] %vm250_vm1, %v6901_v61  ;;  %349 = vst.msk [vmem:[#allocation2 + $0x310] sm:$0xff] %vm250_vm1, %v6901_v61 }
  0x47   : > { %6352 = vmatprep.mubr.msk.bf16.mxu1 %vm250_vm1, %v7094_v57  ;;  %350 = vst.msk [vmem:[#allocation2 + $0x318] sm:$0xff] %vm250_vm1, %v6901_v61  ;;  %351 = vst.msk [vmem:[#allocation2 + $0x320] sm:$0xff] %vm250_vm1, %v6901_v61 }
  0x48   : > { %352 = vst.msk [vmem:[#allocation2 + $0x328] sm:$0xff] %vm250_vm1, %v6901_v61  ;;  %353 = vst.msk [vmem:[#allocation2 + $0x330] sm:$0xff] %vm250_vm1, %v6901_v61 }
  0x49   : > { %354 = vst.msk [vmem:[#allocation2 + $0x338] sm:$0xff] %vm250_vm1, %v6901_v61  ;;  %355 = vst.msk [vmem:[#allocation2 + $0x340] sm:$0xff] %vm250_vm1, %v6901_v61 }
  0x4a   : > { %356 = vst.msk [vmem:[#allocation2 + $0x348] sm:$0xff] %vm250_vm1, %v6901_v61  ;;  %357 = vst.msk [vmem:[#allocation2 + $0x350] sm:$0xff] %vm250_vm1, %v6901_v61 }
  0x4b   : > { %358 = vst.msk [vmem:[#allocation2 + $0x358] sm:$0xff] %vm250_vm1, %v6901_v61  ;;  %359 = vst.msk [vmem:[#allocation2 + $0x360] sm:$0xff] %vm250_vm1, %v6901_v61 }
  0x4c   : > { %360 = vst.msk [vmem:[#allocation2 + $0x368] sm:$0xff] %vm250_vm1, %v6901_v61  ;;  %361 = vst.msk [vmem:[#allocation2 + $0x370] sm:$0xff] %vm250_vm1, %v6901_v61 }
  0x4d   : > { %6319 = vmatmul.mubr.msk.bf16.gmra.mxu0 %vm250_vm1, %v7094_v57  ;;  %362 = vst.msk [vmem:[#allocation2 + $0x378] sm:$0xff] %vm250_vm1, %v6901_v61  ;;  %363 = vst.msk [vmem:[#allocation2 + $0x380] sm:$0xff] %vm250_vm1, %v6901_v61 }
  0x4e   : > { %6353 = vmatmul.mubr.msk.bf16.gmra.mxu1 %vm250_vm1, %v7106_v60  ;;  %6358 = vmatprep.mubr.msk.bf16.mxu0 %vm250_vm1, %v6973_v13  ;;  %364 = vst.msk [vmem:[#allocation2 + $0x388] sm:$0xff] %vm250_vm1, %v6901_v61  ;;  %365 = vst.msk [vmem:[#allocation2 + $0x390] sm:$0xff] %vm250_vm1, %v6901_v61  ;;  %v2202_v13 = vsel %vm515_vm0, %v5778_v0, 0 }
  0x4f   : > { %6392 = vmatprep.mubr.msk.bf16.mxu1 %vm250_vm1, %v6975_v14  ;;  %366 = vst.msk [vmem:[#allocation2 + $0x398] sm:$0xff] %vm250_vm1, %v6901_v61  ;;  %367 = vst.msk [vmem:[#allocation2 + $0x3a0] sm:$0xff] %vm250_vm1, %v6901_v61 }
  0x50   : > { %368 = vst.msk [vmem:[#allocation2 + $0x3a8] sm:$0xff] %vm250_vm1, %v6901_v61  ;;  %369 = vst.msk [vmem:[#allocation2 + $0x3b0] sm:$0xff] %vm250_vm1, %v6901_v61 }
  0x51   : > { %370 = vst.msk [vmem:[#allocation2 + $0x3b8] sm:$0xff] %vm250_vm1, %v6901_v61  ;;  %371 = vst.msk [vmem:[#allocation2 + $0x3c0] sm:$0xff] %vm250_vm1, %v6901_v61 }
  0x52   : > { %372 = vst.msk [vmem:[#allocation2 + $0x3c8] sm:$0xff] %vm250_vm1, %v6901_v61  ;;  %373 = vst.msk [vmem:[#allocation2 + $0x3d0] sm:$0xff] %vm250_vm1, %v6901_v61 }
  0x53   : > { %374 = vst.msk [vmem:[#allocation2 + $0x3d8] sm:$0xff] %vm250_vm1, %v6901_v61  ;;  %375 = vst.msk [vmem:[#allocation2 + $0x3e0] sm:$0xff] %vm250_vm1, %v6901_v61 }
  0x54   : > { %376 = vst.msk [vmem:[#allocation2 + $0x3e8] sm:$0xff] %vm250_vm1, %v6901_v61  ;;  %377 = vst.msk [vmem:[#allocation2 + $0x3f0] sm:$0xff] %vm250_vm1, %v6901_v61 }
  0x55   : > { %378 = vst.msk [vmem:[#allocation2 + $0x3f8] sm:$0xff] %vm250_vm1, %v6901_v61  ;;  %6359 = vmatmul.mubr.msk.bf16.vlgmr.msra.gmra.mxu0 %vm250_vm1, %v6975_v14  ;;  %v7456_v14 = vpack.c.bf16 %v1542_v11, %v1541_v10  ;;  %v2989_v61 = vsel %vm515_vm0, %v7473_v19, 0  ;;  %v439_v11 = vld [vmem:[#allocation2 + $0x30] sm:$0xff] }
  0x56   : > { %6393 = vmatmul.mubr.msk.bf16.vlgmr.msra.gmra.mxu1 %vm250_vm1, %v6981_v18  ;;  %6425 = vmatpush3.bf16.msra.mxu0 %v1674_v62  ;;  %v7598_v62 = vld [vmem:[%s9024_s1 + $0x16] sm:$0x3] }
  0x57   : > { %6362 = vmatprep.mubr.msk.bf16.mxu0 %vm250_vm1, %v6981_v18  ;;  %6396 = vmatprep.mubr.msk.bf16.mxu1 %vm250_vm1, %v7012_v26  ;;  %v1544_v18 = vld [vmem:[%s6965_s27 + $0x51] sm:$0xff] }
  0x58   : > { %6459 = vmatpush3.bf16.msra.mxu1 %v1937_v63  ;;  %6838 = vmatprep.subr.msk.bf16.mxu0 %vm515_vm0, %v5778_v0  ;;  %v7483_v22 = vpack.c.bf16 %v1544_v18, %v1543_v17  ;;  %v437_v17 = vld [vmem:[#allocation2 + $0x20] sm:$0xff] }
  0x59   : > { %6839 = vmatprep.subr.msk.bf16.mxu1 %vm515_vm0, %v5795_v1  ;;  %v7605_v1 = vld [vmem:[%s9024_s1 + $0x1c] sm:$0x3] }
  0x5d   : > { %6363 = vmatmul.mubr.msk.bf16.gmra.mxu0 %vm250_vm1, %v7012_v26  ;;  %v1549_v26 = vld [vmem:[%s6965_s27 + $0x91] sm:$0xff] }
  0x5e   : > { %6397 = vmatmul.mubr.msk.bf16.gmra.mxu1 %vm250_vm1, %v7014_v27  ;;  %6366 = vmatprep.mubr.msk.bf16.mxu0 %vm250_vm1, %v7014_v27  ;;  %v1550_v27 = vld [vmem:[%s6965_s27 + $0x99] sm:$0xff] }
  0x5f   : > { %6400 = vmatprep.mubr.msk.bf16.mxu1 %vm250_vm1, %v7028_v32  ;;  %v7503_v29 = vpack.c.bf16 %v1550_v27, %v1549_v26 }
  0x65   : > { %6367 = vmatmul.mubr.msk.bf16.gmra.mxu0 %vm250_vm1, %v7028_v32  ;;  %v1553_v32 = vld [vmem:[%s6965_s27 + $0xc1] sm:$0xff] }
  0x66   : > { %6401 = vmatmul.mubr.msk.bf16.gmra.mxu1 %vm250_vm1, %v7030_v33  ;;  %6370 = vmatprep.mubr.msk.bf16.mxu0 %vm250_vm1, %v7030_v33  ;;  %v1554_v33 = vld [vmem:[%s6965_s27 + $0xc9] sm:$0xff] }
  0x67   : > { %6404 = vmatprep.mubr.msk.bf16.mxu1 %vm250_vm1, %v7044_v38  ;;  %v7519_v35 = vpack.c.bf16 %v1554_v33, %v1553_v32  ;;  %v438_v32 = vld [vmem:[#allocation2 + $0x28] sm:$0xff] }
  0x6d   : > { %6371 = vmatmul.mubr.msk.bf16.gmra.mxu0 %vm250_vm1, %v7044_v38  ;;  %v1557_v38 = vld [vmem:[%s6965_s27 + $0xf1] sm:$0xff] }
  0x6e   : > { %6405 = vmatmul.mubr.msk.bf16.gmra.mxu1 %vm250_vm1, %v7046_v39  ;;  %6374 = vmatprep.mubr.msk.bf16.mxu0 %vm250_vm1, %v7046_v39  ;;  %v1558_v39 = vld [vmem:[%s6965_s27 + $0xf9] sm:$0xff] }
  0x6f   : > { %6408 = vmatprep.mubr.msk.bf16.mxu1 %vm250_vm1, %v7060_v44  ;;  %v7535_v41 = vpack.c.bf16 %v1558_v39, %v1557_v38 }
  0x75   : > { %6375 = vmatmul.mubr.msk.bf16.gmra.mxu0 %vm250_vm1, %v7060_v44  ;;  %v1561_v44 = vld [vmem:[%s6965_s27 + $0x121] sm:$0xff] }
  0x76   : > { %6409 = vmatmul.mubr.msk.bf16.gmra.mxu1 %vm250_vm1, %v7062_v45  ;;  %6378 = vmatprep.mubr.msk.bf16.mxu0 %vm250_vm1, %v7062_v45  ;;  %v1562_v45 = vld [vmem:[%s6965_s27 + $0x129] sm:$0xff] }
  0x77   : > { %6412 = vmatprep.mubr.msk.bf16.mxu1 %vm250_vm1, %v7076_v50  ;;  %v7551_v47 = vpack.c.bf16 %v1562_v45, %v1561_v44 }
  0x7d   : > { %6379 = vmatmul.mubr.msk.bf16.gmra.mxu0 %vm250_vm1, %v7076_v50  ;;  %v1565_v50 = vld [vmem:[%s6965_s27 + $0x151] sm:$0xff] }
  0x7e   : > { %6413 = vmatmul.mubr.msk.bf16.gmra.mxu1 %vm250_vm1, %v7078_v51  ;;  %6382 = vmatprep.mubr.msk.bf16.mxu0 %vm250_vm1, %v7078_v51  ;;  %v1566_v51 = vld [vmem:[%s6965_s27 + $0x159] sm:$0xff] }
  0x7f   : > { %6416 = vmatprep.mubr.msk.bf16.mxu1 %vm250_vm1, %v7092_v56  ;;  %v7567_v53 = vpack.c.bf16 %v1566_v51, %v1565_v50  ;;  %v441_v50 = vld [vmem:[#allocation2 + $0x40] sm:$0xff] }
  0x85   : > { %6383 = vmatmul.mubr.msk.bf16.gmra.mxu0 %vm250_vm1, %v7092_v56  ;;  %v7579_v56 = vpack.c.bf16 %v1568_v55, %v1567_v54 }
  0x86   : > { %6417 = vmatmul.mubr.msk.bf16.gmra.mxu1 %vm250_vm1, %v7094_v57  ;;  %6386 = vmatprep.mubr.msk.bf16.mxu0 %vm250_vm1, %v7094_v57  ;;  %v435_v57 = vld [vmem:[#allocation2 + $0x10] sm:$0xff] }
  0x87   : > { %6420 = vmatprep.mubr.msk.bf16.mxu1 %vm250_vm1, %v7106_v60 }
  0x8d   : > { %6387 = vmatmul.mubr.msk.bf16.gmra.mxu0 %vm250_vm1, %v7106_v60  ;;  %v433_v60 = vld [vmem:[#allocation2] sm:$0xff] }
  0x8e   : > { %6421 = vmatmul.mubr.msk.bf16.gmra.mxu1 %vm250_vm1, %v432_v6  ;;  %6426 = vmatprep.mubr.msk.bf16.mxu0 %vm250_vm1, %v1573_v7 }
  0x8f   : > { %6460 = vmatprep.mubr.msk.bf16.mxu1 %vm250_vm1, %v1573_v7  ;;  %v434_v7 = vld [vmem:[#allocation2 + $0x8] sm:$0xff] }
  0x95   : > { %6427 = vmatmul.mubr.msk.bf16.vlgmr.msra.gmra.mxu0 %vm250_vm1, %v7453_v12 }
  0x96   : > { %6461 = vmatmul.mubr.msk.bf16.vlgmr.msra.gmra.mxu1 %vm250_vm1, %v7453_v12  ;;  %6493 = vmatpush3.bf16.msra.mxu0 %v2202_v13 }
  0x97   : > { %6430 = vmatprep.mubr.msk.bf16.mxu0 %vm250_vm1, %v7456_v14  ;;  %6464 = vmatprep.mubr.msk.bf16.mxu1 %vm250_vm1, %v7456_v14 }
  0x98   : > { %6527 = vmatpush3.bf16.msra.mxu1 %v2464_v15  ;;  %6840 = vmatprep.subr.msk.bf16.mxu0 %vm515_vm0, %v7464_v16 }
  0x99   : > { %6841 = vmatprep.subr.msk.bf16.mxu1 %vm515_vm0, %v7473_v19 }
  0x9d   : > { %6431 = vmatmul.mubr.msk.bf16.gmra.mxu0 %vm250_vm1, %v7483_v22 }
  0x9e   : > { %6465 = vmatmul.mubr.msk.bf16.gmra.mxu1 %vm250_vm1, %v7483_v22  ;;  %6434 = vmatprep.mubr.msk.bf16.mxu0 %vm250_vm1, %v7487_v23 }
  0x9f   : > { %6468 = vmatprep.mubr.msk.bf16.mxu1 %vm250_vm1, %v7487_v23 }
  0xa5   : > { %6435 = vmatmul.mubr.msk.bf16.gmra.mxu0 %vm250_vm1, %v7501_v28 }
  0xa6   : > { %6469 = vmatmul.mubr.msk.bf16.gmra.mxu1 %vm250_vm1, %v7501_v28  ;;  %6438 = vmatprep.mubr.msk.bf16.mxu0 %vm250_vm1, %v7503_v29 }
  0xa7   : > { %6472 = vmatprep.mubr.msk.bf16.mxu1 %vm250_vm1, %v7503_v29 }
  0xad   : > { %6439 = vmatmul.mubr.msk.bf16.gmra.mxu0 %vm250_vm1, %v7517_v34 }
  0xae   : > { %6473 = vmatmul.mubr.msk.bf16.gmra.mxu1 %vm250_vm1, %v7517_v34  ;;  %6442 = vmatprep.mubr.msk.bf16.mxu0 %vm250_vm1, %v7519_v35 }
  0xaf   : > { %6476 = vmatprep.mubr.msk.bf16.mxu1 %vm250_vm1, %v7519_v35 }
  0xb5   : > { %6443 = vmatmul.mubr.msk.bf16.gmra.mxu0 %vm250_vm1, %v7533_v40 }
  0xb6   : > { %6477 = vmatmul.mubr.msk.bf16.gmra.mxu1 %vm250_vm1, %v7533_v40  ;;  %6446 = vmatprep.mubr.msk.bf16.mxu0 %vm250_vm1, %v7535_v41 }
  0xb7   : > { %6480 = vmatprep.mubr.msk.bf16.mxu1 %vm250_vm1, %v7535_v41 }
  0xbd   : > { %6447 = vmatmul.mubr.msk.bf16.gmra.mxu0 %vm250_vm1, %v7549_v46 }
  0xbe   : > { %6481 = vmatmul.mubr.msk.bf16.gmra.mxu1 %vm250_vm1, %v7549_v46  ;;  %6450 = vmatprep.mubr.msk.bf16.mxu0 %vm250_vm1, %v7551_v47 }
  0xbf   : > { %6484 = vmatprep.mubr.msk.bf16.mxu1 %vm250_vm1, %v7551_v47 }
  0xc5   : > { %6451 = vmatmul.mubr.msk.bf16.gmra.mxu0 %vm250_vm1, %v7565_v52 }
  0xc6   : > { %6485 = vmatmul.mubr.msk.bf16.gmra.mxu1 %vm250_vm1, %v7565_v52  ;;  %6454 = vmatprep.mubr.msk.bf16.mxu0 %vm250_vm1, %v7567_v53 }
  0xc7   : > { %6488 = vmatprep.mubr.msk.bf16.mxu1 %vm250_vm1, %v7567_v53 }
  0xcd   : > { %6455 = vmatmul.mubr.msk.bf16.gmra.mxu0 %vm250_vm1, %v7579_v56 }
  0xce   : > { %6489 = vmatmul.mubr.msk.bf16.gmra.mxu1 %vm250_vm1, %v7579_v56  ;;  %6494 = vmatprep.mubr.msk.bf16.mxu0 %vm250_vm1, %v7453_v12 }
  0xcf   : > { %6528 = vmatprep.mubr.msk.bf16.mxu1 %vm250_vm1, %v7453_v12 }
  0xd5   : > { %v6292_v59 = vpop.f32.mrf.mxu0  ;;  %6495 = vmatmul.mubr.msk.bf16.vlgmr.msra.gmra.mxu0 %vm250_vm1, %v7456_v14 }
  0xd6   : > { %v682_v63 = vadd.f32 %v6292_v59, %v435_v57  ;;  %v6326_v0 = vpop.f32.mrf.mxu1  ;;  %6529 = vmatmul.mubr.msk.bf16.vlgmr.msra.gmra.mxu1 %vm250_vm1, %v7456_v14  ;;  %6561 = vmatpush3.bf16.msra.mxu0 %v2726_v58  ;;  %v444_v59 = vld [vmem:[#allocation2 + $0x58] sm:$0xff] }
  0xd7   : > { %v553_v2 = vpop.f32.mrf.mxu0  ;;  %6498 = vmatprep.mubr.msk.bf16.mxu0 %vm250_vm1, %v7483_v22  ;;  %6532 = vmatprep.mubr.msk.bf16.mxu1 %vm250_vm1, %v7483_v22 }
  0xd8   : > { %714 = vst.msk [vmem:[#allocation2 + $0x10] sm:$0xff] %vm250_vm1, %v682_v63  ;;  %v680_v4 = vadd.f32 %v553_v2, %v433_v60  ;;  %v818_v5 = vpop.f32.mrf.mxu1  ;;  %6595 = vmatpush3.bf16.msra.mxu1 %v2989_v61  ;;  %6842 = vmatprep.subr.msk.bf16.mxu0 %vm515_vm0, %v7598_v62 }
  0xd9   : > { %v6293_v6 = vpop.f32.mrf.mxu0  ;;  %6843 = vmatprep.subr.msk.bf16.mxu1 %vm515_vm0, %v7605_v1 }
  0xda   : > { %712 = vst.msk [vmem:[#allocation2] sm:$0xff] %vm250_vm1, %v680_v4  ;;  %v683_v8 = vadd.f32 %v6293_v6, %v436_v3  ;;  %v6327_v9 = vpop.f32.mrf.mxu1  ;;  %v442_v3 = vld [vmem:[#allocation2 + $0x48] sm:$0xff] }
  0xdb   : > { %v556_v10 = vpop.f32.mrf.mxu0 }
  0xdc   : > { %715 = vst.msk [vmem:[#allocation2 + $0x18] sm:$0xff] %vm250_vm1, %v683_v8  ;;  %v681_v13 = vadd.f32 %v556_v10, %v434_v7  ;;  %v821_v15 = vpop.f32.mrf.mxu1 }
  0xdd   : > { %v6296_v16 = vpop.f32.mrf.mxu0  ;;  %6499 = vmatmul.mubr.msk.bf16.gmra.mxu0 %vm250_vm1, %v7487_v23 }
  0xde   : > { %713 = vst.msk [vmem:[#allocation2 + $0x8] sm:$0xff] %vm250_vm1, %v681_v13  ;;  %v686_v18 = vadd.f32 %v6296_v16, %v439_v11  ;;  %v6330_v19 = vpop.f32.mrf.mxu1  ;;  %6533 = vmatmul.mubr.msk.bf16.gmra.mxu1 %vm250_vm1, %v7487_v23  ;;  %6502 = vmatprep.mubr.msk.bf16.mxu0 %vm250_vm1, %v7501_v28 }
  0xdf   : > { %v746_v20 = vld [vmem:[#allocation2 + $0x10] sm:$0xff]  ;;  %v569_v21 = vpop.f32.mrf.mxu0  ;;  %6536 = vmatprep.mubr.msk.bf16.mxu1 %vm250_vm1, %v7501_v28 }
  0xe0   : > { %v947_v25 = vadd.f32 %v6326_v0, %v746_v20  ;;  %718 = vst.msk [vmem:[#allocation2 + $0x30] sm:$0xff] %vm250_vm1, %v686_v18  ;;  %v684_v26 = vadd.f32 %v569_v21, %v437_v17  ;;  %v834_v27 = vpop.f32.mrf.mxu1  ;;  %v445_v17 = vld [vmem:[#allocation2 + $0x60] sm:$0xff] }
  0xe1   : > { %v744_v30 = vld [vmem:[#allocation2] sm:$0xff]  ;;  %v6297_v31 = vpop.f32.mrf.mxu0 }
  0xe2   : > { %979 = vst.msk [vmem:[#allocation2 + $0x10] sm:$0xff] %vm250_vm1, %v947_v25  ;;  %v945_v33 = vadd.f32 %v818_v5, %v744_v30  ;;  %716 = vst.msk [vmem:[#allocation2 + $0x20] sm:$0xff] %vm250_vm1, %v684_v26  ;;  %v687_v36 = vadd.f32 %v6297_v31, %v440_v24  ;;  %v6331_v37 = vpop.f32.mrf.mxu1  ;;  %v448_v25 = vld [vmem:[#allocation2 + $0x78] sm:$0xff] }
  0xe3   : > { %v747_v38 = vld [vmem:[#allocation2 + $0x18] sm:$0xff]  ;;  %v572_v39 = vpop.f32.mrf.mxu0 }
  0xe4   : > { %977 = vst.msk [vmem:[#allocation2] sm:$0xff] %vm250_vm1, %v945_v33  ;;  %v948_v43 = vadd.f32 %v6327_v9, %v747_v38  ;;  %719 = vst.msk [vmem:[#allocation2 + $0x38] sm:$0xff] %vm250_vm1, %v687_v36  ;;  %v685_v44 = vadd.f32 %v572_v39, %v438_v32  ;;  %v837_v45 = vpop.f32.mrf.mxu1  ;;  %v447_v9 = vld [vmem:[#allocation2 + $0x70] sm:$0xff]  ;;  %v446_v33 = vld [vmem:[#allocation2 + $0x68] sm:$0xff] }
  0xe5   : > { %v745_v48 = vld [vmem:[#allocation2 + $0x8] sm:$0xff]  ;;  %v6300_v49 = vpop.f32.mrf.mxu0  ;;  %6503 = vmatmul.mubr.msk.bf16.gmra.mxu0 %vm250_vm1, %v7503_v29 }
  0xe6   : > { %980 = vst.msk [vmem:[#allocation2 + $0x18] sm:$0xff] %vm250_vm1, %v948_v43  ;;  %v946_v51 = vadd.f32 %v821_v15, %v745_v48  ;;  %717 = vst.msk [vmem:[#allocation2 + $0x28] sm:$0xff] %vm250_vm1, %v685_v44  ;;  %v690_v54 = vadd.f32 %v6300_v49, %v443_v42  ;;  %v6334_v55 = vpop.f32.mrf.mxu1  ;;  %6537 = vmatmul.mubr.msk.bf16.gmra.mxu1 %vm250_vm1, %v7503_v29  ;;  %6506 = vmatprep.mubr.msk.bf16.mxu0 %vm250_vm1, %v7517_v34  ;;  %v451_v43 = vld [vmem:[#allocation2 + $0x90] sm:$0xff] }
  0xe7   : > { %v750_v57 = vld [vmem:[#allocation2 + $0x30] sm:$0xff]  ;;  %v585_v58 = vpop.f32.mrf.mxu0  ;;  %6540 = vmatprep.mubr.msk.bf16.mxu1 %vm250_vm1, %v7517_v34 }
  0xe8   : > { %978 = vst.msk [vmem:[#allocation2 + $0x8] sm:$0xff] %vm250_vm1, %v946_v51  ;;  %v951_v60 = vadd.f32 %v6330_v19, %v750_v57  ;;  %722 = vst.msk [vmem:[#allocation2 + $0x50] sm:$0xff] %vm250_vm1, %v690_v54  ;;  %v688_v61 = vadd.f32 %v585_v58, %v441_v50  ;;  %v850_v63 = vpop.f32.mrf.mxu1  ;;  %v449_v51 = vld [vmem:[#allocation2 + $0x80] sm:$0xff] }
  0xe9   : > { %v748_v0 = vld [vmem:[#allocation2 + $0x20] sm:$0xff]  ;;  %v6301_v2 = vpop.f32.mrf.mxu0 }
  0xea   : > { %983 = vst.msk [vmem:[#allocation2 + $0x30] sm:$0xff] %vm250_vm1, %v951_v60  ;;  %v949_v4 = vadd.f32 %v834_v27, %v748_v0  ;;  %720 = vst.msk [vmem:[#allocation2 + $0x40] sm:$0xff] %vm250_vm1, %v688_v61  ;;  %v691_v5 = vadd.f32 %v6301_v2, %v444_v59  ;;  %v6335_v6 = vpop.f32.mrf.mxu1  ;;  %v452_v60 = vld [vmem:[#allocation2 + $0x98] sm:$0xff] }
  0xeb   : > { %v751_v7 = vld [vmem:[#allocation2 + $0x38] sm:$0xff]  ;;  %v588_v8 = vpop.f32.mrf.mxu0 }
  0xec   : > { %981 = vst.msk [vmem:[#allocation2 + $0x20] sm:$0xff] %vm250_vm1, %v949_v4  ;;  %v952_v10 = vadd.f32 %v6331_v37, %v751_v7  ;;  %723 = vst.msk [vmem:[#allocation2 + $0x58] sm:$0xff] %vm250_vm1, %v691_v5  ;;  %v689_v11 = vadd.f32 %v588_v8, %v442_v3  ;;  %v853_v13 = vpop.f32.mrf.mxu1  ;;  %v450_v4 = vld [vmem:[#allocation2 + $0x88] sm:$0xff] }
  0xed   : > { %v749_v15 = vld [vmem:[#allocation2 + $0x28] sm:$0xff]  ;;  %v6304_v16 = vpop.f32.mrf.mxu0  ;;  %6507 = vmatmul.mubr.msk.bf16.gmra.mxu0 %vm250_vm1, %v7519_v35 }
  0xee   : > { %984 = vst.msk [vmem:[#allocation2 + $0x38] sm:$0xff] %vm250_vm1, %v952_v10  ;;  %v950_v18 = vadd.f32 %v837_v45, %v749_v15  ;;  %721 = vst.msk [vmem:[#allocation2 + $0x48] sm:$0xff] %vm250_vm1, %v689_v11  ;;  %v694_v19 = vadd.f32 %v6304_v16, %v447_v9  ;;  %v6338_v20 = vpop.f32.mrf.mxu1  ;;  %6541 = vmatmul.mubr.msk.bf16.gmra.mxu1 %vm250_vm1, %v7519_v35  ;;  %6510 = vmatprep.mubr.msk.bf16.mxu0 %vm250_vm1, %v7533_v40  ;;  %v455_v10 = vld [vmem:[#allocation2 + $0xb0] sm:$0xff] }
  0xef   : > { %v754_v21 = vld [vmem:[#allocation2 + $0x50] sm:$0xff]  ;;  %v601_v24 = vpop.f32.mrf.mxu0  ;;  %6544 = vmatprep.mubr.msk.bf16.mxu1 %vm250_vm1, %v7533_v40 }
  0xf0   : > { %982 = vst.msk [vmem:[#allocation2 + $0x28] sm:$0xff] %vm250_vm1, %v950_v18  ;;  %v955_v26 = vadd.f32 %v6334_v55, %v754_v21  ;;  %726 = vst.msk [vmem:[#allocation2 + $0x70] sm:$0xff] %vm250_vm1, %v694_v19  ;;  %v692_v27 = vadd.f32 %v601_v24, %v445_v17  ;;  %v866_v30 = vpop.f32.mrf.mxu1  ;;  %v453_v18 = vld [vmem:[#allocation2 + $0xa0] sm:$0xff] }
  0xf1   : > { %v752_v31 = vld [vmem:[#allocation2 + $0x40] sm:$0xff]  ;;  %v6305_v32 = vpop.f32.mrf.mxu0 }
  0xf2   : > { %987 = vst.msk [vmem:[#allocation2 + $0x50] sm:$0xff] %vm250_vm1, %v955_v26  ;;  %v953_v36 = vadd.f32 %v850_v63, %v752_v31  ;;  %724 = vst.msk [vmem:[#allocation2 + $0x60] sm:$0xff] %vm250_vm1, %v692_v27  ;;  %v695_v37 = vadd.f32 %v6305_v32, %v448_v25  ;;  %v6339_v38 = vpop.f32.mrf.mxu1  ;;  %v456_v26 = vld [vmem:[#allocation2 + $0xb8] sm:$0xff] }
  0xf3   : > { %v755_v39 = vld [vmem:[#allocation2 + $0x58] sm:$0xff]  ;;  %v604_v42 = vpop.f32.mrf.mxu0 }
  0xf4   : > { %985 = vst.msk [vmem:[#allocation2 + $0x40] sm:$0xff] %vm250_vm1, %v953_v36  ;;  %v956_v44 = vadd.f32 %v6335_v6, %v755_v39  ;;  %727 = vst.msk [vmem:[#allocation2 + $0x78] sm:$0xff] %vm250_vm1, %v695_v37  ;;  %v693_v45 = vadd.f32 %v604_v42, %v446_v33  ;;  %v869_v48 = vpop.f32.mrf.mxu1  ;;  %v454_v36 = vld [vmem:[#allocation2 + $0xa8] sm:$0xff] }
  0xf5   : > { %v753_v49 = vld [vmem:[#allocation2 + $0x48] sm:$0xff]  ;;  %v6308_v50 = vpop.f32.mrf.mxu0  ;;  %6511 = vmatmul.mubr.msk.bf16.gmra.mxu0 %vm250_vm1, %v7535_v41 }
  0xf6   : > { %988 = vst.msk [vmem:[#allocation2 + $0x58] sm:$0xff] %vm250_vm1, %v956_v44  ;;  %v954_v54 = vadd.f32 %v853_v13, %v753_v49  ;;  %725 = vst.msk [vmem:[#allocation2 + $0x68] sm:$0xff] %vm250_vm1, %v693_v45  ;;  %v698_v55 = vadd.f32 %v6308_v50, %v451_v43  ;;  %v6342_v57 = vpop.f32.mrf.mxu1  ;;  %6545 = vmatmul.mubr.msk.bf16.gmra.mxu1 %vm250_vm1, %v7535_v41  ;;  %6514 = vmatprep.mubr.msk.bf16.mxu0 %vm250_vm1, %v7549_v46  ;;  %v459_v44 = vld [vmem:[#allocation2 + $0xd0] sm:$0xff] }
  0xf7   : > { %v758_v58 = vld [vmem:[#allocation2 + $0x70] sm:$0xff]  ;;  %v617_v59 = vpop.f32.mrf.mxu0  ;;  %6548 = vmatprep.mubr.msk.bf16.mxu1 %vm250_vm1, %v7549_v46 }
  0xf8   : > { %986 = vst.msk [vmem:[#allocation2 + $0x48] sm:$0xff] %vm250_vm1, %v954_v54  ;;  %v959_v61 = vadd.f32 %v6338_v20, %v758_v58  ;;  %730 = vst.msk [vmem:[#allocation2 + $0x90] sm:$0xff] %vm250_vm1, %v698_v55  ;;  %v696_v63 = vadd.f32 %v617_v59, %v449_v51  ;;  %v882_v0 = vpop.f32.mrf.mxu1  ;;  %v457_v54 = vld [vmem:[#allocation2 + $0xc0] sm:$0xff] }
  0xf9   : > { %v756_v2 = vld [vmem:[#allocation2 + $0x60] sm:$0xff]  ;;  %v6309_v3 = vpop.f32.mrf.mxu0 }
  0xfa   : > { %991 = vst.msk [vmem:[#allocation2 + $0x70] sm:$0xff] %vm250_vm1, %v959_v61  ;;  %v957_v5 = vadd.f32 %v866_v30, %v756_v2  ;;  %728 = vst.msk [vmem:[#allocation2 + $0x80] sm:$0xff] %vm250_vm1, %v696_v63  ;;  %v699_v6 = vadd.f32 %v6309_v3, %v452_v60  ;;  %v6343_v7 = vpop.f32.mrf.mxu1  ;;  %v1569_v59 = vld [vmem:[%s6965_s27 + $0x181] sm:$0xff]  ;;  %v1570_v60 = vld [vmem:[%s6965_s27 + $0x189] sm:$0xff] }
  0xfb   : > { %v759_v8 = vld [vmem:[#allocation2 + $0x78] sm:$0xff]  ;;  %v620_v9 = vpop.f32.mrf.mxu0 }
  0xfc   : > { %989 = vst.msk [vmem:[#allocation2 + $0x60] sm:$0xff] %vm250_vm1, %v957_v5  ;;  %v960_v11 = vadd.f32 %v6339_v38, %v759_v8  ;;  %731 = vst.msk [vmem:[#allocation2 + $0x98] sm:$0xff] %vm250_vm1, %v699_v6  ;;  %v697_v13 = vadd.f32 %v620_v9, %v450_v4  ;;  %v885_v15 = vpop.f32.mrf.mxu1  ;;  %v7710_v8 = vpack.c.bf16 %v1570_v60, %v1569_v59  ;;  %v1010_v59 = vld [vmem:[#allocation2 + $0x200] sm:$0xff]  ;;  %v3516_v60 = vsel %vm515_vm0, %v7605_v1, 0  ;;  %v7750_v1 = vld [vmem:[%s9024_s1 + $0xe] sm:$0x3] }
  0xfd   : > { %v757_v16 = vld [vmem:[#allocation2 + $0x68] sm:$0xff]  ;;  %v6312_v17 = vpop.f32.mrf.mxu0  ;;  %6515 = vmatmul.mubr.msk.bf16.gmra.mxu0 %vm250_vm1, %v7551_v47 }
  0xfe   : > { %992 = vst.msk [vmem:[#allocation2 + $0x78] sm:$0xff] %vm250_vm1, %v960_v11  ;;  %v958_v19 = vadd.f32 %v869_v48, %v757_v16  ;;  %729 = vst.msk [vmem:[#allocation2 + $0x88] sm:$0xff] %vm250_vm1, %v697_v13  ;;  %v702_v20 = vadd.f32 %v6312_v17, %v455_v10  ;;  %v6346_v21 = vpop.f32.mrf.mxu1  ;;  %6549 = vmatmul.mubr.msk.bf16.gmra.mxu1 %vm250_vm1, %v7551_v47  ;;  %6518 = vmatprep.mubr.msk.bf16.mxu0 %vm250_vm1, %v7565_v52  ;;  %v463_v16 = vld [vmem:[#allocation2 + $0xf0] sm:$0xff] }
  0xff   : > { %v762_v24 = vld [vmem:[#allocation2 + $0x90] sm:$0xff]  ;;  %v633_v25 = vpop.f32.mrf.mxu0  ;;  %6552 = vmatprep.mubr.msk.bf16.mxu1 %vm250_vm1, %v7565_v52 }
 0x100   : > { %990 = vst.msk [vmem:[#allocation2 + $0x68] sm:$0xff] %vm250_vm1, %v958_v19  ;;  %v963_v27 = vadd.f32 %v6342_v57, %v762_v24  ;;  %734 = vst.msk [vmem:[#allocation2 + $0xb0] sm:$0xff] %vm250_vm1, %v702_v20  ;;  %v700_v30 = vadd.f32 %v633_v25, %v453_v18  ;;  %v898_v31 = vpop.f32.mrf.mxu1  ;;  %v461_v24 = vld [vmem:[#allocation2 + $0xe0] sm:$0xff] }
 0x101   : > { %v760_v32 = vld [vmem:[#allocation2 + $0x80] sm:$0xff]  ;;  %v6313_v33 = vpop.f32.mrf.mxu0 }
 0x102   : > { %995 = vst.msk [vmem:[#allocation2 + $0x90] sm:$0xff] %vm250_vm1, %v963_v27  ;;  %v961_v37 = vadd.f32 %v882_v0, %v760_v32  ;;  %732 = vst.msk [vmem:[#allocation2 + $0xa0] sm:$0xff] %vm250_vm1, %v700_v30  ;;  %v703_v38 = vadd.f32 %v6313_v33, %v456_v26  ;;  %v6347_v39 = vpop.f32.mrf.mxu1  ;;  %v460_v0 = vld [vmem:[#allocation2 + $0xd8] sm:$0xff] }
 0x103   : > { %v763_v42 = vld [vmem:[#allocation2 + $0x98] sm:$0xff]  ;;  %v636_v43 = vpop.f32.mrf.mxu0 }
 0x104   : > { %993 = vst.msk [vmem:[#allocation2 + $0x80] sm:$0xff] %vm250_vm1, %v961_v37  ;;  %v964_v45 = vadd.f32 %v6343_v7, %v763_v42  ;;  %735 = vst.msk [vmem:[#allocation2 + $0xb8] sm:$0xff] %vm250_vm1, %v703_v38  ;;  %v701_v48 = vadd.f32 %v636_v43, %v454_v36  ;;  %v901_v49 = vpop.f32.mrf.mxu1  ;;  %v458_v7 = vld [vmem:[#allocation2 + $0xc8] sm:$0xff]  ;;  %v464_v32 = vld [vmem:[#allocation2 + $0xf8] sm:$0xff] }
 0x105   : > { %v761_v50 = vld [vmem:[#allocation2 + $0x88] sm:$0xff]  ;;  %v6316_v51 = vpop.f32.mrf.mxu0  ;;  %6519 = vmatmul.mubr.msk.bf16.gmra.mxu0 %vm250_vm1, %v7567_v53 }
 0x106   : > { %996 = vst.msk [vmem:[#allocation2 + $0x98] sm:$0xff] %vm250_vm1, %v964_v45  ;;  %v962_v55 = vadd.f32 %v885_v15, %v761_v50  ;;  %733 = vst.msk [vmem:[#allocation2 + $0xa8] sm:$0xff] %vm250_vm1, %v701_v48  ;;  %v706_v57 = vadd.f32 %v6316_v51, %v459_v44  ;;  %v6350_v58 = vpop.f32.mrf.mxu1  ;;  %6553 = vmatmul.mubr.msk.bf16.gmra.mxu1 %vm250_vm1, %v7567_v53  ;;  %6522 = vmatprep.mubr.msk.bf16.mxu0 %vm250_vm1, %v7579_v56  ;;  %v462_v42 = vld [vmem:[#allocation2 + $0xe8] sm:$0xff]  ;;  %v3254_v50 = vsel %vm515_vm0, %v7598_v62, 0 }
 0x107   : > { %v766_v61 = vld [vmem:[#allocation2 + $0xb0] sm:$0xff]  ;;  %v649_v63 = vpop.f32.mrf.mxu0  ;;  %6556 = vmatprep.mubr.msk.bf16.mxu1 %vm250_vm1, %v7579_v56  ;;  %v7741_v62 = vld [vmem:[%s9024_s1 + $0xa] sm:$0x3] }
 0x108   : > { %994 = vst.msk [vmem:[#allocation2 + $0x88] sm:$0xff] %vm250_vm1, %v962_v55  ;;  %v967_v2 = vadd.f32 %v6346_v21, %v766_v61  ;;  %738 = vst.msk [vmem:[#allocation2 + $0xd0] sm:$0xff] %vm250_vm1, %v706_v57  ;;  %v704_v3 = vadd.f32 %v649_v63, %v457_v54  ;;  %v914_v4 = vpop.f32.mrf.mxu1 }
 0x109   : > { %v764_v5 = vld [vmem:[#allocation2 + $0xa0] sm:$0xff]  ;;  %v6317_v6 = vpop.f32.mrf.mxu0 }
 0x10a   : > { %999 = vst.msk [vmem:[#allocation2 + $0xb0] sm:$0xff] %vm250_vm1, %v967_v2  ;;  %v965_v9 = vadd.f32 %v898_v31, %v764_v5  ;;  %736 = vst.msk [vmem:[#allocation2 + $0xc0] sm:$0xff] %vm250_vm1, %v704_v3  ;;  %v707_v10 = vadd.f32 %v6317_v6, %v460_v0  ;;  %v6351_v11 = vpop.f32.mrf.mxu1 }
 0x10b   : > { %v767_v13 = vld [vmem:[#allocation2 + $0xb8] sm:$0xff]  ;;  %v652_v15 = vpop.f32.mrf.mxu0 }
 0x10c   : > { %997 = vst.msk [vmem:[#allocation2 + $0xa0] sm:$0xff] %vm250_vm1, %v965_v9  ;;  %v968_v17 = vadd.f32 %v6347_v39, %v767_v13  ;;  %739 = vst.msk [vmem:[#allocation2 + $0xd8] sm:$0xff] %vm250_vm1, %v707_v10  ;;  %v705_v18 = vadd.f32 %v652_v15, %v458_v7  ;;  %v917_v19 = vpop.f32.mrf.mxu1 }
 0x10d   : > { %v765_v20 = vld [vmem:[#allocation2 + $0xa8] sm:$0xff]  ;;  %v6320_v21 = vpop.f32.mrf.mxu0  ;;  %6523 = vmatmul.mubr.msk.bf16.gmra.mxu0 %vm250_vm1, %v7710_v8 }
 0x10e   : > { %1000 = vst.msk [vmem:[#allocation2 + $0xb8] sm:$0xff] %vm250_vm1, %v968_v17  ;;  %v966_v25 = vadd.f32 %v901_v49, %v765_v20  ;;  %737 = vst.msk [vmem:[#allocation2 + $0xc8] sm:$0xff] %vm250_vm1, %v705_v18  ;;  %v710_v26 = vadd.f32 %v6320_v21, %v463_v16  ;;  %v6354_v27 = vpop.f32.mrf.mxu1  ;;  %6557 = vmatmul.mubr.msk.bf16.gmra.mxu1 %vm250_vm1, %v7710_v8  ;;  %6562 = vmatprep.mubr.msk.bf16.mxu0 %vm250_vm1, %v7453_v12 }
 0x10f   : > { %v770_v30 = vld [vmem:[#allocation2 + $0xd0] sm:$0xff]  ;;  %v665_v31 = vpop.f32.mrf.mxu0  ;;  %6596 = vmatprep.mubr.msk.bf16.mxu1 %vm250_vm1, %v7453_v12 }
 0x110   : > { %998 = vst.msk [vmem:[#allocation2 + $0xa8] sm:$0xff] %vm250_vm1, %v966_v25  ;;  %v971_v33 = vadd.f32 %v6350_v58, %v770_v30  ;;  %742 = vst.msk [vmem:[#allocation2 + $0xf0] sm:$0xff] %vm250_vm1, %v710_v26  ;;  %v708_v36 = vadd.f32 %v665_v31, %v461_v24  ;;  %v930_v37 = vpop.f32.mrf.mxu1  ;;  %v1012_v12 = vld [vmem:[#allocation2 + $0x210] sm:$0xff] }
 0x111   : > { %v768_v38 = vld [vmem:[#allocation2 + $0xc0] sm:$0xff]  ;;  %v6321_v39 = vpop.f32.mrf.mxu0 }
 0x112   : > { %1003 = vst.msk [vmem:[#allocation2 + $0xd0] sm:$0xff] %vm250_vm1, %v971_v33  ;;  %v969_v43 = vadd.f32 %v914_v4, %v768_v38  ;;  %740 = vst.msk [vmem:[#allocation2 + $0xe0] sm:$0xff] %vm250_vm1, %v708_v36  ;;  %v711_v44 = vadd.f32 %v6321_v39, %v464_v32  ;;  %v6355_v45 = vpop.f32.mrf.mxu1  ;;  %v1013_v4 = vld [vmem:[#allocation2 + $0x218] sm:$0xff] }
 0x113   : > { %v771_v48 = vld [vmem:[#allocation2 + $0xd8] sm:$0xff]  ;;  %v668_v49 = vpop.f32.mrf.mxu0 }
 0x114   : > { %1001 = vst.msk [vmem:[#allocation2 + $0xc0] sm:$0xff] %vm250_vm1, %v969_v43  ;;  %v972_v51 = vadd.f32 %v6351_v11, %v771_v48  ;;  %743 = vst.msk [vmem:[#allocation2 + $0xf8] sm:$0xff] %vm250_vm1, %v711_v44  ;;  %v709_v54 = vadd.f32 %v668_v49, %v462_v42  ;;  %v933_v55 = vpop.f32.mrf.mxu1  ;;  %v1011_v11 = vld [vmem:[#allocation2 + $0x208] sm:$0xff] }
 0x115   : > { %v769_v57 = vld [vmem:[#allocation2 + $0xc8] sm:$0xff]  ;;  %v6360_v58 = vpop.f32.mrf.mxu0  ;;  %6563 = vmatmul.mubr.msk.bf16.vlgmr.msra.gmra.mxu0 %vm250_vm1, %v7456_v14 }
 0x116   : > { %1004 = vst.msk [vmem:[#allocation2 + $0xd8] sm:$0xff] %vm250_vm1, %v972_v51  ;;  %v970_v61 = vadd.f32 %v917_v19, %v769_v57  ;;  %741 = vst.msk [vmem:[#allocation2 + $0xe8] sm:$0xff] %vm250_vm1, %v709_v54  ;;  %v1210_v63 = vadd.f32 %v6360_v58, %v1012_v12  ;;  %v6394_v0 = vpop.f32.mrf.mxu1  ;;  %6597 = vmatmul.mubr.msk.bf16.vlgmr.msra.gmra.mxu1 %vm250_vm1, %v7456_v14  ;;  %6629 = vmatpush3.bf16.msra.mxu0 %v3254_v50  ;;  %v1016_v19 = vld [vmem:[#allocation2 + $0x230] sm:$0xff] }
 0x117   : > { %v774_v2 = vld [vmem:[#allocation2 + $0xf0] sm:$0xff]  ;;  %v1081_v3 = vpop.f32.mrf.mxu0  ;;  %6566 = vmatprep.mubr.msk.bf16.mxu0 %vm250_vm1, %v7483_v22  ;;  %6600 = vmatprep.mubr.msk.bf16.mxu1 %vm250_vm1, %v7483_v22 }
 0x118   : > { %1002 = vst.msk [vmem:[#allocation2 + $0xc8] sm:$0xff] %vm250_vm1, %v970_v61  ;;  %v975_v5 = vadd.f32 %v6354_v27, %v774_v2  ;;  %1242 = vst.msk [vmem:[#allocation2 + $0x210] sm:$0xff] %vm250_vm1, %v1210_v63  ;;  %v1208_v6 = vadd.f32 %v1081_v3, %v1010_v59  ;;  %v1346_v7 = vpop.f32.mrf.mxu1  ;;  %6663 = vmatpush3.bf16.msra.mxu1 %v3516_v60  ;;  %6844 = vmatprep.subr.msk.bf16.mxu0 %vm515_vm0, %v7741_v62  ;;  %v1014_v27 = vld [vmem:[#allocation2 + $0x220] sm:$0xff]  ;;  %v1020_v54 = vld [vmem:[#allocation2 + $0x250] sm:$0xff] }
 0x119   : > { %v772_v9 = vld [vmem:[#allocation2 + $0xe0] sm:$0xff]  ;;  %v6361_v10 = vpop.f32.mrf.mxu0  ;;  %6845 = vmatprep.subr.msk.bf16.mxu1 %vm515_vm0, %v7750_v1 }
 0x11a   : > { %1007 = vst.msk [vmem:[#allocation2 + $0xf0] sm:$0xff] %vm250_vm1, %v975_v5  ;;  %v973_v13 = vadd.f32 %v930_v37, %v772_v9  ;;  %1240 = vst.msk [vmem:[#allocation2 + $0x200] sm:$0xff] %vm250_vm1, %v1208_v6  ;;  %v1211_v15 = vadd.f32 %v6361_v10, %v1013_v4  ;;  %v6395_v16 = vpop.f32.mrf.mxu1  ;;  %v1017_v37 = vld [vmem:[#allocation2 + $0x238] sm:$0xff]  ;;  %v1018_v61 = vld [vmem:[#allocation2 + $0x240] sm:$0xff] }
 0x11b   : > { %v775_v17 = vld [vmem:[#allocation2 + $0xf8] sm:$0xff]  ;;  %v1084_v18 = vpop.f32.mrf.mxu0 }
 0x11c   : > { %1005 = vst.msk [vmem:[#allocation2 + $0xe0] sm:$0xff] %vm250_vm1, %v973_v13  ;;  %v976_v20 = vadd.f32 %v6355_v45, %v775_v17  ;;  %1243 = vst.msk [vmem:[#allocation2 + $0x218] sm:$0xff] %vm250_vm1, %v1211_v15  ;;  %v1209_v21 = vadd.f32 %v1084_v18, %v1011_v11  ;;  %v1349_v24 = vpop.f32.mrf.mxu1  ;;  %v1015_v45 = vld [vmem:[#allocation2 + $0x228] sm:$0xff]  ;;  %v1021_v5 = vld [vmem:[#allocation2 + $0x258] sm:$0xff] }
 0x11d   : > { %v773_v25 = vld [vmem:[#allocation2 + $0xe8] sm:$0xff]  ;;  %v6364_v26 = vpop.f32.mrf.mxu0  ;;  %6567 = vmatmul.mubr.msk.bf16.gmra.mxu0 %vm250_vm1, %v7487_v23 }
 0x11e   : > { %1008 = vst.msk [vmem:[#allocation2 + $0xf8] sm:$0xff] %vm250_vm1, %v976_v20  ;;  %v974_v30 = vadd.f32 %v933_v55, %v773_v25  ;;  %1241 = vst.msk [vmem:[#allocation2 + $0x208] sm:$0xff] %vm250_vm1, %v1209_v21  ;;  %v1214_v31 = vadd.f32 %v6364_v26, %v1016_v19  ;;  %v6398_v32 = vpop.f32.mrf.mxu1  ;;  %6601 = vmatmul.mubr.msk.bf16.gmra.mxu1 %vm250_vm1, %v7487_v23  ;;  %6570 = vmatprep.mubr.msk.bf16.mxu0 %vm250_vm1, %v7501_v28  ;;  %v1019_v13 = vld [vmem:[#allocation2 + $0x248] sm:$0xff]  ;;  %v1024_v20 = vld [vmem:[#allocation2 + $0x270] sm:$0xff] }
 0x11f   : > { %v1274_v33 = vld [vmem:[#allocation2 + $0x210] sm:$0xff]  ;;  %v1097_v36 = vpop.f32.mrf.mxu0  ;;  %6604 = vmatprep.mubr.msk.bf16.mxu1 %vm250_vm1, %v7501_v28 }
 0x120   : > { %1006 = vst.msk [vmem:[#allocation2 + $0xe8] sm:$0xff] %vm250_vm1, %v974_v30  ;;  %v1475_v38 = vadd.f32 %v6394_v0, %v1274_v33  ;;  %1246 = vst.msk [vmem:[#allocation2 + $0x230] sm:$0xff] %vm250_vm1, %v1214_v31  ;;  %v1212_v39 = vadd.f32 %v1097_v36, %v1014_v27  ;;  %v1362_v42 = vpop.f32.mrf.mxu1  ;;  %v1022_v30 = vld [vmem:[#allocation2 + $0x260] sm:$0xff] }
 0x121   : > { %v1272_v43 = vld [vmem:[#allocation2 + $0x200] sm:$0xff]  ;;  %v6365_v44 = vpop.f32.mrf.mxu0 }
 0x122   : > { %1507 = vst.msk [vmem:[#allocation2 + $0x210] sm:$0xff] %vm250_vm1, %v1475_v38  ;;  %v1473_v48 = vadd.f32 %v1346_v7, %v1272_v43  ;;  %1244 = vst.msk [vmem:[#allocation2 + $0x220] sm:$0xff] %vm250_vm1, %v1212_v39  ;;  %v1215_v49 = vadd.f32 %v6365_v44, %v1017_v37  ;;  %v6399_v12 = vpop.f32.mrf.mxu1  ;;  %v1025_v38 = vld [vmem:[#allocation2 + $0x278] sm:$0xff] }
 0x123   : > { %v1275_v50 = vld [vmem:[#allocation2 + $0x218] sm:$0xff]  ;;  %v1100_v51 = vpop.f32.mrf.mxu0 }
 0x124   : > { %1505 = vst.msk [vmem:[#allocation2 + $0x200] sm:$0xff] %vm250_vm1, %v1473_v48  ;;  %v1476_v55 = vadd.f32 %v6395_v16, %v1275_v50  ;;  %1247 = vst.msk [vmem:[#allocation2 + $0x238] sm:$0xff] %vm250_vm1, %v1215_v49  ;;  %v1213_v57 = vadd.f32 %v1100_v51, %v1015_v45  ;;  %v1365_v58 = vpop.f32.mrf.mxu1  ;;  %v1023_v48 = vld [vmem:[#allocation2 + $0x268] sm:$0xff] }
 0x125   : > { %v1273_v59 = vld [vmem:[#allocation2 + $0x208] sm:$0xff]  ;;  %v6368_v60 = vpop.f32.mrf.mxu0  ;;  %6571 = vmatmul.mubr.msk.bf16.gmra.mxu0 %vm250_vm1, %v7503_v29 }
 0x126   : > { %1508 = vst.msk [vmem:[#allocation2 + $0x218] sm:$0xff] %vm250_vm1, %v1476_v55  ;;  %v1474_v63 = vadd.f32 %v1349_v24, %v1273_v59  ;;  %1245 = vst.msk [vmem:[#allocation2 + $0x228] sm:$0xff] %vm250_vm1, %v1213_v57  ;;  %v1218_v0 = vadd.f32 %v6368_v60, %v1020_v54  ;;  %v6402_v2 = vpop.f32.mrf.mxu1  ;;  %6605 = vmatmul.mubr.msk.bf16.gmra.mxu1 %vm250_vm1, %v7503_v29  ;;  %6574 = vmatprep.mubr.msk.bf16.mxu0 %vm250_vm1, %v7517_v34  ;;  %v1028_v55 = vld [vmem:[#allocation2 + $0x290] sm:$0xff] }
 0x127   : > { %v1278_v3 = vld [vmem:[#allocation2 + $0x230] sm:$0xff]  ;;  %v1113_v4 = vpop.f32.mrf.mxu0  ;;  %6608 = vmatprep.mubr.msk.bf16.mxu1 %vm250_vm1, %v7517_v34 }
 0x128   : > { %1506 = vst.msk [vmem:[#allocation2 + $0x208] sm:$0xff] %vm250_vm1, %v1474_v63  ;;  %v1479_v6 = vadd.f32 %v6398_v32, %v1278_v3  ;;  %1250 = vst.msk [vmem:[#allocation2 + $0x250] sm:$0xff] %vm250_vm1, %v1218_v0  ;;  %v1216_v7 = vadd.f32 %v1113_v4, %v1018_v61  ;;  %v1378_v9 = vpop.f32.mrf.mxu1  ;;  %v1026_v63 = vld [vmem:[#allocation2 + $0x280] sm:$0xff] }
 0x129   : > { %v1276_v10 = vld [vmem:[#allocation2 + $0x220] sm:$0xff]  ;;  %v6369_v11 = vpop.f32.mrf.mxu0 }
 0x12a   : > { %1511 = vst.msk [vmem:[#allocation2 + $0x230] sm:$0xff] %vm250_vm1, %v1479_v6  ;;  %v1477_v15 = vadd.f32 %v1362_v42, %v1276_v10  ;;  %1248 = vst.msk [vmem:[#allocation2 + $0x240] sm:$0xff] %vm250_vm1, %v1216_v7  ;;  %v1219_v16 = vadd.f32 %v6369_v11, %v1021_v5  ;;  %v6403_v17 = vpop.f32.mrf.mxu1  ;;  %v1029_v6 = vld [vmem:[#allocation2 + $0x298] sm:$0xff] }
 0x12b   : > { %v1279_v18 = vld [vmem:[#allocation2 + $0x238] sm:$0xff]  ;;  %v1116_v19 = vpop.f32.mrf.mxu0 }
 0x12c   : > { %1509 = vst.msk [vmem:[#allocation2 + $0x220] sm:$0xff] %vm250_vm1, %v1477_v15  ;;  %v1480_v21 = vadd.f32 %v6399_v12, %v1279_v18  ;;  %1251 = vst.msk [vmem:[#allocation2 + $0x258] sm:$0xff] %vm250_vm1, %v1219_v16  ;;  %v1217_v24 = vadd.f32 %v1116_v19, %v1019_v13  ;;  %v1381_v25 = vpop.f32.mrf.mxu1  ;;  %v1027_v15 = vld [vmem:[#allocation2 + $0x288] sm:$0xff] }
 0x12d   : > { %v1277_v26 = vld [vmem:[#allocation2 + $0x228] sm:$0xff]  ;;  %v6372_v27 = vpop.f32.mrf.mxu0  ;;  %6575 = vmatmul.mubr.msk.bf16.gmra.mxu0 %vm250_vm1, %v7519_v35 }
 0x12e   : > { %1512 = vst.msk [vmem:[#allocation2 + $0x238] sm:$0xff] %vm250_vm1, %v1480_v21  ;;  %v1478_v31 = vadd.f32 %v1365_v58, %v1277_v26  ;;  %1249 = vst.msk [vmem:[#allocation2 + $0x248] sm:$0xff] %vm250_vm1, %v1217_v24  ;;  %v1222_v32 = vadd.f32 %v6372_v27, %v1024_v20  ;;  %v6406_v33 = vpop.f32.mrf.mxu1  ;;  %6609 = vmatmul.mubr.msk.bf16.gmra.mxu1 %vm250_vm1, %v7519_v35  ;;  %6578 = vmatprep.mubr.msk.bf16.mxu0 %vm250_vm1, %v7533_v40  ;;  %v1032_v21 = vld [vmem:[#allocation2 + $0x2b0] sm:$0xff] }
 0x12f   : > { %v1282_v36 = vld [vmem:[#allocation2 + $0x250] sm:$0xff]  ;;  %v1129_v37 = vpop.f32.mrf.mxu0  ;;  %6612 = vmatprep.mubr.msk.bf16.mxu1 %vm250_vm1, %v7533_v40 }
 0x130   : > { %1510 = vst.msk [vmem:[#allocation2 + $0x228] sm:$0xff] %vm250_vm1, %v1478_v31  ;;  %v1483_v39 = vadd.f32 %v6402_v2, %v1282_v36  ;;  %1254 = vst.msk [vmem:[#allocation2 + $0x270] sm:$0xff] %vm250_vm1, %v1222_v32  ;;  %v1220_v42 = vadd.f32 %v1129_v37, %v1022_v30  ;;  %v1394_v43 = vpop.f32.mrf.mxu1  ;;  %v1030_v31 = vld [vmem:[#allocation2 + $0x2a0] sm:$0xff] }
 0x131   : > { %v1280_v44 = vld [vmem:[#allocation2 + $0x240] sm:$0xff]  ;;  %v6373_v45 = vpop.f32.mrf.mxu0 }
 0x132   : > { %1515 = vst.msk [vmem:[#allocation2 + $0x250] sm:$0xff] %vm250_vm1, %v1483_v39  ;;  %v1481_v49 = vadd.f32 %v1378_v9, %v1280_v44  ;;  %1252 = vst.msk [vmem:[#allocation2 + $0x260] sm:$0xff] %vm250_vm1, %v1220_v42  ;;  %v1223_v12 = vadd.f32 %v6373_v45, %v1025_v38  ;;  %v6407_v50 = vpop.f32.mrf.mxu1  ;;  %v1033_v39 = vld [vmem:[#allocation2 + $0x2b8] sm:$0xff] }
 0x133   : > { %v1283_v51 = vld [vmem:[#allocation2 + $0x258] sm:$0xff]  ;;  %v1132_v54 = vpop.f32.mrf.mxu0 }
 0x134   : > { %1513 = vst.msk [vmem:[#allocation2 + $0x240] sm:$0xff] %vm250_vm1, %v1481_v49  ;;  %v1484_v57 = vadd.f32 %v6403_v17, %v1283_v51  ;;  %1255 = vst.msk [vmem:[#allocation2 + $0x278] sm:$0xff] %vm250_vm1, %v1223_v12  ;;  %v1221_v58 = vadd.f32 %v1132_v54, %v1023_v48  ;;  %v1397_v59 = vpop.f32.mrf.mxu1  ;;  %v1031_v49 = vld [vmem:[#allocation2 + $0x2a8] sm:$0xff] }
 0x135   : > { %v1281_v60 = vld [vmem:[#allocation2 + $0x248] sm:$0xff]  ;;  %v6376_v61 = vpop.f32.mrf.mxu0  ;;  %6579 = vmatmul.mubr.msk.bf16.gmra.mxu0 %vm250_vm1, %v7535_v41 }
 0x136   : > { %1516 = vst.msk [vmem:[#allocation2 + $0x258] sm:$0xff] %vm250_vm1, %v1484_v57  ;;  %v1482_v0 = vadd.f32 %v1381_v25, %v1281_v60  ;;  %1253 = vst.msk [vmem:[#allocation2 + $0x268] sm:$0xff] %vm250_vm1, %v1221_v58  ;;  %v1226_v2 = vadd.f32 %v6376_v61, %v1028_v55  ;;  %v6410_v3 = vpop.f32.mrf.mxu1  ;;  %6613 = vmatmul.mubr.msk.bf16.gmra.mxu1 %vm250_vm1, %v7535_v41  ;;  %6582 = vmatprep.mubr.msk.bf16.mxu0 %vm250_vm1, %v7549_v46  ;;  %v1036_v57 = vld [vmem:[#allocation2 + $0x2d0] sm:$0xff] }
 0x137   : > { %v1286_v4 = vld [vmem:[#allocation2 + $0x270] sm:$0xff]  ;;  %v1145_v5 = vpop.f32.mrf.mxu0  ;;  %6616 = vmatprep.mubr.msk.bf16.mxu1 %vm250_vm1, %v7549_v46 }
 0x138   : > { %1514 = vst.msk [vmem:[#allocation2 + $0x248] sm:$0xff] %vm250_vm1, %v1482_v0  ;;  %v1487_v7 = vadd.f32 %v6406_v33, %v1286_v4  ;;  %1258 = vst.msk [vmem:[#allocation2 + $0x290] sm:$0xff] %vm250_vm1, %v1226_v2  ;;  %v1224_v9 = vadd.f32 %v1145_v5, %v1026_v63  ;;  %v1410_v10 = vpop.f32.mrf.mxu1  ;;  %v1034_v0 = vld [vmem:[#allocation2 + $0x2c0] sm:$0xff] }
 0x139   : > { %v1284_v11 = vld [vmem:[#allocation2 + $0x260] sm:$0xff]  ;;  %v6377_v13 = vpop.f32.mrf.mxu0 }
 0x13a   : > { %1519 = vst.msk [vmem:[#allocation2 + $0x270] sm:$0xff] %vm250_vm1, %v1487_v7  ;;  %v1485_v16 = vadd.f32 %v1394_v43, %v1284_v11  ;;  %1256 = vst.msk [vmem:[#allocation2 + $0x280] sm:$0xff] %vm250_vm1, %v1224_v9  ;;  %v1227_v17 = vadd.f32 %v6377_v13, %v1029_v6  ;;  %v6411_v18 = vpop.f32.mrf.mxu1  ;;  %v1037_v7 = vld [vmem:[#allocation2 + $0x2d8] sm:$0xff] }
 0x13b   : > { %v1287_v19 = vld [vmem:[#allocation2 + $0x278] sm:$0xff]  ;;  %v1148_v20 = vpop.f32.mrf.mxu0 }
 0x13c   : > { %1517 = vst.msk [vmem:[#allocation2 + $0x260] sm:$0xff] %vm250_vm1, %v1485_v16  ;;  %v1488_v24 = vadd.f32 %v6407_v50, %v1287_v19  ;;  %1259 = vst.msk [vmem:[#allocation2 + $0x298] sm:$0xff] %vm250_vm1, %v1227_v17  ;;  %v1225_v25 = vadd.f32 %v1148_v20, %v1027_v15  ;;  %v1413_v26 = vpop.f32.mrf.mxu1  ;;  %v1035_v16 = vld [vmem:[#allocation2 + $0x2c8] sm:$0xff] }
 0x13d   : > { %v1285_v27 = vld [vmem:[#allocation2 + $0x268] sm:$0xff]  ;;  %v6380_v30 = vpop.f32.mrf.mxu0  ;;  %6583 = vmatmul.mubr.msk.bf16.gmra.mxu0 %vm250_vm1, %v7551_v47 }
 0x13e   : > { %1520 = vst.msk [vmem:[#allocation2 + $0x278] sm:$0xff] %vm250_vm1, %v1488_v24  ;;  %v1486_v32 = vadd.f32 %v1397_v59, %v1285_v27  ;;  %1257 = vst.msk [vmem:[#allocation2 + $0x288] sm:$0xff] %vm250_vm1, %v1225_v25  ;;  %v1230_v33 = vadd.f32 %v6380_v30, %v1032_v21  ;;  %v6414_v36 = vpop.f32.mrf.mxu1  ;;  %6617 = vmatmul.mubr.msk.bf16.gmra.mxu1 %vm250_vm1, %v7551_v47  ;;  %6586 = vmatprep.mubr.msk.bf16.mxu0 %vm250_vm1, %v7565_v52  ;;  %v1040_v24 = vld [vmem:[#allocation2 + $0x2f0] sm:$0xff] }
 0x13f   : > { %v1290_v37 = vld [vmem:[#allocation2 + $0x290] sm:$0xff]  ;;  %v1161_v38 = vpop.f32.mrf.mxu0  ;;  %6620 = vmatprep.mubr.msk.bf16.mxu1 %vm250_vm1, %v7565_v52 }
 0x140   : > { %1518 = vst.msk [vmem:[#allocation2 + $0x268] sm:$0xff] %vm250_vm1, %v1486_v32  ;;  %v1491_v42 = vadd.f32 %v6410_v3, %v1290_v37  ;;  %1262 = vst.msk [vmem:[#allocation2 + $0x2b0] sm:$0xff] %vm250_vm1, %v1230_v33  ;;  %v1228_v43 = vadd.f32 %v1161_v38, %v1030_v31  ;;  %v1426_v44 = vpop.f32.mrf.mxu1  ;;  %v1038_v32 = vld [vmem:[#allocation2 + $0x2e0] sm:$0xff] }
 0x141   : > { %v1288_v45 = vld [vmem:[#allocation2 + $0x280] sm:$0xff]  ;;  %v6381_v48 = vpop.f32.mrf.mxu0 }
 0x142   : > { %1523 = vst.msk [vmem:[#allocation2 + $0x290] sm:$0xff] %vm250_vm1, %v1491_v42  ;;  %v1489_v12 = vadd.f32 %v1410_v10, %v1288_v45  ;;  %1260 = vst.msk [vmem:[#allocation2 + $0x2a0] sm:$0xff] %vm250_vm1, %v1228_v43  ;;  %v1231_v50 = vadd.f32 %v6381_v48, %v1033_v39  ;;  %v6415_v51 = vpop.f32.mrf.mxu1  ;;  %v1041_v42 = vld [vmem:[#allocation2 + $0x2f8] sm:$0xff] }
 0x143   : > { %v1291_v54 = vld [vmem:[#allocation2 + $0x298] sm:$0xff]  ;;  %v1164_v55 = vpop.f32.mrf.mxu0 }
 0x144   : > { %1521 = vst.msk [vmem:[#allocation2 + $0x280] sm:$0xff] %vm250_vm1, %v1489_v12  ;;  %v1492_v58 = vadd.f32 %v6411_v18, %v1291_v54  ;;  %1263 = vst.msk [vmem:[#allocation2 + $0x2b8] sm:$0xff] %vm250_vm1, %v1231_v50  ;;  %v1229_v59 = vadd.f32 %v1164_v55, %v1031_v49  ;;  %v1429_v60 = vpop.f32.mrf.mxu1  ;;  %v1039_v12 = vld [vmem:[#allocation2 + $0x2e8] sm:$0xff] }
 0x145   : > { %v1289_v61 = vld [vmem:[#allocation2 + $0x288] sm:$0xff]  ;;  %v6384_v63 = vpop.f32.mrf.mxu0  ;;  %6587 = vmatmul.mubr.msk.bf16.gmra.mxu0 %vm250_vm1, %v7567_v53 }
 0x146   : > { %1524 = vst.msk [vmem:[#allocation2 + $0x298] sm:$0xff] %vm250_vm1, %v1492_v58  ;;  %v1490_v2 = vadd.f32 %v1413_v26, %v1289_v61  ;;  %1261 = vst.msk [vmem:[#allocation2 + $0x2a8] sm:$0xff] %vm250_vm1, %v1229_v59  ;;  %v1234_v3 = vadd.f32 %v6384_v63, %v1036_v57  ;;  %v6418_v4 = vpop.f32.mrf.mxu1  ;;  %6621 = vmatmul.mubr.msk.bf16.gmra.mxu1 %vm250_vm1, %v7567_v53  ;;  %6590 = vmatprep.mubr.msk.bf16.mxu0 %vm250_vm1, %v7579_v56  ;;  %v1904_v61 = vld [vmem:[#allocation2 + $0x110] sm:$0xff] }
 0x147   : > { %v1294_v5 = vld [vmem:[#allocation2 + $0x2b0] sm:$0xff]  ;;  %v1177_v6 = vpop.f32.mrf.mxu0  ;;  %6624 = vmatprep.mubr.msk.bf16.mxu1 %vm250_vm1, %v7579_v56 }
 0x148   : > { %1522 = vst.msk [vmem:[#allocation2 + $0x288] sm:$0xff] %vm250_vm1, %v1490_v2  ;;  %v1495_v9 = vadd.f32 %v6414_v36, %v1294_v5  ;;  %1266 = vst.msk [vmem:[#allocation2 + $0x2d0] sm:$0xff] %vm250_vm1, %v1234_v3  ;;  %v1232_v10 = vadd.f32 %v1177_v6, %v1034_v0  ;;  %v1442_v11 = vpop.f32.mrf.mxu1  ;;  %v1593_v0 = vld [vmem:[#allocation2 + $0x10] sm:$0xff]  ;;  %v4145_v3 = vsel %vm515_vm0, %v7750_v1, 0  ;;  %v7896_v1 = vld [vmem:[%s9024_s1 + $0x1e] sm:$0x3] }
 0x149   : > { %v1292_v13 = vld [vmem:[#allocation2 + $0x2a0] sm:$0xff]  ;;  %v6385_v15 = vpop.f32.mrf.mxu0 }
 0x14a   : > { %1527 = vst.msk [vmem:[#allocation2 + $0x2b0] sm:$0xff] %vm250_vm1, %v1495_v9  ;;  %v1493_v17 = vadd.f32 %v1426_v44, %v1292_v13  ;;  %1264 = vst.msk [vmem:[#allocation2 + $0x2c0] sm:$0xff] %vm250_vm1, %v1232_v10  ;;  %v1235_v18 = vadd.f32 %v6385_v15, %v1037_v7  ;;  %v6419_v19 = vpop.f32.mrf.mxu1  ;;  %v1902_v7 = vld [vmem:[#allocation2 + $0x100] sm:$0xff] }
 0x14b   : > { %v1295_v20 = vld [vmem:[#allocation2 + $0x2b8] sm:$0xff]  ;;  %v1180_v21 = vpop.f32.mrf.mxu0 }
 0x14c   : > { %1525 = vst.msk [vmem:[#allocation2 + $0x2a0] sm:$0xff] %vm250_vm1, %v1493_v17  ;;  %v1496_v25 = vadd.f32 %v6415_v51, %v1295_v20  ;;  %1267 = vst.msk [vmem:[#allocation2 + $0x2d8] sm:$0xff] %vm250_vm1, %v1235_v18  ;;  %v1233_v26 = vadd.f32 %v1180_v21, %v1035_v16  ;;  %v1445_v27 = vpop.f32.mrf.mxu1  ;;  %v1905_v17 = vld [vmem:[#allocation2 + $0x118] sm:$0xff] }
 0x14d   : > { %v1293_v30 = vld [vmem:[#allocation2 + $0x2a8] sm:$0xff]  ;;  %v6388_v31 = vpop.f32.mrf.mxu0  ;;  %6591 = vmatmul.mubr.msk.bf16.gmra.mxu0 %vm250_vm1, %v7710_v8  ;;  %v1594_v20 = vld [vmem:[#allocation2 + $0x18] sm:$0xff] }
 0x14e   : > { %1528 = vst.msk [vmem:[#allocation2 + $0x2b8] sm:$0xff] %vm250_vm1, %v1496_v25  ;;  %v1494_v33 = vadd.f32 %v1429_v60, %v1293_v30  ;;  %1265 = vst.msk [vmem:[#allocation2 + $0x2c8] sm:$0xff] %vm250_vm1, %v1233_v26  ;;  %v1238_v36 = vadd.f32 %v6388_v31, %v1040_v24  ;;  %v6422_v37 = vpop.f32.mrf.mxu1  ;;  %6625 = vmatmul.mubr.msk.bf16.gmra.mxu1 %vm250_vm1, %v7710_v8  ;;  %6630 = vmatprep.mubr.msk.bf16.mxu0 %vm250_vm1, %v7456_v14  ;;  %v1903_v26 = vld [vmem:[#allocation2 + $0x108] sm:$0xff] }
 0x14f   : > { %v1298_v38 = vld [vmem:[#allocation2 + $0x2d0] sm:$0xff]  ;;  %v1193_v39 = vpop.f32.mrf.mxu0  ;;  %6664 = vmatprep.mubr.msk.bf16.mxu1 %vm250_vm1, %v7456_v14  ;;  %v3880_v14 = vsel %vm515_vm0, %v7741_v62, 0  ;;  %v7887_v62 = vld [vmem:[%s9024_s1 + $0x1a] sm:$0x3]  ;;  %v1592_v31 = vld [vmem:[#allocation2 + $0x8] sm:$0xff] }
 0x150   : > { %1526 = vst.msk [vmem:[#allocation2 + $0x2a8] sm:$0xff] %vm250_vm1, %v1494_v33  ;;  %v1499_v43 = vadd.f32 %v6418_v4, %v1298_v38  ;;  %1270 = vst.msk [vmem:[#allocation2 + $0x2f0] sm:$0xff] %vm250_vm1, %v1238_v36  ;;  %v1236_v44 = vadd.f32 %v1193_v39, %v1038_v32  ;;  %v1458_v45 = vpop.f32.mrf.mxu1  ;;  %v1908_v38 = vld [vmem:[#allocation2 + $0x130] sm:$0xff] }
 0x151   : > { %v1296_v48 = vld [vmem:[#allocation2 + $0x2c0] sm:$0xff]  ;;  %v6389_v49 = vpop.f32.mrf.mxu0 }
 0x152   : > { %1531 = vst.msk [vmem:[#allocation2 + $0x2d0] sm:$0xff] %vm250_vm1, %v1499_v43  ;;  %v1497_v50 = vadd.f32 %v1442_v11, %v1296_v48  ;;  %1268 = vst.msk [vmem:[#allocation2 + $0x2e0] sm:$0xff] %vm250_vm1, %v1236_v44  ;;  %v1239_v51 = vadd.f32 %v6389_v49, %v1041_v42  ;;  %v6423_v54 = vpop.f32.mrf.mxu1  ;;  %v1591_v11 = vld [vmem:[#allocation2] sm:$0xff]  ;;  %v1597_v43 = vld [vmem:[#allocation2 + $0x30] sm:$0xff] }
 0x153   : > { %v1299_v55 = vld [vmem:[#allocation2 + $0x2d8] sm:$0xff]  ;;  %v1196_v57 = vpop.f32.mrf.mxu0 }
 0x154   : > { %1529 = vst.msk [vmem:[#allocation2 + $0x2c0] sm:$0xff] %vm250_vm1, %v1497_v50  ;;  %v1500_v58 = vadd.f32 %v6419_v19, %v1299_v55  ;;  %1271 = vst.msk [vmem:[#allocation2 + $0x2f8] sm:$0xff] %vm250_vm1, %v1239_v51  ;;  %v1237_v59 = vadd.f32 %v1196_v57, %v1039_v12  ;;  %v1461_v60 = vpop.f32.mrf.mxu1  ;;  %v1906_v12 = vld [vmem:[#allocation2 + $0x120] sm:$0xff] }
 0x155   : > { %v1297_v63 = vld [vmem:[#allocation2 + $0x2c8] sm:$0xff]  ;;  %v6428_v2 = vpop.f32.mrf.mxu0  ;;  %6631 = vmatmul.mubr.msk.bf16.vlgmr.msra.gmra.mxu0 %vm250_vm1, %v7483_v22  ;;  %v1595_v51 = vld [vmem:[#allocation2 + $0x20] sm:$0xff] }
 0x156   : > { %1532 = vst.msk [vmem:[#allocation2 + $0x2d8] sm:$0xff] %vm250_vm1, %v1500_v58  ;;  %v1498_v4 = vadd.f32 %v1445_v27, %v1297_v63  ;;  %1269 = vst.msk [vmem:[#allocation2 + $0x2e8] sm:$0xff] %vm250_vm1, %v1237_v59  ;;  %v1839_v5 = vadd.f32 %v6428_v2, %v1593_v0  ;;  %v6462_v6 = vpop.f32.mrf.mxu1  ;;  %6665 = vmatmul.mubr.msk.bf16.vlgmr.msra.gmra.mxu1 %vm250_vm1, %v7483_v22  ;;  %6697 = vmatpush3.bf16.msra.mxu0 %v3880_v14  ;;  %v1909_v14 = vld [vmem:[#allocation2 + $0x138] sm:$0xff]  ;;  %v1907_v63 = vld [vmem:[#allocation2 + $0x128] sm:$0xff] }
 0x157   : > { %v1302_v9 = vld [vmem:[#allocation2 + $0x2f0] sm:$0xff]  ;;  %v2102_v10 = vadd.f32 %v6462_v6, %v1904_v61  ;;  %v1710_v13 = vpop.f32.mrf.mxu0  ;;  %6634 = vmatprep.mubr.msk.bf16.mxu0 %vm250_vm1, %v7487_v23  ;;  %6668 = vmatprep.mubr.msk.bf16.mxu1 %vm250_vm1, %v7487_v23  ;;  %v1598_v58 = vld [vmem:[#allocation2 + $0x38] sm:$0xff]  ;;  %v1596_v0 = vld [vmem:[#allocation2 + $0x28] sm:$0xff] }
 0x158   : > { %1530 = vst.msk [vmem:[#allocation2 + $0x2c8] sm:$0xff] %vm250_vm1, %v1498_v4  ;;  %v1503_v22 = vadd.f32 %v6422_v37, %v1302_v9  ;;  %1871 = vst.msk [vmem:[#allocation2 + $0x10] sm:$0xff] %vm250_vm1, %v1839_v5  ;;  %v1837_v15 = vadd.f32 %v1710_v13, %v1591_v11  ;;  %v1973_v16 = vpop.f32.mrf.mxu1  ;;  %6731 = vmatpush3.bf16.msra.mxu1 %v4145_v3  ;;  %6846 = vmatprep.subr.msk.bf16.mxu0 %vm515_vm0, %v7887_v62  ;;  %v1912_v5 = vld [vmem:[#allocation2 + $0x150] sm:$0xff]  ;;  %v1910_v13 = vld [vmem:[#allocation2 + $0x140] sm:$0xff] }
 0x159   : > { %v1300_v18 = vld [vmem:[#allocation2 + $0x2e0] sm:$0xff]  ;;  %2134 = vst.msk [vmem:[#allocation2 + $0x110] sm:$0xff] %vm250_vm1, %v2102_v10  ;;  %v2100_v19 = vadd.f32 %v1973_v16, %v1902_v7  ;;  %v6429_v21 = vpop.f32.mrf.mxu0  ;;  %6847 = vmatprep.subr.msk.bf16.mxu1 %vm515_vm0, %v7896_v1  ;;  %v1601_v7 = vld [vmem:[#allocation2 + $0x50] sm:$0xff] }
 0x15a   : > { %1535 = vst.msk [vmem:[#allocation2 + $0x2f0] sm:$0xff] %vm250_vm1, %v1503_v22  ;;  %v1501_v23 = vadd.f32 %v1458_v45, %v1300_v18  ;;  %1869 = vst.msk [vmem:[#allocation2] sm:$0xff] %vm250_vm1, %v1837_v15  ;;  %v1840_v24 = vadd.f32 %v6429_v21, %v1594_v20  ;;  %v6463_v25 = vpop.f32.mrf.mxu1  ;;  %v1599_v15 = vld [vmem:[#allocation2 + $0x40] sm:$0xff]  ;;  %v1602_v20 = vld [vmem:[#allocation2 + $0x58] sm:$0xff] }
 0x15b   : > { %v1303_v27 = vld [vmem:[#allocation2 + $0x2f8] sm:$0xff]  ;;  %2132 = vst.msk [vmem:[#allocation2 + $0x100] sm:$0xff] %vm250_vm1, %v2100_v19  ;;  %v2103_v30 = vadd.f32 %v6463_v25, %v1905_v17  ;;  %v1713_v32 = vpop.f32.mrf.mxu0  ;;  %v1911_v25 = vld [vmem:[#allocation2 + $0x148] sm:$0xff] }
 0x15c   : > { %1533 = vst.msk [vmem:[#allocation2 + $0x2e0] sm:$0xff] %vm250_vm1, %v1501_v23  ;;  %v1504_v33 = vadd.f32 %v6423_v54, %v1303_v27  ;;  %1872 = vst.msk [vmem:[#allocation2 + $0x18] sm:$0xff] %vm250_vm1, %v1840_v24  ;;  %v1838_v36 = vadd.f32 %v1713_v32, %v1592_v31  ;;  %v1976_v37 = vpop.f32.mrf.mxu1  ;;  %v1913_v19 = vld [vmem:[#allocation2 + $0x158] sm:$0xff]  ;;  %v1600_v27 = vld [vmem:[#allocation2 + $0x48] sm:$0xff] }
 0x15d   : > { %v1301_v39 = vld [vmem:[#allocation2 + $0x2e8] sm:$0xff]  ;;  %2135 = vst.msk [vmem:[#allocation2 + $0x118] sm:$0xff] %vm250_vm1, %v2103_v30  ;;  %v2101_v42 = vadd.f32 %v1976_v37, %v1903_v26  ;;  %v6432_v44 = vpop.f32.mrf.mxu0  ;;  %6635 = vmatmul.mubr.msk.bf16.gmra.mxu0 %vm250_vm1, %v7501_v28  ;;  %v1916_v32 = vld [vmem:[#allocation2 + $0x170] sm:$0xff] }
 0x15e   : > { %1536 = vst.msk [vmem:[#allocation2 + $0x2f8] sm:$0xff] %vm250_vm1, %v1504_v33  ;;  %v1502_v45 = vadd.f32 %v1461_v60, %v1301_v39  ;;  %1870 = vst.msk [vmem:[#allocation2 + $0x8] sm:$0xff] %vm250_vm1, %v1838_v36  ;;  %v1843_v48 = vadd.f32 %v6432_v44, %v1597_v43  ;;  %v6466_v49 = vpop.f32.mrf.mxu1  ;;  %6669 = vmatmul.mubr.msk.bf16.gmra.mxu1 %vm250_vm1, %v7501_v28  ;;  %6638 = vmatprep.mubr.msk.bf16.mxu0 %vm250_vm1, %v7503_v29  ;;  %v1605_v36 = vld [vmem:[#allocation2 + $0x70] sm:$0xff]  ;;  %v1603_v44 = vld [vmem:[#allocation2 + $0x60] sm:$0xff] }
 0x15f   : > { %2133 = vst.msk [vmem:[#allocation2 + $0x108] sm:$0xff] %vm250_vm1, %v2101_v42  ;;  %v2106_v50 = vadd.f32 %v6466_v49, %v1908_v38  ;;  %v1726_v54 = vpop.f32.mrf.mxu0  ;;  %6672 = vmatprep.mubr.msk.bf16.mxu1 %vm250_vm1, %v7503_v29  ;;  %v1914_v42 = vld [vmem:[#allocation2 + $0x160] sm:$0xff] }
 0x160   : > { %1534 = vst.msk [vmem:[#allocation2 + $0x2e8] sm:$0xff] %vm250_vm1, %v1502_v45  ;;  %1875 = vst.msk [vmem:[#allocation2 + $0x30] sm:$0xff] %vm250_vm1, %v1843_v48  ;;  %v1841_v55 = vadd.f32 %v1726_v54, %v1595_v51  ;;  %v1989_v57 = vpop.f32.mrf.mxu1 }
 0x161   : > { %2138 = vst.msk [vmem:[#allocation2 + $0x130] sm:$0xff] %vm250_vm1, %v2106_v50  ;;  %v2104_v28 = vadd.f32 %v1989_v57, %v1906_v12  ;;  %v6433_v59 = vpop.f32.mrf.mxu0  ;;  %v1917_v12 = vld [vmem:[#allocation2 + $0x178] sm:$0xff]  ;;  %v1915_v57 = vld [vmem:[#allocation2 + $0x168] sm:$0xff] }
 0x162   : > { %1873 = vst.msk [vmem:[#allocation2 + $0x20] sm:$0xff] %vm250_vm1, %v1841_v55  ;;  %v1844_v60 = vadd.f32 %v6433_v59, %v1598_v58  ;;  %v6467_v61 = vpop.f32.mrf.mxu1  ;;  %v1606_v50 = vld [vmem:[#allocation2 + $0x78] sm:$0xff] }
 0x163   : > { %2136 = vst.msk [vmem:[#allocation2 + $0x120] sm:$0xff] %vm250_vm1, %v2104_v28  ;;  %v2107_v29 = vadd.f32 %v6467_v61, %v1909_v14  ;;  %v1729_v2 = vpop.f32.mrf.mxu0  ;;  %v1604_v28 = vld [vmem:[#allocation2 + $0x68] sm:$0xff] }
 0x164   : > { %1876 = vst.msk [vmem:[#allocation2 + $0x38] sm:$0xff] %vm250_vm1, %v1844_v60  ;;  %v1842_v3 = vadd.f32 %v1729_v2, %v1596_v0  ;;  %v1992_v4 = vpop.f32.mrf.mxu1  ;;  %v1920_v60 = vld [vmem:[#allocation2 + $0x190] sm:$0xff] }
 0x165   : > { %2139 = vst.msk [vmem:[#allocation2 + $0x138] sm:$0xff] %vm250_vm1, %v2107_v29  ;;  %v2105_v6 = vadd.f32 %v1992_v4, %v1907_v63  ;;  %v6436_v9 = vpop.f32.mrf.mxu0  ;;  %6639 = vmatmul.mubr.msk.bf16.gmra.mxu0 %vm250_vm1, %v7517_v34  ;;  %v1609_v63 = vld [vmem:[#allocation2 + $0x90] sm:$0xff] }
 0x166   : > { %1874 = vst.msk [vmem:[#allocation2 + $0x28] sm:$0xff] %vm250_vm1, %v1842_v3  ;;  %v1847_v10 = vadd.f32 %v6436_v9, %v1601_v7  ;;  %v6470_v11 = vpop.f32.mrf.mxu1  ;;  %6673 = vmatmul.mubr.msk.bf16.gmra.mxu1 %vm250_vm1, %v7517_v34  ;;  %6642 = vmatprep.mubr.msk.bf16.mxu0 %vm250_vm1, %v7519_v35  ;;  %v1918_v3 = vld [vmem:[#allocation2 + $0x180] sm:$0xff] }
 0x167   : > { %2137 = vst.msk [vmem:[#allocation2 + $0x128] sm:$0xff] %vm250_vm1, %v2105_v6  ;;  %v2110_v22 = vadd.f32 %v6470_v11, %v1912_v5  ;;  %v1742_v16 = vpop.f32.mrf.mxu0  ;;  %6676 = vmatprep.mubr.msk.bf16.mxu1 %vm250_vm1, %v7519_v35  ;;  %v1607_v5 = vld [vmem:[#allocation2 + $0x80] sm:$0xff]  ;;  %v1610_v11 = vld [vmem:[#allocation2 + $0x98] sm:$0xff] }
 0x168   : > { %1879 = vst.msk [vmem:[#allocation2 + $0x50] sm:$0xff] %vm250_vm1, %v1847_v10  ;;  %v1845_v17 = vadd.f32 %v1742_v16, %v1599_v15  ;;  %v2005_v18 = vpop.f32.mrf.mxu1  ;;  %v1921_v10 = vld [vmem:[#allocation2 + $0x198] sm:$0xff]  ;;  %v1919_v16 = vld [vmem:[#allocation2 + $0x188] sm:$0xff] }
 0x169   : > { %2142 = vst.msk [vmem:[#allocation2 + $0x150] sm:$0xff] %vm250_vm1, %v2110_v22  ;;  %v2108_v34 = vadd.f32 %v2005_v18, %v1910_v13  ;;  %v6437_v21 = vpop.f32.mrf.mxu0  ;;  %v1608_v18 = vld [vmem:[#allocation2 + $0x88] sm:$0xff] }
 0x16a   : > { %1877 = vst.msk [vmem:[#allocation2 + $0x40] sm:$0xff] %vm250_vm1, %v1845_v17  ;;  %v1848_v23 = vadd.f32 %v6437_v21, %v1602_v20  ;;  %v6471_v24 = vpop.f32.mrf.mxu1  ;;  %v1924_v20 = vld [vmem:[#allocation2 + $0x1b0] sm:$0xff] }
 0x16b   : > { %2140 = vst.msk [vmem:[#allocation2 + $0x140] sm:$0xff] %vm250_vm1, %v2108_v34  ;;  %v2111_v26 = vadd.f32 %v6471_v24, %v1913_v19  ;;  %v1745_v35 = vpop.f32.mrf.mxu0 }
 0x16c   : > { %1880 = vst.msk [vmem:[#allocation2 + $0x58] sm:$0xff] %vm250_vm1, %v1848_v23  ;;  %v1846_v30 = vadd.f32 %v1745_v35, %v1600_v27  ;;  %v2008_v31 = vpop.f32.mrf.mxu1  ;;  %v1613_v23 = vld [vmem:[#allocation2 + $0xb0] sm:$0xff]  ;;  %v1922_v27 = vld [vmem:[#allocation2 + $0x1a0] sm:$0xff] }
 0x16d   : > { %2143 = vst.msk [vmem:[#allocation2 + $0x158] sm:$0xff] %vm250_vm1, %v2111_v26  ;;  %v2109_v33 = vadd.f32 %v2008_v31, %v1911_v25  ;;  %v6440_v37 = vpop.f32.mrf.mxu0  ;;  %6643 = vmatmul.mubr.msk.bf16.gmra.mxu0 %vm250_vm1, %v7533_v40 }
 0x16e   : > { %1878 = vst.msk [vmem:[#allocation2 + $0x48] sm:$0xff] %vm250_vm1, %v1846_v30  ;;  %v1851_v38 = vadd.f32 %v6440_v37, %v1605_v36  ;;  %v6474_v39 = vpop.f32.mrf.mxu1  ;;  %6677 = vmatmul.mubr.msk.bf16.gmra.mxu1 %vm250_vm1, %v7533_v40  ;;  %6646 = vmatprep.mubr.msk.bf16.mxu0 %vm250_vm1, %v7535_v41  ;;  %v1611_v30 = vld [vmem:[#allocation2 + $0xa0] sm:$0xff]  ;;  %v1925_v36 = vld [vmem:[#allocation2 + $0x1b8] sm:$0xff] }
 0x16f   : > { %2141 = vst.msk [vmem:[#allocation2 + $0x148] sm:$0xff] %vm250_vm1, %v2109_v33  ;;  %v2114_v43 = vadd.f32 %v6474_v39, %v1916_v32  ;;  %v1758_v45 = vpop.f32.mrf.mxu0  ;;  %6680 = vmatprep.mubr.msk.bf16.mxu1 %vm250_vm1, %v7535_v41  ;;  %v1614_v37 = vld [vmem:[#allocation2 + $0xb8] sm:$0xff] }
 0x170   : > { %1883 = vst.msk [vmem:[#allocation2 + $0x70] sm:$0xff] %vm250_vm1, %v1851_v38  ;;  %v1849_v48 = vadd.f32 %v1758_v45, %v1603_v44  ;;  %v2021_v49 = vpop.f32.mrf.mxu1  ;;  %v1612_v45 = vld [vmem:[#allocation2 + $0xa8] sm:$0xff] }
 0x171   : > { %2146 = vst.msk [vmem:[#allocation2 + $0x170] sm:$0xff] %vm250_vm1, %v2114_v43  ;;  %v2112_v40 = vadd.f32 %v2021_v49, %v1914_v42  ;;  %v6441_v51 = vpop.f32.mrf.mxu0  ;;  %v1923_v43 = vld [vmem:[#allocation2 + $0x1a8] sm:$0xff] }
 0x172   : > { %1881 = vst.msk [vmem:[#allocation2 + $0x60] sm:$0xff] %vm250_vm1, %v1849_v48  ;;  %v1852_v54 = vadd.f32 %v6441_v51, %v1606_v50  ;;  %v6475_v55 = vpop.f32.mrf.mxu1  ;;  %v1617_v50 = vld [vmem:[#allocation2 + $0xd0] sm:$0xff] }
 0x173   : > { %2144 = vst.msk [vmem:[#allocation2 + $0x160] sm:$0xff] %vm250_vm1, %v2112_v40  ;;  %v2115_v14 = vadd.f32 %v6475_v55, %v1917_v12  ;;  %v1761_v41 = vpop.f32.mrf.mxu0  ;;  %v1928_v12 = vld [vmem:[#allocation2 + $0x1d0] sm:$0xff] }
 0x174   : > { %1884 = vst.msk [vmem:[#allocation2 + $0x78] sm:$0xff] %vm250_vm1, %v1852_v54  ;;  %v1850_v58 = vadd.f32 %v1761_v41, %v1604_v28  ;;  %v2024_v59 = vpop.f32.mrf.mxu1  ;;  %v1572_v28 = vld [vmem:[%s6965_s27 + $0x1a1] sm:$0xff] }
 0x175   : > { %2147 = vst.msk [vmem:[#allocation2 + $0x178] sm:$0xff] %vm250_vm1, %v2115_v14  ;;  %v2113_v61 = vadd.f32 %v2024_v59, %v1915_v57  ;;  %v6444_v29 = vpop.f32.mrf.mxu0  ;;  %6647 = vmatmul.mubr.msk.bf16.gmra.mxu0 %vm250_vm1, %v7549_v46  ;;  %v1926_v57 = vld [vmem:[#allocation2 + $0x1c0] sm:$0xff] }
 0x176   : > { %1882 = vst.msk [vmem:[#allocation2 + $0x68] sm:$0xff] %vm250_vm1, %v1850_v58  ;;  %v1855_v0 = vadd.f32 %v6444_v29, %v1609_v63  ;;  %v6478_v2 = vpop.f32.mrf.mxu1  ;;  %6681 = vmatmul.mubr.msk.bf16.gmra.mxu1 %vm250_vm1, %v7549_v46  ;;  %6650 = vmatprep.mubr.msk.bf16.mxu0 %vm250_vm1, %v7551_v47  ;;  %v1571_v14 = vld [vmem:[%s6965_s27 + $0x199] sm:$0xff] }
 0x177   : > { %2145 = vst.msk [vmem:[#allocation2 + $0x168] sm:$0xff] %vm250_vm1, %v2113_v61  ;;  %v2118_v4 = vadd.f32 %v6478_v2, %v1920_v60  ;;  %v1774_v6 = vpop.f32.mrf.mxu0  ;;  %6684 = vmatprep.mubr.msk.bf16.mxu1 %vm250_vm1, %v7551_v47  ;;  %v1615_v58 = vld [vmem:[#allocation2 + $0xc0] sm:$0xff]  ;;  %v3744_v61 = vld [vmem:[%s6965_s27 + $0xa] sm:$0xff]  ;;  %v1929_v29 = vld [vmem:[#allocation2 + $0x1d8] sm:$0xff] }
 0x178   : > { %1887 = vst.msk [vmem:[#allocation2 + $0x90] sm:$0xff] %vm250_vm1, %v1855_v0  ;;  %v1853_v7 = vadd.f32 %v1774_v6, %v1607_v5  ;;  %v2037_v9 = vpop.f32.mrf.mxu1  ;;  %v3743_v60 = vld [vmem:[%s6965_s27 + $0x2] sm:$0xff]  ;;  %v1618_v2 = vld [vmem:[#allocation2 + $0xd8] sm:$0xff] }
 0x179   : > { %2150 = vst.msk [vmem:[#allocation2 + $0x190] sm:$0xff] %vm250_vm1, %v2118_v4  ;;  %v2116_v46 = vadd.f32 %v2037_v9, %v1918_v3  ;;  %v6445_v13 = vpop.f32.mrf.mxu0  ;;  %v1590_v4 = vpack.c.bf16 %v1572_v28, %v1571_v14  ;;  %v3745_v9 = vld [vmem:[%s6965_s27 + $0x1a] sm:$0xff] }
 0x17a   : > { %1885 = vst.msk [vmem:[#allocation2 + $0x80] sm:$0xff] %vm250_vm1, %v1853_v7  ;;  %v1856_v22 = vadd.f32 %v6445_v13, %v1610_v11  ;;  %v6479_v15 = vpop.f32.mrf.mxu1  ;;  %v3779_v7 = vpack.c.bf16 %v3744_v61, %v3743_v60  ;;  %v1616_v11 = vld [vmem:[#allocation2 + $0xc8] sm:$0xff]  ;;  %v2164_v28 = vld [vmem:[#allocation2] sm:$0xff] }
 0x17b   : > { %2148 = vst.msk [vmem:[#allocation2 + $0x180] sm:$0xff] %vm250_vm1, %v2116_v46  ;;  %v2119_v17 = vadd.f32 %v6479_v15, %v1921_v10  ;;  %v1777_v47 = vpop.f32.mrf.mxu0  ;;  %v3746_v10 = vld [vmem:[%s6965_s27 + $0x22] sm:$0xff] }
 0x17c   : > { %1888 = vst.msk [vmem:[#allocation2 + $0x98] sm:$0xff] %vm250_vm1, %v1856_v22  ;;  %v1854_v19 = vadd.f32 %v1777_v47, %v1608_v18  ;;  %v2040_v34 = vpop.f32.mrf.mxu1  ;;  %v1621_v18 = vld [vmem:[#allocation2 + $0xf0] sm:$0xff]  ;;  %v2429_v61 = vld [vmem:[#allocation2 + $0x100] sm:$0xff] }
 0x17d   : > { %2151 = vst.msk [vmem:[#allocation2 + $0x198] sm:$0xff] %vm250_vm1, %v2119_v17  ;;  %v2117_v21 = vadd.f32 %v2040_v34, %v1919_v16  ;;  %v6448_v24 = vpop.f32.mrf.mxu0  ;;  %6651 = vmatmul.mubr.msk.bf16.gmra.mxu0 %vm250_vm1, %v7565_v52  ;;  %v1932_v16 = vld [vmem:[#allocation2 + $0x1f0] sm:$0xff] }
 0x17e   : > { %1886 = vst.msk [vmem:[#allocation2 + $0x88] sm:$0xff] %vm250_vm1, %v1854_v19  ;;  %v1859_v25 = vadd.f32 %v6448_v24, %v1613_v23  ;;  %v6482_v26 = vpop.f32.mrf.mxu1  ;;  %6685 = vmatmul.mubr.msk.bf16.gmra.mxu1 %vm250_vm1, %v7565_v52  ;;  %6654 = vmatprep.mubr.msk.bf16.mxu0 %vm250_vm1, %v7567_v53  ;;  %v8020_v19 = vpack.c.bf16 %v3746_v10, %v3745_v9  ;;  %v1619_v24 = vld [vmem:[#allocation2 + $0xe0] sm:$0xff]  ;;  %v2165_v9 = vld [vmem:[#allocation2 + $0x8] sm:$0xff] }
 0x17f   : > { %2149 = vst.msk [vmem:[#allocation2 + $0x188] sm:$0xff] %vm250_vm1, %v2117_v21  ;;  %v2122_v35 = vadd.f32 %v6482_v26, %v1924_v20  ;;  %v1790_v31 = vpop.f32.mrf.mxu0  ;;  %6688 = vmatprep.mubr.msk.bf16.mxu1 %vm250_vm1, %v7567_v53  ;;  %v1930_v21 = vld [vmem:[#allocation2 + $0x1e0] sm:$0xff]  ;;  %v3747_v26 = vld [vmem:[%s6965_s27 + $0x32] sm:$0xff] }
 0x180   : > { %1891 = vst.msk [vmem:[#allocation2 + $0xb0] sm:$0xff] %vm250_vm1, %v1859_v25  ;;  %v1857_v32 = vadd.f32 %v1790_v31, %v1611_v30  ;;  %v2053_v33 = vpop.f32.mrf.mxu1  ;;  %v1933_v31 = vld [vmem:[#allocation2 + $0x1f8] sm:$0xff] }
 0x181   : > { %2154 = vst.msk [vmem:[#allocation2 + $0x1b0] sm:$0xff] %vm250_vm1, %v2122_v35  ;;  %v2120_v52 = vadd.f32 %v2053_v33, %v1922_v27  ;;  %v6449_v38 = vpop.f32.mrf.mxu0  ;;  %v3748_v27 = vld [vmem:[%s6965_s27 + $0x3a] sm:$0xff] }
 0x182   : > { %1889 = vst.msk [vmem:[#allocation2 + $0xa0] sm:$0xff] %vm250_vm1, %v1857_v32  ;;  %v1860_v39 = vadd.f32 %v6449_v38, %v1614_v37  ;;  %v6483_v42 = vpop.f32.mrf.mxu1  ;;  %v1622_v33 = vld [vmem:[#allocation2 + $0xf8] sm:$0xff]  ;;  %v1931_v38 = vld [vmem:[#allocation2 + $0x1e8] sm:$0xff] }
 0x183   : > { %2152 = vst.msk [vmem:[#allocation2 + $0x1a0] sm:$0xff] %vm250_vm1, %v2120_v52  ;;  %v2123_v44 = vadd.f32 %v6483_v42, %v1925_v36  ;;  %v1793_v53 = vpop.f32.mrf.mxu0 }
 0x184   : > { %1892 = vst.msk [vmem:[#allocation2 + $0xb8] sm:$0xff] %vm250_vm1, %v1860_v39  ;;  %v1858_v48 = vadd.f32 %v1793_v53, %v1612_v45  ;;  %v2056_v49 = vpop.f32.mrf.mxu1  ;;  %v8033_v39 = vpack.c.bf16 %v3748_v27, %v3747_v26  ;;  %v4407_v45 = vsel %vm515_vm0, %v7887_v62, 0  ;;  %v3749_v53 = vld [vmem:[%s6965_s27 + $0x4a] sm:$0xff]  ;;  %v3756_v26 = vld [vmem:[%s6965_s27 + $0x9a] sm:$0xff] }
 0x185   : > { %2155 = vst.msk [vmem:[#allocation2 + $0x1b8] sm:$0xff] %vm250_vm1, %v2123_v44  ;;  %v2121_v40 = vadd.f32 %v2056_v49, %v1923_v43  ;;  %v6452_v51 = vpop.f32.mrf.mxu0  ;;  %6655 = vmatmul.mubr.msk.bf16.gmra.mxu0 %vm250_vm1, %v7579_v56  ;;  %v1620_v43 = vld [vmem:[#allocation2 + $0xe8] sm:$0xff] }
 0x186   : > { %1890 = vst.msk [vmem:[#allocation2 + $0xa8] sm:$0xff] %vm250_vm1, %v1858_v48  ;;  %v1863_v54 = vadd.f32 %v6452_v51, %v1617_v50  ;;  %v6486_v55 = vpop.f32.mrf.mxu1  ;;  %6689 = vmatmul.mubr.msk.bf16.gmra.mxu1 %vm250_vm1, %v7579_v56  ;;  %6658 = vmatprep.mubr.msk.bf16.mxu0 %vm250_vm1, %v7710_v8  ;;  %v3750_v48 = vld [vmem:[%s6965_s27 + $0x52] sm:$0xff] }
 0x187   : > { %2153 = vst.msk [vmem:[#allocation2 + $0x1a8] sm:$0xff] %vm250_vm1, %v2121_v40  ;;  %v2126_v41 = vadd.f32 %v6486_v55, %v1928_v12  ;;  %v1806_v59 = vpop.f32.mrf.mxu0  ;;  %6692 = vmatprep.mubr.msk.bf16.mxu1 %vm250_vm1, %v7710_v8  ;;  %v1927_v8 = vld [vmem:[#allocation2 + $0x1c8] sm:$0xff]  ;;  %v4672_v40 = vsel %vm515_vm0, %v7896_v1, 0  ;;  %v2166_v51 = vld [vmem:[#allocation2 + $0x10] sm:$0xff]  ;;  %v8049_v1 = vpack.c.bf16 %v3750_v48, %v3749_v53 }
 0x188   : > { %1895 = vst.msk [vmem:[#allocation2 + $0xd0] sm:$0xff] %vm250_vm1, %v1863_v54  ;;  %v1861_v56 = vadd.f32 %v1806_v59, %v1615_v58  ;;  %v2069_v63 = vpop.f32.mrf.mxu1  ;;  %v2431_v55 = vld [vmem:[#allocation2 + $0x110] sm:$0xff]  ;;  %v3751_v58 = vld [vmem:[%s6965_s27 + $0x62] sm:$0xff] }
 0x189   : > { %2158 = vst.msk [vmem:[#allocation2 + $0x1d0] sm:$0xff] %vm250_vm1, %v2126_v41  ;;  %v2124_v0 = vadd.f32 %v2069_v63, %v1926_v57  ;;  %v6453_v3 = vpop.f32.mrf.mxu0  ;;  %v3752_v59 = vld [vmem:[%s6965_s27 + $0x6a] sm:$0xff]  ;;  %v3758_v53 = vld [vmem:[%s6965_s27 + $0xb2] sm:$0xff] }
 0x18a   : > { %1893 = vst.msk [vmem:[#allocation2 + $0xc0] sm:$0xff] %vm250_vm1, %v1861_v56  ;;  %v1864_v5 = vadd.f32 %v6453_v3, %v1618_v2  ;;  %v6487_v6 = vpop.f32.mrf.mxu1  ;;  %v2432_v3 = vld [vmem:[#allocation2 + $0x118] sm:$0xff] }
 0x18b   : > { %2156 = vst.msk [vmem:[#allocation2 + $0x1c0] sm:$0xff] %vm250_vm1, %v2124_v0  ;;  %v2127_v46 = vadd.f32 %v6487_v6, %v1929_v29  ;;  %v1809_v13 = vpop.f32.mrf.mxu0  ;;  %v2167_v29 = vld [vmem:[#allocation2 + $0x18] sm:$0xff] }
 0x18c   : > { %1896 = vst.msk [vmem:[#allocation2 + $0xd8] sm:$0xff] %vm250_vm1, %v1864_v5  ;;  %v1862_v22 = vadd.f32 %v1809_v13, %v1616_v11  ;;  %v2072_v15 = vpop.f32.mrf.mxu1  ;;  %v8061_v5 = vpack.c.bf16 %v3752_v59, %v3751_v58  ;;  %v3753_v6 = vld [vmem:[%s6965_s27 + $0x7a] sm:$0xff]  ;;  %v2430_v11 = vld [vmem:[#allocation2 + $0x108] sm:$0xff] }
 0x18d   : > { %2159 = vst.msk [vmem:[#allocation2 + $0x1d8] sm:$0xff] %vm250_vm1, %v2127_v46  ;;  %v2125_v17 = vadd.f32 %v2072_v15, %v1927_v8  ;;  %v6456_v47 = vpop.f32.mrf.mxu0  ;;  %6659 = vmatmul.mubr.msk.bf16.gmra.mxu0 %vm250_vm1, %v1590_v4  ;;  %v3754_v8 = vld [vmem:[%s6965_s27 + $0x82] sm:$0xff]  ;;  %v2170_v15 = vld [vmem:[#allocation2 + $0x30] sm:$0xff] }
 0x18e   : > { %1894 = vst.msk [vmem:[#allocation2 + $0xc8] sm:$0xff] %vm250_vm1, %v1862_v22  ;;  %v1867_v34 = vadd.f32 %v6456_v47, %v1621_v18  ;;  %v6490_v20 = vpop.f32.mrf.mxu1  ;;  %6693 = vmatmul.mubr.msk.bf16.gmra.mxu1 %vm250_vm1, %v1590_v4  ;;  %6698 = vmatprep.mubr.msk.bf16.mxu0 %vm250_vm1, %v3779_v7  ;;  %v8076_v18 = vld [vmem:[%s9025_s2] ss:$0 sm:$0xff] }
 0x18f   : > { %2157 = vst.msk [vmem:[#allocation2 + $0x1c8] sm:$0xff] %vm250_vm1, %v2125_v17  ;;  %v2130_v23 = vadd.f32 %v6490_v20, %v1932_v16  ;;  %v1822_v25 = vpop.f32.mrf.mxu0  ;;  %6732 = vmatprep.mubr.msk.bf16.mxu1 %vm250_vm1, %v8020_v19  ;;  %v8071_v17 = vpack.c.bf16 %v3754_v8, %v3753_v6  ;;  %v2437_v8 = vld [vmem:[#allocation2 + $0x140] sm:$0xff] }
 0x190   : > { %1899 = vst.msk [vmem:[#allocation2 + $0xf0] sm:$0xff] %vm250_vm1, %v1867_v34  ;;  %v1865_v35 = vadd.f32 %v1822_v25, %v1619_v24  ;;  %v2085_v30 = vpop.f32.mrf.mxu1  ;;  %v2435_v34 = vld [vmem:[#allocation2 + $0x130] sm:$0xff]  ;;  %v2168_v24 = vld [vmem:[#allocation2 + $0x20] sm:$0xff] }
 0x191   : > { %2162 = vst.msk [vmem:[#allocation2 + $0x1f0] sm:$0xff] %vm250_vm1, %v2130_v23  ;;  %v2128_v32 = vadd.f32 %v2085_v30, %v1930_v21  ;;  %v6457_v36 = vpop.f32.mrf.mxu0  ;;  %v3755_v21 = vld [vmem:[%s6965_s27 + $0x92] sm:$0xff]  ;;  %v2433_v30 = vld [vmem:[#allocation2 + $0x120] sm:$0xff] }
 0x192   : > { %1897 = vst.msk [vmem:[#allocation2 + $0xe0] sm:$0xff] %vm250_vm1, %v1865_v35  ;;  %v1868_v52 = vadd.f32 %v6457_v36, %v1622_v33  ;;  %v6491_v37 = vpop.f32.mrf.mxu1  ;;  %v2171_v36 = vld [vmem:[#allocation2 + $0x38] sm:$0xff] }
 0x193   : > { %2160 = vst.msk [vmem:[#allocation2 + $0x1e0] sm:$0xff] %vm250_vm1, %v2128_v32  ;;  %v2131_v42 = vadd.f32 %v6491_v37, %v1933_v31  ;;  %v1825_v44 = vpop.f32.mrf.mxu0 }
 0x194   : > { %1900 = vst.msk [vmem:[#allocation2 + $0xf8] sm:$0xff] %vm250_vm1, %v1868_v52  ;;  %v1866_v49 = vadd.f32 %v1825_v44, %v1620_v43  ;;  %v2088_v12 = vpop.f32.mrf.mxu1  ;;  %v8097_v44 = vpack.c.bf16 %v3756_v26, %v3755_v21 }
 0x195   : > { %2163 = vst.msk [vmem:[#allocation2 + $0x1f8] sm:$0xff] %vm250_vm1, %v2131_v42  ;;  %v2129_v50 = vadd.f32 %v2088_v12, %v1931_v38  ;;  %v6496_v54 = vpop.f32.mrf.mxu0  ;;  %6699 = vmatmul.mubr.msk.bf16.vlgmr.msra.gmra.mxu0 %vm250_vm1, %v8020_v19  ;;  %v2436_v42 = vld [vmem:[#allocation2 + $0x138] sm:$0xff]  ;;  %v2169_v12 = vld [vmem:[#allocation2 + $0x28] sm:$0xff] }
 0x196   : > { %1898 = vst.msk [vmem:[#allocation2 + $0xe8] sm:$0xff] %vm250_vm1, %v1866_v49  ;;  %v2367_v62 = vadd.f32 %v6496_v54, %v2166_v51  ;;  %v6530_v57 = vpop.f32.mrf.mxu1  ;;  %6765 = vmatpush3.bf16.msra.mxu0 %v4407_v45  ;;  %6733 = vmatmul.mubr.msk.bf16.vlgmr.msra.gmra.mxu1 %vm250_vm1, %v8033_v39  ;;  %v3757_v45 = vld [vmem:[%s6965_s27 + $0xaa] sm:$0xff] }
 0x197   : > { %2161 = vst.msk [vmem:[#allocation2 + $0x1e8] sm:$0xff] %vm250_vm1, %v2129_v50  ;;  %v2629_v14 = vadd.f32 %v6530_v57, %v2431_v55  ;;  %v2238_v41 = vpop.f32.mrf.mxu0  ;;  %6702 = vmatprep.mubr.msk.bf16.mxu0 %vm250_vm1, %v8033_v39  ;;  %6799 = vmatpush3.bf16.msra.mxu1 %v4672_v40  ;;  %v2434_v54 = vld [vmem:[#allocation2 + $0x128] sm:$0xff] }
 0x198   : > { %2399 = vst.msk [vmem:[#allocation2 + $0x10] sm:$0xff] %vm250_vm1, %v2367_v62  ;;  %v2365_v60 = vadd.f32 %v2238_v41, %v2164_v28  ;;  %v2500_v56 = vpop.f32.mrf.mxu1  ;;  %6736 = vmatprep.mubr.msk.bf16.mxu1 %vm250_vm1, %v8049_v1  ;;  %v8112_v41 = vpack.c.bf16 %v3758_v53, %v3757_v45  ;;  %v3763_v45 = vld [vmem:[%s6965_s27 + $0xf2] sm:$0xff] }
 0x199   : > { %2661 = vst.msk [vmem:[#allocation2 + $0x110] sm:$0xff] %vm250_vm1, %v2629_v14  ;;  %v2627_v63 = vadd.f32 %v2500_v56, %v2429_v61  ;;  %v6497_v0 = vpop.f32.mrf.mxu0  ;;  %v2174_v14 = vld [vmem:[#allocation2 + $0x50] sm:$0xff]  ;;  %v3759_v56 = vld [vmem:[%s6965_s27 + $0xc2] sm:$0xff] }
 0x19a   : > { %2397 = vst.msk [vmem:[#allocation2] sm:$0xff] %vm250_vm1, %v2365_v60  ;;  %v2368_v2 = vadd.f32 %v6497_v0, %v2167_v29  ;;  %v6531_v4 = vpop.f32.mrf.mxu1  ;;  %v2439_v60 = vld [vmem:[#allocation2 + $0x150] sm:$0xff]  ;;  %v2172_v0 = vld [vmem:[#allocation2 + $0x40] sm:$0xff] }
 0x19b   : > { %2659 = vst.msk [vmem:[#allocation2 + $0x100] sm:$0xff] %vm250_vm1, %v2627_v63  ;;  %v2630_v7 = vadd.f32 %v6531_v4, %v2432_v3  ;;  %v2241_v10 = vpop.f32.mrf.mxu0  ;;  %v3760_v3 = vld [vmem:[%s6965_s27 + $0xca] sm:$0xff] }
 0x19c   : > { %2400 = vst.msk [vmem:[#allocation2 + $0x18] sm:$0xff] %vm250_vm1, %v2368_v2  ;;  %v2366_v46 = vadd.f32 %v2241_v10, %v2165_v9  ;;  %v2503_v13 = vpop.f32.mrf.mxu1 }
 0x19d   : > { %2662 = vst.msk [vmem:[#allocation2 + $0x118] sm:$0xff] %vm250_vm1, %v2630_v7  ;;  %v2628_v22 = vadd.f32 %v2503_v13, %v2430_v11  ;;  %v6500_v16 = vpop.f32.mrf.mxu0  ;;  %6703 = vmatmul.mubr.msk.bf16.gmra.mxu0 %vm250_vm1, %v8049_v1 }
 0x19e   : > { %2398 = vst.msk [vmem:[#allocation2 + $0x8] sm:$0xff] %vm250_vm1, %v2366_v46  ;;  %v2371_v47 = vadd.f32 %v6500_v16, %v2170_v15  ;;  %v6534_v20 = vpop.f32.mrf.mxu1  ;;  %6737 = vmatmul.mubr.msk.bf16.gmra.mxu1 %vm250_vm1, %v8061_v5  ;;  %6706 = vmatprep.mubr.msk.bf16.mxu0 %vm250_vm1, %v8061_v5  ;;  %v2175_v46 = vld [vmem:[#allocation2 + $0x58] sm:$0xff] }
 0x19f   : > { %2660 = vst.msk [vmem:[#allocation2 + $0x108] sm:$0xff] %vm250_vm1, %v2628_v22  ;;  %v2633_v23 = vadd.f32 %v6534_v20, %v2435_v34  ;;  %v2254_v25 = vpop.f32.mrf.mxu0  ;;  %6740 = vmatprep.mubr.msk.bf16.mxu1 %vm250_vm1, %v8071_v17  ;;  %v4905_v27 = vld [vmem:[#allocation2 + $0x10] sm:$0xff]  ;;  %v2440_v15 = vld [vmem:[#allocation2 + $0x158] sm:$0xff]  ;;  %v3762_v20 = vld [vmem:[%s6965_s27 + $0xe2] sm:$0xff] }
 0x1a0   : > { %2403 = vst.msk [vmem:[#allocation2 + $0x30] sm:$0xff] %vm250_vm1, %v2371_v47  ;;  %v2369_v35 = vadd.f32 %v2254_v25, %v2168_v24  ;;  %v2516_v31 = vpop.f32.mrf.mxu1  ;;  %v4943_v32 = vadd.f32 %v8076_v18, %v4905_v27  ;;  %v8133_v47 = vpack.c.bf16 %v3760_v3, %v3759_v56  ;;  %v3761_v34 = vld [vmem:[%s6965_s27 + $0xda] sm:$0xff]  ;;  %v2173_v24 = vld [vmem:[#allocation2 + $0x48] sm:$0xff] }
 0x1a1   : > { %2665 = vst.msk [vmem:[#allocation2 + $0x130] sm:$0xff] %vm250_vm1, %v2633_v23  ;;  %v2631_v33 = vadd.f32 %v2516_v31, %v2433_v30  ;;  %v6501_v52 = vpop.f32.mrf.mxu0  ;;  %v4903_v37 = vld [vmem:[#allocation2] sm:$0xff]  ;;  %v2177_v3 = vld [vmem:[#allocation2 + $0x68] sm:$0xff] }
 0x1a2   : > { %2401 = vst.msk [vmem:[#allocation2 + $0x20] sm:$0xff] %vm250_vm1, %v2369_v35  ;;  %v2372_v38 = vadd.f32 %v6501_v52, %v2171_v36  ;;  %v6535_v43 = vpop.f32.mrf.mxu1  ;;  %4975 = vst.msk [vmem:[%s8087_s7 + $0x20] sm:$0xff] %vm250_vm1, %v4943_v32  ;;  %v4941_v48 = vadd.f32 %v8076_v18, %v4903_v37  ;;  %v2438_v35 = vld [vmem:[#allocation2 + $0x148] sm:$0xff]  ;;  %v8148_v52 = vpack.c.bf16 %v3762_v20, %v3761_v34  ;;  %v2447_v34 = vld [vmem:[#allocation2 + $0x190] sm:$0xff] }
 0x1a3   : > { %2663 = vst.msk [vmem:[#allocation2 + $0x120] sm:$0xff] %vm250_vm1, %v2631_v33  ;;  %v2634_v49 = vadd.f32 %v6535_v43, %v2436_v42  ;;  %v2257_v40 = vpop.f32.mrf.mxu0  ;;  %v4906_v50 = vld [vmem:[#allocation2 + $0x18] sm:$0xff]  ;;  %v2178_v33 = vld [vmem:[#allocation2 + $0x70] sm:$0xff] }
 0x1a4   : > { %2404 = vst.msk [vmem:[#allocation2 + $0x38] sm:$0xff] %vm250_vm1, %v2372_v38  ;;  %v2370_v51 = vadd.f32 %v2257_v40, %v2169_v12  ;;  %v2519_v62 = vpop.f32.mrf.mxu1  ;;  %4973 = vst.msk [vmem:[%s8087_s7] sm:$0xff] %vm250_vm1, %v4941_v48  ;;  %v4944_v55 = vadd.f32 %v8076_v18, %v4906_v50  ;;  %v2443_v42 = vld [vmem:[#allocation2 + $0x170] sm:$0xff]  ;;  %v3764_v40 = vld [vmem:[%s6965_s27 + $0xfa] sm:$0xff] }
 0x1a5   : > { %2666 = vst.msk [vmem:[#allocation2 + $0x138] sm:$0xff] %vm250_vm1, %v2634_v49  ;;  %v2632_v57 = vadd.f32 %v2519_v62, %v2434_v54  ;;  %v6504_v28 = vpop.f32.mrf.mxu0  ;;  %6707 = vmatmul.mubr.msk.bf16.gmra.mxu0 %vm250_vm1, %v8071_v17  ;;  %v4904_v58 = vld [vmem:[#allocation2 + $0x8] sm:$0xff]  ;;  %v2176_v49 = vld [vmem:[#allocation2 + $0x60] sm:$0xff]  ;;  %v8169_v56 = vpack.c.bf16 %v3764_v40, %v3763_v45  ;;  %v2448_v45 = vld [vmem:[#allocation2 + $0x198] sm:$0xff] }
 0x1a6   : > { %2402 = vst.msk [vmem:[#allocation2 + $0x28] sm:$0xff] %vm250_vm1, %v2370_v51  ;;  %v2375_v59 = vadd.f32 %v6504_v28, %v2174_v14  ;;  %v6538_v61 = vpop.f32.mrf.mxu1  ;;  %6741 = vmatmul.mubr.msk.bf16.gmra.mxu1 %vm250_vm1, %v8097_v44  ;;  %6710 = vmatprep.mubr.msk.bf16.mxu0 %vm250_vm1, %v8097_v44  ;;  %4976 = vst.msk [vmem:[%s8087_s7 + $0x28] sm:$0xff] %vm250_vm1, %v4944_v55  ;;  %v4942_v63 = vadd.f32 %v8076_v18, %v4904_v58  ;;  %v2441_v54 = vld [vmem:[#allocation2 + $0x160] sm:$0xff]  ;;  %v2179_v14 = vld [vmem:[#allocation2 + $0x78] sm:$0xff] }
 0x1a7   : > { %2664 = vst.msk [vmem:[#allocation2 + $0x128] sm:$0xff] %vm250_vm1, %v2632_v57  ;;  %v2637_v29 = vadd.f32 %v6538_v61, %v2439_v60  ;;  %v2270_v2 = vpop.f32.mrf.mxu0  ;;  %6744 = vmatprep.mubr.msk.bf16.mxu1 %vm250_vm1, %v8112_v41  ;;  %v4909_v4 = vld [vmem:[#allocation2 + $0x30] sm:$0xff]  ;;  %v2444_v60 = vld [vmem:[#allocation2 + $0x178] sm:$0xff] }
 0x1a8   : > { %2407 = vst.msk [vmem:[#allocation2 + $0x50] sm:$0xff] %vm250_vm1, %v2375_v59  ;;  %v2373_v6 = vadd.f32 %v2270_v2, %v2172_v0  ;;  %v2532_v7 = vpop.f32.mrf.mxu1  ;;  %4974 = vst.msk [vmem:[%s8087_s7 + $0x8] sm:$0xff] %vm250_vm1, %v4942_v63  ;;  %v4947_v9 = vadd.f32 %v8076_v18, %v4909_v4  ;;  %v3765_v63 = vld [vmem:[%s6965_s27 + $0x10a] sm:$0xff] }
 0x1a9   : > { %2669 = vst.msk [vmem:[#allocation2 + $0x150] sm:$0xff] %vm250_vm1, %v2637_v29  ;;  %v2635_v10 = vadd.f32 %v2532_v7, %v2437_v8  ;;  %v6505_v11 = vpop.f32.mrf.mxu0  ;;  %v4907_v13 = vld [vmem:[#allocation2 + $0x20] sm:$0xff]  ;;  %v3766_v29 = vld [vmem:[%s6965_s27 + $0x112] sm:$0xff]  ;;  %v2442_v7 = vld [vmem:[#allocation2 + $0x168] sm:$0xff] }
 0x1aa   : > { %2405 = vst.msk [vmem:[#allocation2 + $0x40] sm:$0xff] %vm250_vm1, %v2373_v6  ;;  %v2376_v22 = vadd.f32 %v6505_v11, %v2175_v46  ;;  %v6539_v16 = vpop.f32.mrf.mxu1  ;;  %4979 = vst.msk [vmem:[%s8087_s7 + $0x60] sm:$0xff] %vm250_vm1, %v4947_v9  ;;  %v4945_v21 = vadd.f32 %v8076_v18, %v4907_v13  ;;  %v2182_v11 = vld [vmem:[#allocation2 + $0x90] sm:$0xff] }
 0x1ab   : > { %2667 = vst.msk [vmem:[#allocation2 + $0x140] sm:$0xff] %vm250_vm1, %v2635_v10  ;;  %v2638_v23 = vadd.f32 %v6539_v16, %v2440_v15  ;;  %v2273_v25 = vpop.f32.mrf.mxu0  ;;  %v4910_v26 = vld [vmem:[#allocation2 + $0x38] sm:$0xff] }
 0x1ac   : > { %2408 = vst.msk [vmem:[#allocation2 + $0x58] sm:$0xff] %vm250_vm1, %v2376_v22  ;;  %v2374_v27 = vadd.f32 %v2273_v25, %v2173_v24  ;;  %v2535_v30 = vpop.f32.mrf.mxu1  ;;  %v4948_v31 = vadd.f32 %v8076_v18, %v4910_v26  ;;  %4977 = vst.msk [vmem:[%s8087_s7 + $0x40] sm:$0xff] %vm250_vm1, %v4945_v21  ;;  %v8184_v22 = vpack.c.bf16 %v3766_v29, %v3765_v63  ;;  %v3767_v21 = vld [vmem:[%s6965_s27 + $0x122] sm:$0xff] }
 0x1ad   : > { %2670 = vst.msk [vmem:[#allocation2 + $0x158] sm:$0xff] %vm250_vm1, %v2638_v23  ;;  %v2636_v32 = vadd.f32 %v2535_v30, %v2438_v35  ;;  %v6508_v36 = vpop.f32.mrf.mxu0  ;;  %6711 = vmatmul.mubr.msk.bf16.gmra.mxu0 %vm250_vm1, %v8112_v41  ;;  %v4908_v37 = vld [vmem:[#allocation2 + $0x28] sm:$0xff]  ;;  %v2180_v25 = vld [vmem:[#allocation2 + $0x80] sm:$0xff] }
 0x1ae   : > { %2406 = vst.msk [vmem:[#allocation2 + $0x48] sm:$0xff] %vm250_vm1, %v2374_v27  ;;  %v2379_v38 = vadd.f32 %v6508_v36, %v2178_v33  ;;  %v6542_v43 = vpop.f32.mrf.mxu1  ;;  %6745 = vmatmul.mubr.msk.bf16.gmra.mxu1 %vm250_vm1, %v8133_v47  ;;  %6714 = vmatprep.mubr.msk.bf16.mxu0 %vm250_vm1, %v8133_v47  ;;  %4980 = vst.msk [vmem:[%s8087_s7 + $0x68] sm:$0xff] %vm250_vm1, %v4948_v31  ;;  %v4946_v53 = vadd.f32 %v8076_v18, %v4908_v37  ;;  %v3768_v27 = vld [vmem:[%s6965_s27 + $0x12a] sm:$0xff]  ;;  %v2445_v31 = vld [vmem:[#allocation2 + $0x180] sm:$0xff] }
 0x1af   : > { %2668 = vst.msk [vmem:[#allocation2 + $0x148] sm:$0xff] %vm250_vm1, %v2636_v32  ;;  %v2641_v48 = vadd.f32 %v6542_v43, %v2443_v42  ;;  %v2286_v12 = vpop.f32.mrf.mxu0  ;;  %6748 = vmatprep.mubr.msk.bf16.mxu1 %vm250_vm1, %v8148_v52  ;;  %v4913_v50 = vld [vmem:[#allocation2 + $0x50] sm:$0xff]  ;;  %v2183_v37 = vld [vmem:[#allocation2 + $0x98] sm:$0xff] }
 0x1b0   : > { %2411 = vst.msk [vmem:[#allocation2 + $0x70] sm:$0xff] %vm250_vm1, %v2379_v38  ;;  %v2377_v51 = vadd.f32 %v2286_v12, %v2176_v49  ;;  %v2548_v62 = vpop.f32.mrf.mxu1  ;;  %4978 = vst.msk [vmem:[%s8087_s7 + $0x48] sm:$0xff] %vm250_vm1, %v4946_v53  ;;  %v4951_v55 = vadd.f32 %v8076_v18, %v4913_v50  ;;  %v3769_v49 = vld [vmem:[%s6965_s27 + $0x13a] sm:$0xff]  ;;  %v3770_v12 = vld [vmem:[%s6965_s27 + $0x142] sm:$0xff] }
 0x1b1   : > { %2673 = vst.msk [vmem:[#allocation2 + $0x170] sm:$0xff] %vm250_vm1, %v2641_v48  ;;  %v2639_v57 = vadd.f32 %v2548_v62, %v2441_v54  ;;  %v6509_v28 = vpop.f32.mrf.mxu0  ;;  %v4911_v58 = vld [vmem:[#allocation2 + $0x40] sm:$0xff]  ;;  %v8205_v48 = vpack.c.bf16 %v3768_v27, %v3767_v21  ;;  %v3773_v27 = vld [vmem:[%s6965_s27 + $0x16a] sm:$0xff] }
 0x1b2   : > { %2409 = vst.msk [vmem:[#allocation2 + $0x60] sm:$0xff] %vm250_vm1, %v2377_v51  ;;  %v2380_v59 = vadd.f32 %v6509_v28, %v2179_v14  ;;  %v6543_v61 = vpop.f32.mrf.mxu1  ;;  %4983 = vst.msk [vmem:[%s8087_s7 + $0xa0] sm:$0xff] %vm250_vm1, %v4951_v55  ;;  %v4949_v0 = vadd.f32 %v8076_v18, %v4911_v58  ;;  %v2181_v51 = vld [vmem:[#allocation2 + $0x88] sm:$0xff] }
 0x1b3   : > { %2671 = vst.msk [vmem:[#allocation2 + $0x160] sm:$0xff] %vm250_vm1, %v2639_v57  ;;  %v2642_v2 = vadd.f32 %v6543_v61, %v2444_v60  ;;  %v2289_v4 = vpop.f32.mrf.mxu0  ;;  %v4914_v6 = vld [vmem:[#allocation2 + $0x58] sm:$0xff]  ;;  %v2446_v57 = vld [vmem:[#allocation2 + $0x188] sm:$0xff]  ;;  %v8220_v61 = vpack.c.bf16 %v3770_v12, %v3769_v49 }
 0x1b4   : > { %2412 = vst.msk [vmem:[#allocation2 + $0x78] sm:$0xff] %vm250_vm1, %v2380_v59  ;;  %v2378_v8 = vadd.f32 %v2289_v4, %v2177_v3  ;;  %v2551_v9 = vpop.f32.mrf.mxu1  ;;  %v4952_v10 = vadd.f32 %v8076_v18, %v4914_v6  ;;  %4981 = vst.msk [vmem:[%s8087_s7 + $0x80] sm:$0xff] %vm250_vm1, %v4949_v0  ;;  %v2186_v59 = vld [vmem:[#allocation2 + $0xb0] sm:$0xff] }
 0x1b5   : > { %2674 = vst.msk [vmem:[#allocation2 + $0x178] sm:$0xff] %vm250_vm1, %v2642_v2  ;;  %v2640_v46 = vadd.f32 %v2551_v9, %v2442_v7  ;;  %v6512_v13 = vpop.f32.mrf.mxu0  ;;  %6715 = vmatmul.mubr.msk.bf16.gmra.mxu0 %vm250_vm1, %v8148_v52  ;;  %v4912_v15 = vld [vmem:[#allocation2 + $0x48] sm:$0xff]  ;;  %v2451_v0 = vld [vmem:[#allocation2 + $0x1b0] sm:$0xff]  ;;  %v3772_v9 = vld [vmem:[%s6965_s27 + $0x15a] sm:$0xff] }
 0x1b6   : > { %2410 = vst.msk [vmem:[#allocation2 + $0x68] sm:$0xff] %vm250_vm1, %v2378_v8  ;;  %v2383_v16 = vadd.f32 %v6512_v13, %v2182_v11  ;;  %v6546_v20 = vpop.f32.mrf.mxu1  ;;  %6749 = vmatmul.mubr.msk.bf16.gmra.mxu1 %vm250_vm1, %v8169_v56  ;;  %6718 = vmatprep.mubr.msk.bf16.mxu0 %vm250_vm1, %v8169_v56  ;;  %4984 = vst.msk [vmem:[%s8087_s7 + $0xa8] sm:$0xff] %vm250_vm1, %v4952_v10  ;;  %v4950_v23 = vadd.f32 %v8076_v18, %v4912_v15  ;;  %v3771_v3 = vld [vmem:[%s6965_s27 + $0x152] sm:$0xff]  ;;  %v2184_v8 = vld [vmem:[#allocation2 + $0xa0] sm:$0xff] }
 0x1b7   : > { %2672 = vst.msk [vmem:[#allocation2 + $0x168] sm:$0xff] %vm250_vm1, %v2640_v46  ;;  %v2645_v24 = vadd.f32 %v6546_v20, %v2447_v34  ;;  %v2302_v26 = vpop.f32.mrf.mxu0  ;;  %6752 = vmatprep.mubr.msk.bf16.mxu1 %vm250_vm1, %v8184_v22  ;;  %v4917_v35 = vld [vmem:[#allocation2 + $0x70] sm:$0xff]  ;;  %v2449_v11 = vld [vmem:[#allocation2 + $0x1a0] sm:$0xff]  ;;  %v2187_v34 = vld [vmem:[#allocation2 + $0xb8] sm:$0xff] }
 0x1b8   : > { %2415 = vst.msk [vmem:[#allocation2 + $0x90] sm:$0xff] %vm250_vm1, %v2383_v16  ;;  %v2381_v30 = vadd.f32 %v2302_v26, %v2180_v25  ;;  %v2564_v32 = vpop.f32.mrf.mxu1  ;;  %4982 = vst.msk [vmem:[%s8087_s7 + $0x88] sm:$0xff] %vm250_vm1, %v4950_v23  ;;  %v4955_v33 = vadd.f32 %v8076_v18, %v4917_v35  ;;  %v8241_v26 = vpack.c.bf16 %v3772_v9, %v3771_v3  ;;  %v3774_v35 = vld [vmem:[%s6965_s27 + $0x172] sm:$0xff] }
 0x1b9   : > { %2677 = vst.msk [vmem:[#allocation2 + $0x190] sm:$0xff] %vm250_vm1, %v2645_v24  ;;  %v2643_v36 = vadd.f32 %v2564_v32, %v2445_v31  ;;  %v6513_v38 = vpop.f32.mrf.mxu0  ;;  %v4915_v42 = vld [vmem:[#allocation2 + $0x60] sm:$0xff]  ;;  %v2452_v24 = vld [vmem:[#allocation2 + $0x1b8] sm:$0xff]  ;;  %v2185_v32 = vld [vmem:[#allocation2 + $0xa8] sm:$0xff]  ;;  %v8256_v12 = vpack.c.bf16 %v3774_v35, %v3773_v27 }
 0x1ba   : > { %2413 = vst.msk [vmem:[#allocation2 + $0x80] sm:$0xff] %vm250_vm1, %v2381_v30  ;;  %v2384_v43 = vadd.f32 %v6513_v38, %v2183_v37  ;;  %v6547_v53 = vpop.f32.mrf.mxu1  ;;  %4987 = vst.msk [vmem:[%s8087_s7 + $0xe0] sm:$0xff] %vm250_vm1, %v4955_v33  ;;  %v4953_v40 = vadd.f32 %v8076_v18, %v4915_v42  ;;  %v2450_v38 = vld [vmem:[#allocation2 + $0x1a8] sm:$0xff]  ;;  %v2191_v3 = vld [vmem:[#allocation2 + $0xd8] sm:$0xff] }
 0x1bb   : > { %2675 = vst.msk [vmem:[#allocation2 + $0x180] sm:$0xff] %vm250_vm1, %v2643_v36  ;;  %v2646_v50 = vadd.f32 %v6547_v53, %v2448_v45  ;;  %v2305_v54 = vpop.f32.mrf.mxu0  ;;  %v4918_v62 = vld [vmem:[#allocation2 + $0x78] sm:$0xff]  ;;  %v2190_v53 = vld [vmem:[#allocation2 + $0xd0] sm:$0xff] }
 0x1bc   : > { %2416 = vst.msk [vmem:[#allocation2 + $0x98] sm:$0xff] %vm250_vm1, %v2384_v43  ;;  %v2382_v55 = vadd.f32 %v2305_v54, %v2181_v51  ;;  %v2567_v14 = vpop.f32.mrf.mxu1  ;;  %v4956_v28 = vadd.f32 %v8076_v18, %v4918_v62  ;;  %4985 = vst.msk [vmem:[%s8087_s7 + $0xc0] sm:$0xff] %vm250_vm1, %v4953_v40  ;;  %v2455_v51 = vld [vmem:[#allocation2 + $0x1d0] sm:$0xff]  ;;  %v3775_v62 = vld [vmem:[%s6965_s27 + $0x182] sm:$0xff] }
 0x1bd   : > { %2678 = vst.msk [vmem:[#allocation2 + $0x198] sm:$0xff] %vm250_vm1, %v2646_v50  ;;  %v2644_v58 = vadd.f32 %v2567_v14, %v2446_v57  ;;  %v6516_v60 = vpop.f32.mrf.mxu0  ;;  %6719 = vmatmul.mubr.msk.bf16.gmra.mxu0 %vm250_vm1, %v8184_v22  ;;  %v4916_v63 = vld [vmem:[#allocation2 + $0x68] sm:$0xff]  ;;  %v2188_v14 = vld [vmem:[#allocation2 + $0xc0] sm:$0xff] }
 0x1be   : > { %2414 = vst.msk [vmem:[#allocation2 + $0x88] sm:$0xff] %vm250_vm1, %v2382_v55  ;;  %v2387_v29 = vadd.f32 %v6516_v60, %v2186_v59  ;;  %v6550_v2 = vpop.f32.mrf.mxu1  ;;  %6753 = vmatmul.mubr.msk.bf16.gmra.mxu1 %vm250_vm1, %v8205_v48  ;;  %6722 = vmatprep.mubr.msk.bf16.mxu0 %vm250_vm1, %v8205_v48  ;;  %4988 = vst.msk [vmem:[%s8087_s7 + $0xe8] sm:$0xff] %vm250_vm1, %v4956_v28  ;;  %v4954_v4 = vadd.f32 %v8076_v18, %v4916_v63  ;;  %v2453_v63 = vld [vmem:[#allocation2 + $0x1c0] sm:$0xff] }
 0x1bf   : > { %2676 = vst.msk [vmem:[#allocation2 + $0x188] sm:$0xff] %vm250_vm1, %v2644_v58  ;;  %v2649_v6 = vadd.f32 %v6550_v2, %v2451_v0  ;;  %v2318_v7 = vpop.f32.mrf.mxu0  ;;  %6756 = vmatprep.mubr.msk.bf16.mxu1 %vm250_vm1, %v8220_v61  ;;  %v4921_v10 = vld [vmem:[#allocation2 + $0x90] sm:$0xff] }
 0x1c0   : > { %2419 = vst.msk [vmem:[#allocation2 + $0xb0] sm:$0xff] %vm250_vm1, %v2387_v29  ;;  %v2385_v46 = vadd.f32 %v2318_v7, %v2184_v8  ;;  %v2580_v13 = vpop.f32.mrf.mxu1  ;;  %4986 = vst.msk [vmem:[%s8087_s7 + $0xc8] sm:$0xff] %vm250_vm1, %v4954_v4  ;;  %v4959_v15 = vadd.f32 %v8076_v18, %v4921_v10  ;;  %v3776_v58 = vld [vmem:[%s6965_s27 + $0x18a] sm:$0xff]  ;;  %v2456_v7 = vld [vmem:[#allocation2 + $0x1d8] sm:$0xff] }
 0x1c1   : > { %2681 = vst.msk [vmem:[#allocation2 + $0x1b0] sm:$0xff] %vm250_vm1, %v2649_v6  ;;  %v2647_v16 = vadd.f32 %v2580_v13, %v2449_v11  ;;  %v6517_v20 = vpop.f32.mrf.mxu0  ;;  %v4919_v21 = vld [vmem:[#allocation2 + $0x80] sm:$0xff]  ;;  %v8277_v10 = vpack.c.bf16 %v3776_v58, %v3775_v62  ;;  %v2189_v13 = vld [vmem:[#allocation2 + $0xc8] sm:$0xff]  ;;  %v2460_v62 = vld [vmem:[#allocation2 + $0x1f8] sm:$0xff] }
 0x1c2   : > { %2417 = vst.msk [vmem:[#allocation2 + $0xa0] sm:$0xff] %vm250_vm1, %v2385_v46  ;;  %v2388_v23 = vadd.f32 %v6517_v20, %v2187_v34  ;;  %v6551_v25 = vpop.f32.mrf.mxu1  ;;  %4991 = vst.msk [vmem:[%s8087_s7 + $0x120] sm:$0xff] %vm250_vm1, %v4959_v15  ;;  %v4957_v30 = vadd.f32 %v8076_v18, %v4919_v21  ;;  %v2454_v20 = vld [vmem:[#allocation2 + $0x1c8] sm:$0xff] }
 0x1c3   : > { %2679 = vst.msk [vmem:[#allocation2 + $0x1a0] sm:$0xff] %vm250_vm1, %v2647_v16  ;;  %v2650_v31 = vadd.f32 %v6551_v25, %v2452_v24  ;;  %v2321_v33 = vpop.f32.mrf.mxu0  ;;  %v4922_v36 = vld [vmem:[#allocation2 + $0x98] sm:$0xff]  ;;  %v2194_v25 = vld [vmem:[#allocation2 + $0xf0] sm:$0xff] }
 0x1c4   : > { %2420 = vst.msk [vmem:[#allocation2 + $0xb8] sm:$0xff] %vm250_vm1, %v2388_v23  ;;  %v2386_v37 = vadd.f32 %v2321_v33, %v2185_v32  ;;  %v2583_v42 = vpop.f32.mrf.mxu1  ;;  %v4960_v43 = vadd.f32 %v8076_v18, %v4922_v36  ;;  %4989 = vst.msk [vmem:[%s8087_s7 + $0x100] sm:$0xff] %vm250_vm1, %v4957_v30 }
 0x1c5   : > { %2682 = vst.msk [vmem:[#allocation2 + $0x1b8] sm:$0xff] %vm250_vm1, %v2650_v31  ;;  %v2648_v45 = vadd.f32 %v2583_v42, %v2450_v38  ;;  %v6520_v49 = vpop.f32.mrf.mxu0  ;;  %6723 = vmatmul.mubr.msk.bf16.gmra.mxu0 %vm250_vm1, %v8220_v61  ;;  %v4920_v40 = vld [vmem:[#allocation2 + $0x88] sm:$0xff]  ;;  %v2459_v31 = vld [vmem:[#allocation2 + $0x1f0] sm:$0xff] }
 0x1c6   : > { %2418 = vst.msk [vmem:[#allocation2 + $0xa8] sm:$0xff] %vm250_vm1, %v2386_v37  ;;  %v2391_v50 = vadd.f32 %v6520_v49, %v2190_v53  ;;  %v6554_v54 = vpop.f32.mrf.mxu1  ;;  %6757 = vmatmul.mubr.msk.bf16.gmra.mxu1 %vm250_vm1, %v8241_v26  ;;  %6726 = vmatprep.mubr.msk.bf16.mxu0 %vm250_vm1, %v8241_v26  ;;  %4992 = vst.msk [vmem:[%s8087_s7 + $0x128] sm:$0xff] %vm250_vm1, %v4960_v43  ;;  %v4958_v55 = vadd.f32 %v8076_v18, %v4920_v40  ;;  %v2192_v37 = vld [vmem:[#allocation2 + $0xe0] sm:$0xff]  ;;  %v2195_v40 = vld [vmem:[#allocation2 + $0xf8] sm:$0xff] }
 0x1c7   : > { %2680 = vst.msk [vmem:[#allocation2 + $0x1a8] sm:$0xff] %vm250_vm1, %v2648_v45  ;;  %v2653_v57 = vadd.f32 %v6554_v54, %v2455_v51  ;;  %v2334_v28 = vpop.f32.mrf.mxu0  ;;  %6760 = vmatprep.mubr.msk.bf16.mxu1 %vm250_vm1, %v8256_v12  ;;  %v4925_v59 = vld [vmem:[#allocation2 + $0xb0] sm:$0xff]  ;;  %v2457_v45 = vld [vmem:[#allocation2 + $0x1e0] sm:$0xff] }
 0x1c8   : > { %2423 = vst.msk [vmem:[#allocation2 + $0xd0] sm:$0xff] %vm250_vm1, %v2391_v50  ;;  %v2389_v60 = vadd.f32 %v2334_v28, %v2188_v14  ;;  %v2596_v29 = vpop.f32.mrf.mxu1  ;;  %4990 = vst.msk [vmem:[%s8087_s7 + $0x108] sm:$0xff] %vm250_vm1, %v4958_v55  ;;  %v4963_v0 = vadd.f32 %v8076_v18, %v4925_v59  ;;  %v2193_v28 = vld [vmem:[#allocation2 + $0xe8] sm:$0xff] }
 0x1c9   : > { %2685 = vst.msk [vmem:[#allocation2 + $0x1d0] sm:$0xff] %vm250_vm1, %v2653_v57  ;;  %v2651_v2 = vadd.f32 %v2596_v29, %v2453_v63  ;;  %v6521_v4 = vpop.f32.mrf.mxu0  ;;  %v4923_v6 = vld [vmem:[#allocation2 + $0xa0] sm:$0xff]  ;;  %v2458_v63 = vld [vmem:[#allocation2 + $0x1e8] sm:$0xff] }
 0x1ca   : > { %2421 = vst.msk [vmem:[#allocation2 + $0xc0] sm:$0xff] %vm250_vm1, %v2389_v60  ;;  %v2392_v8 = vadd.f32 %v6521_v4, %v2191_v3  ;;  %v6555_v9 = vpop.f32.mrf.mxu1  ;;  %4995 = vst.msk [vmem:[%s8087_s7 + $0x160] sm:$0xff] %vm250_vm1, %v4963_v0  ;;  %v4961_v46 = vadd.f32 %v8076_v18, %v4923_v6  ;;  %v2956_v0 = vld [vmem:[#allocation2 + $0x310] sm:$0xff] }
 0x1cb   : > { %2683 = vst.msk [vmem:[#allocation2 + $0x1c0] sm:$0xff] %vm250_vm1, %v2651_v2  ;;  %v2654_v11 = vadd.f32 %v6555_v9, %v2456_v7  ;;  %v2337_v15 = vpop.f32.mrf.mxu0  ;;  %v4926_v16 = vld [vmem:[#allocation2 + $0xb8] sm:$0xff]  ;;  %v2693_v4 = vld [vmem:[#allocation2 + $0x210] sm:$0xff] }
 0x1cc   : > { %2424 = vst.msk [vmem:[#allocation2 + $0xd8] sm:$0xff] %vm250_vm1, %v2392_v8  ;;  %v2390_v34 = vadd.f32 %v2337_v15, %v2189_v13  ;;  %v2599_v21 = vpop.f32.mrf.mxu1  ;;  %v4964_v23 = vadd.f32 %v8076_v18, %v4926_v16  ;;  %4993 = vst.msk [vmem:[%s8087_s7 + $0x140] sm:$0xff] %vm250_vm1, %v4961_v46  ;;  %v2954_v46 = vld [vmem:[#allocation2 + $0x300] sm:$0xff] }
 0x1cd   : > { %2686 = vst.msk [vmem:[#allocation2 + $0x1d8] sm:$0xff] %vm250_vm1, %v2654_v11  ;;  %v2652_v24 = vadd.f32 %v2599_v21, %v2454_v20  ;;  %v6524_v27 = vpop.f32.mrf.mxu0  ;;  %6727 = vmatmul.mubr.msk.bf16.gmra.mxu0 %vm250_vm1, %v8256_v12  ;;  %v4924_v35 = vld [vmem:[#allocation2 + $0xa8] sm:$0xff]  ;;  %v2691_v13 = vld [vmem:[#allocation2 + $0x200] sm:$0xff]  ;;  %v2957_v21 = vld [vmem:[#allocation2 + $0x318] sm:$0xff] }
 0x1ce   : > { %2422 = vst.msk [vmem:[#allocation2 + $0xc8] sm:$0xff] %vm250_vm1, %v2390_v34  ;;  %v2395_v30 = vadd.f32 %v6524_v27, %v2194_v25  ;;  %v6558_v32 = vpop.f32.mrf.mxu1  ;;  %6761 = vmatmul.mubr.msk.bf16.gmra.mxu1 %vm250_vm1, %v8277_v10  ;;  %6766 = vmatprep.mubr.msk.bf16.mxu0 %vm250_vm1, %v8020_v19  ;;  %4996 = vst.msk [vmem:[%s8087_s7 + $0x168] sm:$0xff] %vm250_vm1, %v4964_v23  ;;  %v4962_v33 = vadd.f32 %v8076_v18, %v4924_v35 }
 0x1cf   : > { %2684 = vst.msk [vmem:[#allocation2 + $0x1c8] sm:$0xff] %vm250_vm1, %v2652_v24  ;;  %v2657_v36 = vadd.f32 %v6558_v32, %v2459_v31  ;;  %v2350_v38 = vpop.f32.mrf.mxu0  ;;  %6800 = vmatprep.mubr.msk.bf16.mxu1 %vm250_vm1, %v8033_v39  ;;  %v4929_v42 = vld [vmem:[#allocation2 + $0xd0] sm:$0xff]  ;;  %v2694_v24 = vld [vmem:[#allocation2 + $0x218] sm:$0xff]  ;;  %v2955_v31 = vld [vmem:[#allocation2 + $0x308] sm:$0xff] }
 0x1d0   : > { %2427 = vst.msk [vmem:[#allocation2 + $0xf0] sm:$0xff] %vm250_vm1, %v2395_v30  ;;  %v2393_v43 = vadd.f32 %v2350_v38, %v2192_v37  ;;  %v2612_v53 = vpop.f32.mrf.mxu1  ;;  %4994 = vst.msk [vmem:[%s8087_s7 + $0x148] sm:$0xff] %vm250_vm1, %v4962_v33  ;;  %v4967_v19 = vadd.f32 %v8076_v18, %v4929_v42 }
 0x1d1   : > { %2689 = vst.msk [vmem:[#allocation2 + $0x1f0] sm:$0xff] %vm250_vm1, %v2657_v36  ;;  %v2655_v49 = vadd.f32 %v2612_v53, %v2457_v45  ;;  %v6525_v50 = vpop.f32.mrf.mxu0  ;;  %v4927_v51 = vld [vmem:[#allocation2 + $0xc0] sm:$0xff]  ;;  %v2692_v36 = vld [vmem:[#allocation2 + $0x208] sm:$0xff]  ;;  %v2960_v45 = vld [vmem:[#allocation2 + $0x330] sm:$0xff] }
 0x1d2   : > { %2425 = vst.msk [vmem:[#allocation2 + $0xe0] sm:$0xff] %vm250_vm1, %v2393_v43  ;;  %v2396_v54 = vadd.f32 %v6525_v50, %v2195_v40  ;;  %v6559_v55 = vpop.f32.mrf.mxu1  ;;  %4999 = vst.msk [vmem:[%s8087_s7 + $0x1a0] sm:$0xff] %vm250_vm1, %v4967_v19  ;;  %v4965_v57 = vadd.f32 %v8076_v18, %v4927_v51 }
 0x1d3   : > { %2687 = vst.msk [vmem:[#allocation2 + $0x1e0] sm:$0xff] %vm250_vm1, %v2655_v49  ;;  %v2658_v14 = vadd.f32 %v6559_v55, %v2460_v62  ;;  %v2353_v58 = vpop.f32.mrf.mxu0  ;;  %v4930_v59 = vld [vmem:[#allocation2 + $0xd8] sm:$0xff]  ;;  %v2697_v49 = vld [vmem:[#allocation2 + $0x230] sm:$0xff]  ;;  %v2958_v62 = vld [vmem:[#allocation2 + $0x320] sm:$0xff] }
 0x1d4   : > { %2428 = vst.msk [vmem:[#allocation2 + $0xf8] sm:$0xff] %vm250_vm1, %v2396_v54  ;;  %v2394_v60 = vadd.f32 %v2353_v58, %v2193_v28  ;;  %v2615_v29 = vpop.f32.mrf.mxu1  ;;  %v4968_v2 = vadd.f32 %v8076_v18, %v4930_v59  ;;  %4997 = vst.msk [vmem:[%s8087_s7 + $0x180] sm:$0xff] %vm250_vm1, %v4965_v57  ;;  %v2695_v57 = vld [vmem:[#allocation2 + $0x220] sm:$0xff]  ;;  %v2961_v59 = vld [vmem:[#allocation2 + $0x338] sm:$0xff] }
 0x1d5   : > { %2690 = vst.msk [vmem:[#allocation2 + $0x1f8] sm:$0xff] %vm250_vm1, %v2658_v14  ;;  %v2656_v3 = vadd.f32 %v2615_v29, %v2458_v63  ;;  %v6564_v6 = vpop.f32.mrf.mxu0  ;;  %6767 = vmatmul.mubr.msk.bf16.vlgmr.msra.gmra.mxu0 %vm250_vm1, %v8033_v39  ;;  %v4928_v8 = vld [vmem:[#allocation2 + $0xc8] sm:$0xff] }
 0x1d6   : > { %2426 = vst.msk [vmem:[#allocation2 + $0xe8] sm:$0xff] %vm250_vm1, %v2394_v60  ;;  %v2891_v7 = vadd.f32 %v6564_v6, %v2693_v4  ;;  %v6598_v9 = vpop.f32.mrf.mxu1  ;;  %6801 = vmatmul.mubr.msk.bf16.vlgmr.msra.gmra.mxu1 %vm250_vm1, %v8049_v1  ;;  %6770 = vmatprep.mubr.msk.bf16.mxu0 %vm250_vm1, %v8049_v1  ;;  %5000 = vst.msk [vmem:[%s8087_s7 + $0x1a8] sm:$0xff] %vm250_vm1, %v4968_v2  ;;  %v4966_v11 = vadd.f32 %v8076_v18, %v4928_v8  ;;  %v2698_v60 = vld [vmem:[#allocation2 + $0x238] sm:$0xff] }
 0x1d7   : > { %2688 = vst.msk [vmem:[#allocation2 + $0x1e8] sm:$0xff] %vm250_vm1, %v2656_v3  ;;  %v3154_v39 = vadd.f32 %v6598_v9, %v2956_v0  ;;  %v2762_v15 = vpop.f32.mrf.mxu0  ;;  %6804 = vmatprep.mubr.msk.bf16.mxu1 %vm250_vm1, %v8061_v5  ;;  %v4933_v16 = vld [vmem:[#allocation2 + $0xf0] sm:$0xff]  ;;  %v2959_v0 = vld [vmem:[#allocation2 + $0x328] sm:$0xff] }
 0x1d8   : > { %2923 = vst.msk [vmem:[#allocation2 + $0x210] sm:$0xff] %vm250_vm1, %v2891_v7  ;;  %v2889_v34 = vadd.f32 %v2762_v15, %v2691_v13  ;;  %v3025_v20 = vpop.f32.mrf.mxu1  ;;  %4998 = vst.msk [vmem:[%s8087_s7 + $0x188] sm:$0xff] %vm250_vm1, %v4966_v11  ;;  %v4971_v1 = vadd.f32 %v8076_v18, %v4933_v16  ;;  %v2696_v3 = vld [vmem:[#allocation2 + $0x228] sm:$0xff]  ;;  %v2964_v7 = vld [vmem:[#allocation2 + $0x350] sm:$0xff] }
 0x1d9   : > { %3186 = vst.msk [vmem:[#allocation2 + $0x310] sm:$0xff] %vm250_vm1, %v3154_v39  ;;  %v3152_v23 = vadd.f32 %v3025_v20, %v2954_v46  ;;  %v6565_v25 = vpop.f32.mrf.mxu0  ;;  %v4931_v27 = vld [vmem:[#allocation2 + $0xe0] sm:$0xff]  ;;  %v2701_v46 = vld [vmem:[#allocation2 + $0x250] sm:$0xff] }
 0x1da   : > { %2921 = vst.msk [vmem:[#allocation2 + $0x200] sm:$0xff] %vm250_vm1, %v2889_v34  ;;  %v2892_v35 = vadd.f32 %v6565_v25, %v2694_v24  ;;  %v6599_v30 = vpop.f32.mrf.mxu1  ;;  %5003 = vst.msk [vmem:[%s8087_s7 + $0x1e0] sm:$0xff] %vm250_vm1, %v4971_v1  ;;  %v4969_v32 = vadd.f32 %v8076_v18, %v4931_v27  ;;  %v2962_v15 = vld [vmem:[#allocation2 + $0x340] sm:$0xff]  ;;  %v2965_v1 = vld [vmem:[#allocation2 + $0x358] sm:$0xff] }
 0x1db   : > { %3184 = vst.msk [vmem:[#allocation2 + $0x300] sm:$0xff] %vm250_vm1, %v3152_v23  ;;  %v3155_v33 = vadd.f32 %v6599_v30, %v2957_v21  ;;  %v2765_v37 = vpop.f32.mrf.mxu0  ;;  %v4934_v38 = vld [vmem:[#allocation2 + $0xf8] sm:$0xff]  ;;  %v2699_v34 = vld [vmem:[#allocation2 + $0x240] sm:$0xff] }
 0x1dc   : > { %2924 = vst.msk [vmem:[#allocation2 + $0x218] sm:$0xff] %vm250_vm1, %v2892_v35  ;;  %v2890_v42 = vadd.f32 %v2765_v37, %v2692_v36  ;;  %v3028_v43 = vpop.f32.mrf.mxu1  ;;  %v4972_v53 = vadd.f32 %v8076_v18, %v4934_v38  ;;  %5001 = vst.msk [vmem:[%s8087_s7 + $0x1c0] sm:$0xff] %vm250_vm1, %v4969_v32  ;;  %v2702_v24 = vld [vmem:[#allocation2 + $0x258] sm:$0xff]  ;;  %v2963_v35 = vld [vmem:[#allocation2 + $0x348] sm:$0xff] }
 0x1dd   : > { %3187 = vst.msk [vmem:[#allocation2 + $0x318] sm:$0xff] %vm250_vm1, %v3155_v33  ;;  %v3153_v19 = vadd.f32 %v3028_v43, %v2955_v31  ;;  %v6568_v40 = vpop.f32.mrf.mxu0  ;;  %6771 = vmatmul.mubr.msk.bf16.gmra.mxu0 %vm250_vm1, %v8061_v5  ;;  %v4932_v50 = vld [vmem:[#allocation2 + $0xe8] sm:$0xff]  ;;  %v2968_v37 = vld [vmem:[#allocation2 + $0x370] sm:$0xff] }
 0x1de   : > { %2922 = vst.msk [vmem:[#allocation2 + $0x208] sm:$0xff] %vm250_vm1, %v2890_v42  ;;  %v2895_v51 = vadd.f32 %v6568_v40, %v2697_v49  ;;  %v6602_v54 = vpop.f32.mrf.mxu1  ;;  %6805 = vmatmul.mubr.msk.bf16.gmra.mxu1 %vm250_vm1, %v8071_v17  ;;  %6774 = vmatprep.mubr.msk.bf16.mxu0 %vm250_vm1, %v8071_v17  ;;  %5004 = vst.msk [vmem:[%s8087_s7 + $0x1e8] sm:$0xff] %vm250_vm1, %v4972_v53  ;;  %v4970_v55 = vadd.f32 %v8076_v18, %v4932_v50  ;;  %v2700_v31 = vld [vmem:[#allocation2 + $0x248] sm:$0xff]  ;;  %v2705_v42 = vld [vmem:[#allocation2 + $0x270] sm:$0xff] }
 0x1df   : > { %3185 = vst.msk [vmem:[#allocation2 + $0x308] sm:$0xff] %vm250_vm1, %v3153_v19  ;;  %v3158_v5 = vadd.f32 %v6602_v54, %v2960_v45  ;;  %v2778_v14 = vpop.f32.mrf.mxu0  ;;  %6808 = vmatprep.mubr.msk.bf16.mxu1 %vm250_vm1, %v8097_v44  ;;  %v2966_v19 = vld [vmem:[#allocation2 + $0x360] sm:$0xff]  ;;  %v2969_v54 = vld [vmem:[#allocation2 + $0x378] sm:$0xff] }
 0x1e0   : > { %2927 = vst.msk [vmem:[#allocation2 + $0x230] sm:$0xff] %vm250_vm1, %v2895_v51  ;;  %v2893_v28 = vadd.f32 %v2778_v14, %v2695_v57  ;;  %v3041_v58 = vpop.f32.mrf.mxu1  ;;  %5002 = vst.msk [vmem:[%s8087_s7 + $0x1c8] sm:$0xff] %vm250_vm1, %v4970_v55  ;;  %v2703_v40 = vld [vmem:[#allocation2 + $0x260] sm:$0xff]  ;;  %v2706_v55 = vld [vmem:[#allocation2 + $0x278] sm:$0xff] }
 0x1e1   : > { %3190 = vst.msk [vmem:[#allocation2 + $0x330] sm:$0xff] %vm250_vm1, %v3158_v5  ;;  %v3156_v17 = vadd.f32 %v3041_v58, %v2958_v62  ;;  %v6569_v18 = vpop.f32.mrf.mxu0  ;;  %v2967_v14 = vld [vmem:[#allocation2 + $0x368] sm:$0xff] }
 0x1e2   : > { %2925 = vst.msk [vmem:[#allocation2 + $0x220] sm:$0xff] %vm250_vm1, %v2893_v28  ;;  %v2896_v63 = vadd.f32 %v6569_v18, %v2698_v60  ;;  %v6603_v29 = vpop.f32.mrf.mxu1  ;;  %v2704_v58 = vld [vmem:[#allocation2 + $0x268] sm:$0xff]  ;;  %v2972_v18 = vld [vmem:[#allocation2 + $0x390] sm:$0xff] }
 0x1e3   : > { %3188 = vst.msk [vmem:[#allocation2 + $0x320] sm:$0xff] %vm250_vm1, %v3156_v17  ;;  %v3159_v2 = vadd.f32 %v6603_v29, %v2961_v59  ;;  %v2781_v4 = vpop.f32.mrf.mxu0  ;;  %v2709_v29 = vld [vmem:[#allocation2 + $0x290] sm:$0xff] }
 0x1e4   : > { %2928 = vst.msk [vmem:[#allocation2 + $0x238] sm:$0xff] %vm250_vm1, %v2896_v63  ;;  %v2894_v6 = vadd.f32 %v2781_v4, %v2696_v3  ;;  %v3044_v8 = vpop.f32.mrf.mxu1  ;;  %v2970_v4 = vld [vmem:[#allocation2 + $0x380] sm:$0xff] }
 0x1e5   : > { %3191 = vst.msk [vmem:[#allocation2 + $0x338] sm:$0xff] %vm250_vm1, %v3159_v2  ;;  %v3157_v9 = vadd.f32 %v3044_v8, %v2959_v0  ;;  %v6572_v11 = vpop.f32.mrf.mxu0  ;;  %6775 = vmatmul.mubr.msk.bf16.gmra.mxu0 %vm250_vm1, %v8097_v44  ;;  %v2707_v8 = vld [vmem:[#allocation2 + $0x280] sm:$0xff] }
 0x1e6   : > { %2926 = vst.msk [vmem:[#allocation2 + $0x228] sm:$0xff] %vm250_vm1, %v2894_v6  ;;  %v2899_v39 = vadd.f32 %v6572_v11, %v2701_v46  ;;  %v6606_v13 = vpop.f32.mrf.mxu1  ;;  %6809 = vmatmul.mubr.msk.bf16.gmra.mxu1 %vm250_vm1, %v8112_v41  ;;  %6778 = vmatprep.mubr.msk.bf16.mxu0 %vm250_vm1, %v8112_v41  ;;  %v2973_v46 = vld [vmem:[#allocation2 + $0x398] sm:$0xff] }
 0x1e7   : > { %3189 = vst.msk [vmem:[#allocation2 + $0x328] sm:$0xff] %vm250_vm1, %v3157_v9  ;;  %v3162_v16 = vadd.f32 %v6606_v13, %v2964_v7  ;;  %v2794_v20 = vpop.f32.mrf.mxu0  ;;  %6812 = vmatprep.mubr.msk.bf16.mxu1 %vm250_vm1, %v8133_v47 }
 0x1e8   : > { %2931 = vst.msk [vmem:[#allocation2 + $0x250] sm:$0xff] %vm250_vm1, %v2899_v39  ;;  %v2897_v44 = vadd.f32 %v2794_v20, %v2699_v34  ;;  %v3057_v21 = vpop.f32.mrf.mxu1  ;;  %v2710_v39 = vld [vmem:[#allocation2 + $0x298] sm:$0xff]  ;;  %v2708_v20 = vld [vmem:[#allocation2 + $0x288] sm:$0xff] }
 0x1e9   : > { %3194 = vst.msk [vmem:[#allocation2 + $0x350] sm:$0xff] %vm250_vm1, %v3162_v16  ;;  %v3160_v23 = vadd.f32 %v3057_v21, %v2962_v15  ;;  %v6573_v25 = vpop.f32.mrf.mxu0  ;;  %v2971_v16 = vld [vmem:[#allocation2 + $0x388] sm:$0xff] }
 0x1ea   : > { %2929 = vst.msk [vmem:[#allocation2 + $0x240] sm:$0xff] %vm250_vm1, %v2897_v44  ;;  %v2900_v41 = vadd.f32 %v6573_v25, %v2702_v24  ;;  %v6607_v27 = vpop.f32.mrf.mxu1  ;;  %v2713_v25 = vld [vmem:[#allocation2 + $0x2b0] sm:$0xff] }
 0x1eb   : > { %3192 = vst.msk [vmem:[#allocation2 + $0x340] sm:$0xff] %vm250_vm1, %v3160_v23  ;;  %v3163_v30 = vadd.f32 %v6607_v27, %v2965_v1  ;;  %v2797_v32 = vpop.f32.mrf.mxu0  ;;  %v2976_v23 = vld [vmem:[#allocation2 + $0x3b0] sm:$0xff] }
 0x1ec   : > { %2932 = vst.msk [vmem:[#allocation2 + $0x258] sm:$0xff] %vm250_vm1, %v2900_v41  ;;  %v2898_v33 = vadd.f32 %v2797_v32, %v2700_v31  ;;  %v3060_v36 = vpop.f32.mrf.mxu1  ;;  %v2711_v32 = vld [vmem:[#allocation2 + $0x2a0] sm:$0xff] }
 0x1ed   : > { %3195 = vst.msk [vmem:[#allocation2 + $0x358] sm:$0xff] %vm250_vm1, %v3163_v30  ;;  %v3161_v38 = vadd.f32 %v3060_v36, %v2963_v35  ;;  %v6576_v43 = vpop.f32.mrf.mxu0  ;;  %6779 = vmatmul.mubr.msk.bf16.gmra.mxu0 %vm250_vm1, %v8133_v47  ;;  %v2974_v30 = vld [vmem:[#allocation2 + $0x3a0] sm:$0xff] }
 0x1ee   : > { %2930 = vst.msk [vmem:[#allocation2 + $0x248] sm:$0xff] %vm250_vm1, %v2898_v33  ;;  %v2903_v45 = vadd.f32 %v6576_v43, %v2705_v42  ;;  %v6610_v53 = vpop.f32.mrf.mxu1  ;;  %6813 = vmatmul.mubr.msk.bf16.gmra.mxu1 %vm250_vm1, %v8148_v52  ;;  %6782 = vmatprep.mubr.msk.bf16.mxu0 %vm250_vm1, %v8148_v52  ;;  %v2714_v42 = vld [vmem:[#allocation2 + $0x2b8] sm:$0xff] }
 0x1ef   : > { %3193 = vst.msk [vmem:[#allocation2 + $0x348] sm:$0xff] %vm250_vm1, %v3161_v38  ;;  %v3166_v49 = vadd.f32 %v6610_v53, %v2968_v37  ;;  %v2810_v50 = vpop.f32.mrf.mxu0  ;;  %6816 = vmatprep.mubr.msk.bf16.mxu1 %vm250_vm1, %v8169_v56  ;;  %v2977_v37 = vld [vmem:[#allocation2 + $0x3b8] sm:$0xff]  ;;  %v2975_v53 = vld [vmem:[#allocation2 + $0x3a8] sm:$0xff] }
 0x1f0   : > { %2935 = vst.msk [vmem:[#allocation2 + $0x270] sm:$0xff] %vm250_vm1, %v2903_v45  ;;  %v2901_v47 = vadd.f32 %v2810_v50, %v2703_v40  ;;  %v3073_v51 = vpop.f32.mrf.mxu1 }
 0x1f1   : > { %3198 = vst.msk [vmem:[#allocation2 + $0x370] sm:$0xff] %vm250_vm1, %v3166_v49  ;;  %v3164_v62 = vadd.f32 %v3073_v51, %v2966_v19  ;;  %v6577_v5 = vpop.f32.mrf.mxu0  ;;  %v2712_v49 = vld [vmem:[#allocation2 + $0x2a8] sm:$0xff]  ;;  %v2980_v51 = vld [vmem:[#allocation2 + $0x3d0] sm:$0xff] }
 0x1f2   : > { %2933 = vst.msk [vmem:[#allocation2 + $0x260] sm:$0xff] %vm250_vm1, %v2901_v47  ;;  %v2904_v52 = vadd.f32 %v6577_v5, %v2706_v55  ;;  %v6611_v57 = vpop.f32.mrf.mxu1 }
 0x1f3   : > { %3196 = vst.msk [vmem:[#allocation2 + $0x360] sm:$0xff] %vm250_vm1, %v3164_v62  ;;  %v3167_v28 = vadd.f32 %v6611_v57, %v2969_v54  ;;  %v2813_v59 = vpop.f32.mrf.mxu0  ;;  %v2717_v62 = vld [vmem:[#allocation2 + $0x2d0] sm:$0xff]  ;;  %v2978_v57 = vld [vmem:[#allocation2 + $0x3c0] sm:$0xff] }
 0x1f4   : > { %2936 = vst.msk [vmem:[#allocation2 + $0x278] sm:$0xff] %vm250_vm1, %v2904_v52  ;;  %v2902_v17 = vadd.f32 %v2813_v59, %v2704_v58  ;;  %v3076_v60 = vpop.f32.mrf.mxu1  ;;  %v3778_v59 = vld [vmem:[%s6965_s27 + $0x1a2] sm:$0xff] }
 0x1f5   : > { %3199 = vst.msk [vmem:[#allocation2 + $0x378] sm:$0xff] %vm250_vm1, %v3167_v28  ;;  %v3165_v63 = vadd.f32 %v3076_v60, %v2967_v14  ;;  %v6580_v0 = vpop.f32.mrf.mxu0  ;;  %6783 = vmatmul.mubr.msk.bf16.gmra.mxu0 %vm250_vm1, %v8169_v56  ;;  %v2715_v28 = vld [vmem:[#allocation2 + $0x2c0] sm:$0xff] }
 0x1f6   : > { %2934 = vst.msk [vmem:[#allocation2 + $0x268] sm:$0xff] %vm250_vm1, %v2902_v17  ;;  %v2907_v2 = vadd.f32 %v6580_v0, %v2709_v29  ;;  %v6614_v3 = vpop.f32.mrf.mxu1  ;;  %6817 = vmatmul.mubr.msk.bf16.gmra.mxu1 %vm250_vm1, %v8184_v22  ;;  %6786 = vmatprep.mubr.msk.bf16.mxu0 %vm250_vm1, %v8184_v22  ;;  %v2718_v29 = vld [vmem:[#allocation2 + $0x2d8] sm:$0xff] }
 0x1f7   : > { %3197 = vst.msk [vmem:[#allocation2 + $0x368] sm:$0xff] %vm250_vm1, %v3165_v63  ;;  %v3170_v6 = vadd.f32 %v6614_v3, %v2972_v18  ;;  %v2826_v7 = vpop.f32.mrf.mxu0  ;;  %6820 = vmatprep.mubr.msk.bf16.mxu1 %vm250_vm1, %v8205_v48  ;;  %v2981_v18 = vld [vmem:[#allocation2 + $0x3d8] sm:$0xff]  ;;  %v2979_v3 = vld [vmem:[#allocation2 + $0x3c8] sm:$0xff] }
 0x1f8   : > { %2939 = vst.msk [vmem:[#allocation2 + $0x290] sm:$0xff] %vm250_vm1, %v2907_v2  ;;  %v2905_v56 = vadd.f32 %v2826_v7, %v2707_v8  ;;  %v3089_v9 = vpop.f32.mrf.mxu1  ;;  %v2716_v8 = vld [vmem:[#allocation2 + $0x2c8] sm:$0xff] }
 0x1f9   : > { %3202 = vst.msk [vmem:[#allocation2 + $0x390] sm:$0xff] %vm250_vm1, %v3170_v6  ;;  %v3168_v11 = vadd.f32 %v3089_v9, %v2970_v4  ;;  %v6581_v13 = vpop.f32.mrf.mxu0 }
 0x1fa   : > { %2937 = vst.msk [vmem:[#allocation2 + $0x280] sm:$0xff] %vm250_vm1, %v2905_v56  ;;  %v2908_v22 = vadd.f32 %v6581_v13, %v2710_v39  ;;  %v6615_v15 = vpop.f32.mrf.mxu1  ;;  %v2721_v39 = vld [vmem:[#allocation2 + $0x2f0] sm:$0xff] }
 0x1fb   : > { %3200 = vst.msk [vmem:[#allocation2 + $0x380] sm:$0xff] %vm250_vm1, %v3168_v11  ;;  %v3171_v34 = vadd.f32 %v6615_v15, %v2973_v46  ;;  %v2829_v44 = vpop.f32.mrf.mxu0  ;;  %v2984_v46 = vld [vmem:[#allocation2 + $0x3f0] sm:$0xff] }
 0x1fc   : > { %2940 = vst.msk [vmem:[#allocation2 + $0x298] sm:$0xff] %vm250_vm1, %v2908_v22  ;;  %v2906_v21 = vadd.f32 %v2829_v44, %v2708_v20  ;;  %v3092_v1 = vpop.f32.mrf.mxu1  ;;  %v2719_v20 = vld [vmem:[#allocation2 + $0x2e0] sm:$0xff] }
 0x1fd   : > { %3203 = vst.msk [vmem:[#allocation2 + $0x398] sm:$0xff] %vm250_vm1, %v3171_v34  ;;  %v3169_v24 = vadd.f32 %v3092_v1, %v2971_v16  ;;  %v6584_v41 = vpop.f32.mrf.mxu0  ;;  %6787 = vmatmul.mubr.msk.bf16.gmra.mxu0 %vm250_vm1, %v8205_v48  ;;  %v2982_v16 = vld [vmem:[#allocation2 + $0x3e0] sm:$0xff] }
 0x1fe   : > { %2938 = vst.msk [vmem:[#allocation2 + $0x288] sm:$0xff] %vm250_vm1, %v2906_v21  ;;  %v2911_v27 = vadd.f32 %v6584_v41, %v2713_v25  ;;  %v6618_v35 = vpop.f32.mrf.mxu1  ;;  %6821 = vmatmul.mubr.msk.bf16.gmra.mxu1 %vm250_vm1, %v8220_v61  ;;  %6790 = vmatprep.mubr.msk.bf16.mxu0 %vm250_vm1, %v8220_v61 }
 0x1ff   : > { %3201 = vst.msk [vmem:[#allocation2 + $0x388] sm:$0xff] %vm250_vm1, %v3169_v24  ;;  %v3174_v31 = vadd.f32 %v6618_v35, %v2976_v23  ;;  %v2842_v33 = vpop.f32.mrf.mxu0  ;;  %6824 = vmatprep.mubr.msk.bf16.mxu1 %vm250_vm1, %v8241_v26  ;;  %v2985_v23 = vld [vmem:[#allocation2 + $0x3f8] sm:$0xff]  ;;  %v2983_v35 = vld [vmem:[#allocation2 + $0x3e8] sm:$0xff] }
 0x200   : > { %2943 = vst.msk [vmem:[#allocation2 + $0x2b0] sm:$0xff] %vm250_vm1, %v2911_v27  ;;  %v2909_v48 = vadd.f32 %v2842_v33, %v2711_v32  ;;  %v3105_v36 = vpop.f32.mrf.mxu1  ;;  %v2722_v24 = vld [vmem:[#allocation2 + $0x2f8] sm:$0xff] }
 0x201   : > { %3206 = vst.msk [vmem:[#allocation2 + $0x3b0] sm:$0xff] %vm250_vm1, %v3174_v31  ;;  %v3172_v38 = vadd.f32 %v3105_v36, %v2974_v30  ;;  %v6585_v43 = vpop.f32.mrf.mxu0  ;;  %v2720_v31 = vld [vmem:[#allocation2 + $0x2e8] sm:$0xff] }
 0x202   : > { %2941 = vst.msk [vmem:[#allocation2 + $0x2a0] sm:$0xff] %vm250_vm1, %v2909_v48  ;;  %v2912_v61 = vadd.f32 %v6585_v43, %v2714_v42  ;;  %v6619_v45 = vpop.f32.mrf.mxu1  ;;  %v3483_v43 = vld [vmem:[#allocation2 + $0x310] sm:$0xff] }
 0x203   : > { %3204 = vst.msk [vmem:[#allocation2 + $0x3a0] sm:$0xff] %vm250_vm1, %v3172_v38  ;;  %v3175_v19 = vadd.f32 %v6619_v45, %v2977_v37  ;;  %v2845_v40 = vpop.f32.mrf.mxu0  ;;  %v3218_v37 = vld [vmem:[#allocation2 + $0x210] sm:$0xff] }
 0x204   : > { %2944 = vst.msk [vmem:[#allocation2 + $0x2b8] sm:$0xff] %vm250_vm1, %v2912_v61  ;;  %v2910_v50 = vadd.f32 %v2845_v40, %v2712_v49  ;;  %v3108_v47 = vpop.f32.mrf.mxu1  ;;  %v3481_v40 = vld [vmem:[#allocation2 + $0x300] sm:$0xff] }
 0x205   : > { %3207 = vst.msk [vmem:[#allocation2 + $0x3b8] sm:$0xff] %vm250_vm1, %v3175_v19  ;;  %v3173_v54 = vadd.f32 %v3108_v47, %v2975_v53  ;;  %v6588_v55 = vpop.f32.mrf.mxu0  ;;  %6791 = vmatmul.mubr.msk.bf16.gmra.mxu0 %vm250_vm1, %v8241_v26  ;;  %v3777_v26 = vld [vmem:[%s6965_s27 + $0x19a] sm:$0xff] }
 0x206   : > { %2942 = vst.msk [vmem:[#allocation2 + $0x2a8] sm:$0xff] %vm250_vm1, %v2910_v50  ;;  %v2915_v5 = vadd.f32 %v6588_v55, %v2717_v62  ;;  %v6622_v52 = vpop.f32.mrf.mxu1  ;;  %6825 = vmatmul.mubr.msk.bf16.gmra.mxu1 %vm250_vm1, %v8256_v12  ;;  %6794 = vmatprep.mubr.msk.bf16.mxu0 %vm250_vm1, %v8256_v12  ;;  %v3796_v4 = vpack.c.bf16 %v3778_v59, %v3777_v26  ;;  %v3216_v53 = vld [vmem:[#allocation2 + $0x200] sm:$0xff]  ;;  %v3484_v55 = vld [vmem:[#allocation2 + $0x318] sm:$0xff] }
 0x207   : > { %3205 = vst.msk [vmem:[#allocation2 + $0x3a8] sm:$0xff] %vm250_vm1, %v3173_v54  ;;  %v3178_v14 = vadd.f32 %v6622_v52, %v2980_v51  ;;  %v2858_v58 = vpop.f32.mrf.mxu0  ;;  %6828 = vmatprep.mubr.msk.bf16.mxu1 %vm250_vm1, %v8277_v10  ;;  %v3219_v51 = vld [vmem:[#allocation2 + $0x218] sm:$0xff] }
 0x208   : > { %2947 = vst.msk [vmem:[#allocation2 + $0x2d0] sm:$0xff] %vm250_vm1, %v2915_v5  ;;  %v2913_v17 = vadd.f32 %v2858_v58, %v2715_v28  ;;  %v3121_v60 = vpop.f32.mrf.mxu1  ;;  %v3482_v58 = vld [vmem:[#allocation2 + $0x308] sm:$0xff] }
 0x209   : > { %3210 = vst.msk [vmem:[#allocation2 + $0x3d0] sm:$0xff] %vm250_vm1, %v3178_v14  ;;  %v3176_v63 = vadd.f32 %v3121_v60, %v2978_v57  ;;  %v6589_v12 = vpop.f32.mrf.mxu0  ;;  %v3217_v57 = vld [vmem:[#allocation2 + $0x208] sm:$0xff] }
 0x20a   : > { %2945 = vst.msk [vmem:[#allocation2 + $0x2c0] sm:$0xff] %vm250_vm1, %v2913_v17  ;;  %v2916_v0 = vadd.f32 %v6589_v12, %v2718_v29  ;;  %v6623_v2 = vpop.f32.mrf.mxu1  ;;  %v3222_v17 = vld [vmem:[#allocation2 + $0x230] sm:$0xff] }
 0x20b   : > { %3208 = vst.msk [vmem:[#allocation2 + $0x3c0] sm:$0xff] %vm250_vm1, %v3176_v63  ;;  %v3179_v6 = vadd.f32 %v6623_v2, %v2981_v18  ;;  %v2861_v7 = vpop.f32.mrf.mxu0  ;;  %v3487_v63 = vld [vmem:[#allocation2 + $0x330] sm:$0xff] }
 0x20c   : > { %2948 = vst.msk [vmem:[#allocation2 + $0x2d8] sm:$0xff] %vm250_vm1, %v2916_v0  ;;  %v2914_v56 = vadd.f32 %v2861_v7, %v2716_v8  ;;  %v3124_v9 = vpop.f32.mrf.mxu1  ;;  %v3220_v0 = vld [vmem:[#allocation2 + $0x220] sm:$0xff] }
 0x20d   : > { %3211 = vst.msk [vmem:[#allocation2 + $0x3d8] sm:$0xff] %vm250_vm1, %v3179_v6  ;;  %v3177_v11 = vadd.f32 %v3124_v9, %v2979_v3  ;;  %v6592_v13 = vpop.f32.mrf.mxu0  ;;  %6795 = vmatmul.mubr.msk.bf16.gmra.mxu0 %vm250_vm1, %v8277_v10  ;;  %v3485_v6 = vld [vmem:[#allocation2 + $0x320] sm:$0xff] }
 0x20e   : > { %2946 = vst.msk [vmem:[#allocation2 + $0x2c8] sm:$0xff] %vm250_vm1, %v2914_v56  ;;  %v2919_v22 = vadd.f32 %v6592_v13, %v2721_v39  ;;  %v6626_v15 = vpop.f32.mrf.mxu1  ;;  %6829 = vmatmul.mubr.msk.bf16.gmra.mxu1 %vm250_vm1, %v3796_v4  ;;  %v8472_v7 = vld [vmem:[%s9025_s2] ss:$0 sm:$0xff] }
 0x20f   : > { %3209 = vst.msk [vmem:[#allocation2 + $0x3c8] sm:$0xff] %vm250_vm1, %v3177_v11  ;;  %v3182_v34 = vadd.f32 %v6626_v15, %v2984_v46  ;;  %v2874_v44 = vpop.f32.mrf.mxu0  ;;  %v3223_v46 = vld [vmem:[#allocation2 + $0x238] sm:$0xff] }
 0x210   : > { %2951 = vst.msk [vmem:[#allocation2 + $0x2f0] sm:$0xff] %vm250_vm1, %v2919_v22  ;;  %v2917_v21 = vadd.f32 %v2874_v44, %v2719_v20  ;;  %v3137_v1 = vpop.f32.mrf.mxu1  ;;  %v3488_v22 = vld [vmem:[#allocation2 + $0x338] sm:$0xff]  ;;  %v3221_v20 = vld [vmem:[#allocation2 + $0x228] sm:$0xff] }
 0x211   : > { %3214 = vst.msk [vmem:[#allocation2 + $0x3f0] sm:$0xff] %vm250_vm1, %v3182_v34  ;;  %v3180_v10 = vadd.f32 %v3137_v1, %v2982_v16  ;;  %v6593_v25 = vpop.f32.mrf.mxu0 }
 0x212   : > { %2949 = vst.msk [vmem:[#allocation2 + $0x2e0] sm:$0xff] %vm250_vm1, %v2917_v21  ;;  %v2920_v41 = vadd.f32 %v6593_v25, %v2722_v24  ;;  %v6627_v27 = vpop.f32.mrf.mxu1 }
 0x213   : > { %3212 = vst.msk [vmem:[#allocation2 + $0x3e0] sm:$0xff] %vm250_vm1, %v3180_v10  ;;  %v3183_v30 = vadd.f32 %v6627_v27, %v2985_v23  ;;  %v2877_v32 = vpop.f32.mrf.mxu0  ;;  %v3486_v23 = vld [vmem:[#allocation2 + $0x328] sm:$0xff] }
 0x214   : > { %2952 = vst.msk [vmem:[#allocation2 + $0x2f8] sm:$0xff] %vm250_vm1, %v2920_v41  ;;  %v2918_v33 = vadd.f32 %v2877_v32, %v2720_v31  ;;  %v3140_v48 = vpop.f32.mrf.mxu1  ;;  %v3226_v41 = vld [vmem:[#allocation2 + $0x250] sm:$0xff] }
 0x215   : > { %3215 = vst.msk [vmem:[#allocation2 + $0x3f8] sm:$0xff] %vm250_vm1, %v3183_v30  ;;  %v3181_v36 = vadd.f32 %v3140_v48, %v2983_v35  ;;  %v6632_v38 = vpop.f32.mrf.mxu0  ;;  %v3491_v31 = vld [vmem:[#allocation2 + $0x350] sm:$0xff] }
 0x216   : > { %2950 = vst.msk [vmem:[#allocation2 + $0x2e8] sm:$0xff] %vm250_vm1, %v2918_v33  ;;  %v3419_v42 = vadd.f32 %v6632_v38, %v3218_v37  ;;  %v6666_v61 = vpop.f32.mrf.mxu1 }
 0x217   : > { %3213 = vst.msk [vmem:[#allocation2 + $0x3e8] sm:$0xff] %vm250_vm1, %v3181_v36  ;;  %v3681_v45 = vadd.f32 %v6666_v61, %v3483_v43  ;;  %v3290_v19 = vpop.f32.mrf.mxu0  ;;  %v3224_v36 = vld [vmem:[#allocation2 + $0x240] sm:$0xff] }
 0x218   : > { %3451 = vst.msk [vmem:[#allocation2 + $0x210] sm:$0xff] %vm250_vm1, %v3419_v42  ;;  %v3417_v49 = vadd.f32 %v3290_v19, %v3216_v53  ;;  %v3552_v50 = vpop.f32.mrf.mxu1  ;;  %v3489_v43 = vld [vmem:[#allocation2 + $0x340] sm:$0xff]  ;;  %v3227_v19 = vld [vmem:[#allocation2 + $0x258] sm:$0xff] }
 0x219   : > { %3713 = vst.msk [vmem:[#allocation2 + $0x310] sm:$0xff] %vm250_vm1, %v3681_v45  ;;  %v3679_v47 = vadd.f32 %v3552_v50, %v3481_v40  ;;  %v6633_v54 = vpop.f32.mrf.mxu0 }
 0x21a   : > { %3449 = vst.msk [vmem:[#allocation2 + $0x200] sm:$0xff] %vm250_vm1, %v3417_v49  ;;  %v3420_v62 = vadd.f32 %v6633_v54, %v3219_v51  ;;  %v6667_v5 = vpop.f32.mrf.mxu1 }
 0x21b   : > { %3711 = vst.msk [vmem:[#allocation2 + $0x300] sm:$0xff] %vm250_vm1, %v3679_v47  ;;  %v3682_v52 = vadd.f32 %v6667_v5, %v3484_v55  ;;  %v3293_v14 = vpop.f32.mrf.mxu0  ;;  %v3492_v47 = vld [vmem:[#allocation2 + $0x358] sm:$0xff]  ;;  %v3225_v55 = vld [vmem:[#allocation2 + $0x248] sm:$0xff] }
 0x21c   : > { %3452 = vst.msk [vmem:[#allocation2 + $0x218] sm:$0xff] %vm250_vm1, %v3420_v62  ;;  %v3418_v28 = vadd.f32 %v3293_v14, %v3217_v57  ;;  %v3555_v26 = vpop.f32.mrf.mxu1  ;;  %v3490_v14 = vld [vmem:[#allocation2 + $0x348] sm:$0xff] }
 0x21d   : > { %3714 = vst.msk [vmem:[#allocation2 + $0x318] sm:$0xff] %vm250_vm1, %v3682_v52  ;;  %v3680_v59 = vadd.f32 %v3555_v26, %v3482_v58  ;;  %v6636_v60 = vpop.f32.mrf.mxu0 }
 0x21e   : > { %3450 = vst.msk [vmem:[#allocation2 + $0x208] sm:$0xff] %vm250_vm1, %v3418_v28  ;;  %v3423_v18 = vadd.f32 %v6636_v60, %v3222_v17  ;;  %v6670_v29 = vpop.f32.mrf.mxu1 }
 0x21f   : > { %3712 = vst.msk [vmem:[#allocation2 + $0x308] sm:$0xff] %vm250_vm1, %v3680_v59  ;;  %v3685_v12 = vadd.f32 %v6670_v29, %v3487_v63  ;;  %v3306_v2 = vpop.f32.mrf.mxu0  ;;  %v5232_v3 = vld [vmem:[#allocation2 + $0x210] sm:$0xff] }
 0x220   : > { %3455 = vst.msk [vmem:[#allocation2 + $0x230] sm:$0xff] %vm250_vm1, %v3423_v18  ;;  %v3421_v4 = vadd.f32 %v3306_v2, %v3220_v0  ;;  %v3568_v8 = vpop.f32.mrf.mxu1  ;;  %v5264_v56 = vadd.f32 %v8472_v7, %v5232_v3  ;;  %v3230_v59 = vld [vmem:[#allocation2 + $0x270] sm:$0xff]  ;;  %v3228_v2 = vld [vmem:[#allocation2 + $0x260] sm:$0xff] }
 0x221   : > { %3717 = vst.msk [vmem:[#allocation2 + $0x330] sm:$0xff] %vm250_vm1, %v3685_v12  ;;  %v3683_v9 = vadd.f32 %v3568_v8, %v3485_v6  ;;  %v6637_v11 = vpop.f32.mrf.mxu0  ;;  %v5230_v39 = vld [vmem:[#allocation2 + $0x200] sm:$0xff]  ;;  %v3495_v63 = vld [vmem:[#allocation2 + $0x370] sm:$0xff] }
 0x222   : > { %3453 = vst.msk [vmem:[#allocation2 + $0x220] sm:$0xff] %vm250_vm1, %v3421_v4  ;;  %v3424_v13 = vadd.f32 %v6637_v11, %v3223_v46  ;;  %v6671_v15 = vpop.f32.mrf.mxu1  ;;  %5951 = vst.msk [vmem:[%s8087_s7 + $0x30] sm:$0xff] %vm250_vm1, %v5264_v56  ;;  %v5262_v16 = vadd.f32 %v8472_v7, %v5230_v39  ;;  %v3493_v8 = vld [vmem:[#allocation2 + $0x360] sm:$0xff]  ;;  %v3231_v11 = vld [vmem:[#allocation2 + $0x278] sm:$0xff] }
 0x223   : > { %3715 = vst.msk [vmem:[#allocation2 + $0x320] sm:$0xff] %vm250_vm1, %v3683_v9  ;;  %v3686_v34 = vadd.f32 %v6671_v15, %v3488_v22  ;;  %v3309_v44 = vpop.f32.mrf.mxu0  ;;  %v5233_v21 = vld [vmem:[#allocation2 + $0x218] sm:$0xff] }
 0x224   : > { %3456 = vst.msk [vmem:[#allocation2 + $0x238] sm:$0xff] %vm250_vm1, %v3424_v13  ;;  %v3422_v1 = vadd.f32 %v3309_v44, %v3221_v20  ;;  %v3571_v10 = vpop.f32.mrf.mxu1  ;;  %v5265_v24 = vadd.f32 %v8472_v7, %v5233_v21  ;;  %5949 = vst.msk [vmem:[%s8087_s7 + $0x10] sm:$0xff] %vm250_vm1, %v5262_v16  ;;  %v3496_v15 = vld [vmem:[#allocation2 + $0x378] sm:$0xff]  ;;  %v3229_v44 = vld [vmem:[#allocation2 + $0x268] sm:$0xff] }
 0x225   : > { %3718 = vst.msk [vmem:[#allocation2 + $0x338] sm:$0xff] %vm250_vm1, %v3686_v34  ;;  %v3684_v25 = vadd.f32 %v3571_v10, %v3486_v23  ;;  %v6640_v27 = vpop.f32.mrf.mxu0  ;;  %v5231_v35 = vld [vmem:[#allocation2 + $0x208] sm:$0xff] }
 0x226   : > { %3454 = vst.msk [vmem:[#allocation2 + $0x228] sm:$0xff] %vm250_vm1, %v3422_v1  ;;  %v3427_v30 = vadd.f32 %v6640_v27, %v3226_v41  ;;  %v6674_v32 = vpop.f32.mrf.mxu1  ;;  %5952 = vst.msk [vmem:[%s8087_s7 + $0x38] sm:$0xff] %vm250_vm1, %v5265_v24  ;;  %v5263_v33 = vadd.f32 %v8472_v7, %v5231_v35  ;;  %v3494_v10 = vld [vmem:[#allocation2 + $0x368] sm:$0xff]  ;;  %v3234_v27 = vld [vmem:[#allocation2 + $0x290] sm:$0xff] }
 0x227   : > { %3716 = vst.msk [vmem:[#allocation2 + $0x328] sm:$0xff] %vm250_vm1, %v3684_v25  ;;  %v3689_v48 = vadd.f32 %v6674_v32, %v3491_v31  ;;  %v3322_v37 = vpop.f32.mrf.mxu0  ;;  %v5236_v38 = vld [vmem:[#allocation2 + $0x230] sm:$0xff] }
 0x228   : > { %3459 = vst.msk [vmem:[#allocation2 + $0x250] sm:$0xff] %vm250_vm1, %v3427_v30  ;;  %v3425_v42 = vadd.f32 %v3322_v37, %v3224_v36  ;;  %v3584_v61 = vpop.f32.mrf.mxu1  ;;  %5950 = vst.msk [vmem:[%s8087_s7 + $0x18] sm:$0xff] %vm250_vm1, %v5263_v33  ;;  %v5268_v45 = vadd.f32 %v8472_v7, %v5236_v38  ;;  %v3499_v32 = vld [vmem:[#allocation2 + $0x390] sm:$0xff]  ;;  %v3232_v37 = vld [vmem:[#allocation2 + $0x280] sm:$0xff] }
 0x229   : > { %3721 = vst.msk [vmem:[#allocation2 + $0x350] sm:$0xff] %vm250_vm1, %v3689_v48  ;;  %v3687_v53 = vadd.f32 %v3584_v61, %v3489_v43  ;;  %v6641_v49 = vpop.f32.mrf.mxu0  ;;  %v5234_v40 = vld [vmem:[#allocation2 + $0x220] sm:$0xff] }
 0x22a   : > { %3457 = vst.msk [vmem:[#allocation2 + $0x240] sm:$0xff] %vm250_vm1, %v3425_v42  ;;  %v3428_v50 = vadd.f32 %v6641_v49, %v3227_v19  ;;  %v6675_v51 = vpop.f32.mrf.mxu1  ;;  %5955 = vst.msk [vmem:[%s8087_s7 + $0x70] sm:$0xff] %vm250_vm1, %v5268_v45  ;;  %v5266_v54 = vadd.f32 %v8472_v7, %v5234_v40  ;;  %v3497_v61 = vld [vmem:[#allocation2 + $0x380] sm:$0xff]  ;;  %v3235_v49 = vld [vmem:[#allocation2 + $0x298] sm:$0xff] }
 0x22b   : > { %3719 = vst.msk [vmem:[#allocation2 + $0x340] sm:$0xff] %vm250_vm1, %v3687_v53  ;;  %v3690_v62 = vadd.f32 %v6675_v51, %v3492_v47  ;;  %v3325_v5 = vpop.f32.mrf.mxu0  ;;  %v5237_v52 = vld [vmem:[#allocation2 + $0x238] sm:$0xff] }
 0x22c   : > { %3460 = vst.msk [vmem:[#allocation2 + $0x258] sm:$0xff] %vm250_vm1, %v3428_v50  ;;  %v3426_v57 = vadd.f32 %v3325_v5, %v3225_v55  ;;  %v3587_v28 = vpop.f32.mrf.mxu1  ;;  %v5269_v58 = vadd.f32 %v8472_v7, %v5237_v52  ;;  %5953 = vst.msk [vmem:[%s8087_s7 + $0x50] sm:$0xff] %vm250_vm1, %v5266_v54  ;;  %v3500_v51 = vld [vmem:[#allocation2 + $0x398] sm:$0xff]  ;;  %v3233_v5 = vld [vmem:[#allocation2 + $0x288] sm:$0xff] }
 0x22d   : > { %3722 = vst.msk [vmem:[#allocation2 + $0x358] sm:$0xff] %vm250_vm1, %v3690_v62  ;;  %v3688_v26 = vadd.f32 %v3587_v28, %v3490_v14  ;;  %v6644_v17 = vpop.f32.mrf.mxu0  ;;  %v5235_v60 = vld [vmem:[#allocation2 + $0x228] sm:$0xff] }
 0x22e   : > { %3458 = vst.msk [vmem:[#allocation2 + $0x248] sm:$0xff] %vm250_vm1, %v3426_v57  ;;  %v3431_v18 = vadd.f32 %v6644_v17, %v3230_v59  ;;  %v6678_v29 = vpop.f32.mrf.mxu1  ;;  %5956 = vst.msk [vmem:[%s8087_s7 + $0x78] sm:$0xff] %vm250_vm1, %v5269_v58  ;;  %v5267_v12 = vadd.f32 %v8472_v7, %v5235_v60  ;;  %v3498_v28 = vld [vmem:[#allocation2 + $0x388] sm:$0xff]  ;;  %v3238_v17 = vld [vmem:[#allocation2 + $0x2b0] sm:$0xff] }
 0x22f   : > { %3720 = vst.msk [vmem:[#allocation2 + $0x348] sm:$0xff] %vm250_vm1, %v3688_v26  ;;  %v3693_v0 = vadd.f32 %v6678_v29, %v3495_v63  ;;  %v3338_v3 = vpop.f32.mrf.mxu0  ;;  %v5240_v4 = vld [vmem:[#allocation2 + $0x250] sm:$0xff] }
 0x230   : > { %3463 = vst.msk [vmem:[#allocation2 + $0x270] sm:$0xff] %vm250_vm1, %v3431_v18  ;;  %v3429_v6 = vadd.f32 %v3338_v3, %v3228_v2  ;;  %v3600_v56 = vpop.f32.mrf.mxu1  ;;  %5954 = vst.msk [vmem:[%s8087_s7 + $0x58] sm:$0xff] %vm250_vm1, %v5267_v12  ;;  %v5272_v9 = vadd.f32 %v8472_v7, %v5240_v4  ;;  %v3503_v29 = vld [vmem:[#allocation2 + $0x3b0] sm:$0xff]  ;;  %v3236_v3 = vld [vmem:[#allocation2 + $0x2a0] sm:$0xff] }
 0x231   : > { %3725 = vst.msk [vmem:[#allocation2 + $0x370] sm:$0xff] %vm250_vm1, %v3693_v0  ;;  %v3691_v46 = vadd.f32 %v3600_v56, %v3493_v8  ;;  %v6645_v39 = vpop.f32.mrf.mxu0  ;;  %v5238_v13 = vld [vmem:[#allocation2 + $0x240] sm:$0xff] }
 0x232   : > { %3461 = vst.msk [vmem:[#allocation2 + $0x260] sm:$0xff] %vm250_vm1, %v3429_v6  ;;  %v3432_v22 = vadd.f32 %v6645_v39, %v3231_v11  ;;  %v6679_v16 = vpop.f32.mrf.mxu1  ;;  %5959 = vst.msk [vmem:[%s8087_s7 + $0xb0] sm:$0xff] %vm250_vm1, %v5272_v9  ;;  %v5270_v34 = vadd.f32 %v8472_v7, %v5238_v13  ;;  %v3501_v56 = vld [vmem:[#allocation2 + $0x3a0] sm:$0xff]  ;;  %v3239_v39 = vld [vmem:[#allocation2 + $0x2b8] sm:$0xff] }
 0x233   : > { %3723 = vst.msk [vmem:[#allocation2 + $0x360] sm:$0xff] %vm250_vm1, %v3691_v46  ;;  %v3694_v20 = vadd.f32 %v6679_v16, %v3496_v15  ;;  %v3341_v21 = vpop.f32.mrf.mxu0  ;;  %v5241_v1 = vld [vmem:[#allocation2 + $0x258] sm:$0xff] }
 0x234   : > { %3464 = vst.msk [vmem:[#allocation2 + $0x278] sm:$0xff] %vm250_vm1, %v3432_v22  ;;  %v3430_v23 = vadd.f32 %v3341_v21, %v3229_v44  ;;  %v3603_v24 = vpop.f32.mrf.mxu1  ;;  %v5273_v25 = vadd.f32 %v8472_v7, %v5241_v1  ;;  %5957 = vst.msk [vmem:[%s8087_s7 + $0x90] sm:$0xff] %vm250_vm1, %v5270_v34  ;;  %v3504_v16 = vld [vmem:[#allocation2 + $0x3b8] sm:$0xff]  ;;  %v3237_v21 = vld [vmem:[#allocation2 + $0x2a8] sm:$0xff] }
 0x235   : > { %3726 = vst.msk [vmem:[#allocation2 + $0x378] sm:$0xff] %vm250_vm1, %v3694_v20  ;;  %v3692_v41 = vadd.f32 %v3603_v24, %v3494_v10  ;;  %v6648_v35 = vpop.f32.mrf.mxu0  ;;  %v5239_v30 = vld [vmem:[#allocation2 + $0x248] sm:$0xff] }
 0x236   : > { %3462 = vst.msk [vmem:[#allocation2 + $0x268] sm:$0xff] %vm250_vm1, %v3430_v23  ;;  %v3435_v31 = vadd.f32 %v6648_v35, %v3234_v27  ;;  %v6682_v33 = vpop.f32.mrf.mxu1  ;;  %5960 = vst.msk [vmem:[%s8087_s7 + $0xb8] sm:$0xff] %vm250_vm1, %v5273_v25  ;;  %v5271_v48 = vadd.f32 %v8472_v7, %v5239_v30  ;;  %v3502_v24 = vld [vmem:[#allocation2 + $0x3a8] sm:$0xff]  ;;  %v3242_v35 = vld [vmem:[#allocation2 + $0x2d0] sm:$0xff] }
 0x237   : > { %3724 = vst.msk [vmem:[#allocation2 + $0x368] sm:$0xff] %vm250_vm1, %v3692_v41  ;;  %v3697_v36 = vadd.f32 %v6682_v33, %v3499_v32  ;;  %v3354_v38 = vpop.f32.mrf.mxu0  ;;  %v5244_v42 = vld [vmem:[#allocation2 + $0x270] sm:$0xff] }
 0x238   : > { %3467 = vst.msk [vmem:[#allocation2 + $0x290] sm:$0xff] %vm250_vm1, %v3435_v31  ;;  %v3433_v43 = vadd.f32 %v3354_v38, %v3232_v37  ;;  %v3616_v45 = vpop.f32.mrf.mxu1  ;;  %5958 = vst.msk [vmem:[%s8087_s7 + $0x98] sm:$0xff] %vm250_vm1, %v5271_v48  ;;  %v5276_v53 = vadd.f32 %v8472_v7, %v5244_v42  ;;  %v3507_v33 = vld [vmem:[#allocation2 + $0x3d0] sm:$0xff]  ;;  %v3240_v38 = vld [vmem:[#allocation2 + $0x2c0] sm:$0xff] }
 0x239   : > { %3729 = vst.msk [vmem:[#allocation2 + $0x390] sm:$0xff] %vm250_vm1, %v3697_v36  ;;  %v3695_v19 = vadd.f32 %v3616_v45, %v3497_v61  ;;  %v6649_v40 = vpop.f32.mrf.mxu0  ;;  %v5242_v50 = vld [vmem:[#allocation2 + $0x260] sm:$0xff] }
 0x23a   : > { %3465 = vst.msk [vmem:[#allocation2 + $0x280] sm:$0xff] %vm250_vm1, %v3433_v43  ;;  %v3436_v47 = vadd.f32 %v6649_v40, %v3235_v49  ;;  %v6683_v54 = vpop.f32.mrf.mxu1  ;;  %5963 = vst.msk [vmem:[%s8087_s7 + $0xf0] sm:$0xff] %vm250_vm1, %v5276_v53  ;;  %v5274_v62 = vadd.f32 %v8472_v7, %v5242_v50  ;;  %v3505_v45 = vld [vmem:[#allocation2 + $0x3c0] sm:$0xff]  ;;  %v3243_v40 = vld [vmem:[#allocation2 + $0x2d8] sm:$0xff] }
 0x23b   : > { %3727 = vst.msk [vmem:[#allocation2 + $0x380] sm:$0xff] %vm250_vm1, %v3695_v19  ;;  %v3698_v55 = vadd.f32 %v6683_v54, %v3500_v51  ;;  %v3357_v52 = vpop.f32.mrf.mxu0  ;;  %v5245_v57 = vld [vmem:[#allocation2 + $0x278] sm:$0xff] }
 0x23c   : > { %3468 = vst.msk [vmem:[#allocation2 + $0x298] sm:$0xff] %vm250_vm1, %v3436_v47  ;;  %v3434_v14 = vadd.f32 %v3357_v52, %v3233_v5  ;;  %v3619_v58 = vpop.f32.mrf.mxu1  ;;  %v5277_v26 = vadd.f32 %v8472_v7, %v5245_v57  ;;  %5961 = vst.msk [vmem:[%s8087_s7 + $0xd0] sm:$0xff] %vm250_vm1, %v5274_v62  ;;  %v3508_v54 = vld [vmem:[#allocation2 + $0x3d8] sm:$0xff]  ;;  %v3241_v52 = vld [vmem:[#allocation2 + $0x2c8] sm:$0xff] }
 0x23d   : > { %3730 = vst.msk [vmem:[#allocation2 + $0x398] sm:$0xff] %vm250_vm1, %v3698_v55  ;;  %v3696_v59 = vadd.f32 %v3619_v58, %v3498_v28  ;;  %v6652_v60 = vpop.f32.mrf.mxu0  ;;  %v5243_v18 = vld [vmem:[#allocation2 + $0x268] sm:$0xff] }
 0x23e   : > { %3466 = vst.msk [vmem:[#allocation2 + $0x288] sm:$0xff] %vm250_vm1, %v3434_v14  ;;  %v3439_v63 = vadd.f32 %v6652_v60, %v3238_v17  ;;  %v6686_v12 = vpop.f32.mrf.mxu1  ;;  %5964 = vst.msk [vmem:[%s8087_s7 + $0xf8] sm:$0xff] %vm250_vm1, %v5277_v26  ;;  %v5275_v0 = vadd.f32 %v8472_v7, %v5243_v18  ;;  %v3506_v58 = vld [vmem:[#allocation2 + $0x3c8] sm:$0xff]  ;;  %v3246_v60 = vld [vmem:[#allocation2 + $0x2f0] sm:$0xff] }
 0x23f   : > { %3728 = vst.msk [vmem:[#allocation2 + $0x388] sm:$0xff] %vm250_vm1, %v3696_v59  ;;  %v3701_v2 = vadd.f32 %v6686_v12, %v3503_v29  ;;  %v3370_v4 = vpop.f32.mrf.mxu0  ;;  %v5248_v6 = vld [vmem:[#allocation2 + $0x290] sm:$0xff] }
 0x240   : > { %3471 = vst.msk [vmem:[#allocation2 + $0x2b0] sm:$0xff] %vm250_vm1, %v3439_v63  ;;  %v3437_v8 = vadd.f32 %v3370_v4, %v3236_v3  ;;  %v3632_v9 = vpop.f32.mrf.mxu1  ;;  %5962 = vst.msk [vmem:[%s8087_s7 + $0xd8] sm:$0xff] %vm250_vm1, %v5275_v0  ;;  %v5280_v46 = vadd.f32 %v8472_v7, %v5248_v6  ;;  %v3511_v12 = vld [vmem:[#allocation2 + $0x3f0] sm:$0xff]  ;;  %v3244_v4 = vld [vmem:[#allocation2 + $0x2e0] sm:$0xff] }
 0x241   : > { %3733 = vst.msk [vmem:[#allocation2 + $0x3b0] sm:$0xff] %vm250_vm1, %v3701_v2  ;;  %v3699_v11 = vadd.f32 %v3632_v9, %v3501_v56  ;;  %v6653_v13 = vpop.f32.mrf.mxu0  ;;  %v5246_v22 = vld [vmem:[#allocation2 + $0x280] sm:$0xff] }
 0x242   : > { %3469 = vst.msk [vmem:[#allocation2 + $0x2a0] sm:$0xff] %vm250_vm1, %v3437_v8  ;;  %v3440_v15 = vadd.f32 %v6653_v13, %v3239_v39  ;;  %v6687_v34 = vpop.f32.mrf.mxu1  ;;  %5967 = vst.msk [vmem:[%s8087_s7 + $0x130] sm:$0xff] %vm250_vm1, %v5280_v46  ;;  %v5278_v20 = vadd.f32 %v8472_v7, %v5246_v22  ;;  %v3509_v9 = vld [vmem:[#allocation2 + $0x3e0] sm:$0xff]  ;;  %v3247_v13 = vld [vmem:[#allocation2 + $0x2f8] sm:$0xff] }
 0x243   : > { %3731 = vst.msk [vmem:[#allocation2 + $0x3a0] sm:$0xff] %vm250_vm1, %v3699_v11  ;;  %v3702_v44 = vadd.f32 %v6687_v34, %v3504_v16  ;;  %v3373_v1 = vpop.f32.mrf.mxu0  ;;  %v5249_v23 = vld [vmem:[#allocation2 + $0x298] sm:$0xff] }
 0x244   : > { %3472 = vst.msk [vmem:[#allocation2 + $0x2b8] sm:$0xff] %vm250_vm1, %v3440_v15  ;;  %v3438_v10 = vadd.f32 %v3373_v1, %v3237_v21  ;;  %v3635_v25 = vpop.f32.mrf.mxu1  ;;  %v5281_v41 = vadd.f32 %v8472_v7, %v5249_v23  ;;  %5965 = vst.msk [vmem:[%s8087_s7 + $0x110] sm:$0xff] %vm250_vm1, %v5278_v20  ;;  %v3512_v34 = vld [vmem:[#allocation2 + $0x3f8] sm:$0xff]  ;;  %v3245_v1 = vld [vmem:[#allocation2 + $0x2e8] sm:$0xff] }
 0x245   : > { %3734 = vst.msk [vmem:[#allocation2 + $0x3b8] sm:$0xff] %vm250_vm1, %v3702_v44  ;;  %v3700_v27 = vadd.f32 %v3635_v25, %v3502_v24  ;;  %v6656_v30 = vpop.f32.mrf.mxu0  ;;  %v5247_v31 = vld [vmem:[#allocation2 + $0x288] sm:$0xff] }
 0x246   : > { %3470 = vst.msk [vmem:[#allocation2 + $0x2a8] sm:$0xff] %vm250_vm1, %v3438_v10  ;;  %v3443_v32 = vadd.f32 %v6656_v30, %v3242_v35  ;;  %v6690_v48 = vpop.f32.mrf.mxu1  ;;  %5968 = vst.msk [vmem:[%s8087_s7 + $0x138] sm:$0xff] %vm250_vm1, %v5281_v41  ;;  %v5279_v36 = vadd.f32 %v8472_v7, %v5247_v31  ;;  %v3510_v25 = vld [vmem:[#allocation2 + $0x3e8] sm:$0xff]  ;;  %v3799_v30 = vld [vmem:[#allocation2 + $0x110] sm:$0xff] }
 0x247   : > { %3732 = vst.msk [vmem:[#allocation2 + $0x3a8] sm:$0xff] %vm250_vm1, %v3700_v27  ;;  %v3705_v37 = vadd.f32 %v6690_v48, %v3507_v33  ;;  %v3386_v42 = vpop.f32.mrf.mxu0  ;;  %v5252_v43 = vld [vmem:[#allocation2 + $0x2b0] sm:$0xff] }
 0x248   : > { %3475 = vst.msk [vmem:[#allocation2 + $0x2d0] sm:$0xff] %vm250_vm1, %v3443_v32  ;;  %v3441_v61 = vadd.f32 %v3386_v42, %v3240_v38  ;;  %v3648_v53 = vpop.f32.mrf.mxu1  ;;  %5966 = vst.msk [vmem:[%s8087_s7 + $0x118] sm:$0xff] %vm250_vm1, %v5279_v36  ;;  %v5284_v19 = vadd.f32 %v8472_v7, %v5252_v43 }
 0x249   : > { %3737 = vst.msk [vmem:[#allocation2 + $0x3d0] sm:$0xff] %vm250_vm1, %v3705_v37  ;;  %v3703_v49 = vadd.f32 %v3648_v53, %v3505_v45  ;;  %v6657_v50 = vpop.f32.mrf.mxu0  ;;  %v5250_v47 = vld [vmem:[#allocation2 + $0x2a0] sm:$0xff]  ;;  %v3800_v53 = vld [vmem:[#allocation2 + $0x118] sm:$0xff] }
 0x24a   : > { %3473 = vst.msk [vmem:[#allocation2 + $0x2c0] sm:$0xff] %vm250_vm1, %v3441_v61  ;;  %v3444_v51 = vadd.f32 %v6657_v50, %v3243_v40  ;;  %v6691_v62 = vpop.f32.mrf.mxu1  ;;  %5971 = vst.msk [vmem:[%s8087_s7 + $0x170] sm:$0xff] %vm250_vm1, %v5284_v19  ;;  %v5282_v55 = vadd.f32 %v8472_v7, %v5250_v47  ;;  %v3797_v37 = vld [vmem:[#allocation2 + $0x100] sm:$0xff] }
 0x24b   : > { %3735 = vst.msk [vmem:[#allocation2 + $0x3c0] sm:$0xff] %vm250_vm1, %v3703_v49  ;;  %v3706_v5 = vadd.f32 %v6691_v62, %v3508_v54  ;;  %v3389_v57 = vpop.f32.mrf.mxu0  ;;  %v5253_v14 = vld [vmem:[#allocation2 + $0x2b8] sm:$0xff] }
 0x24c   : > { %3476 = vst.msk [vmem:[#allocation2 + $0x2d8] sm:$0xff] %vm250_vm1, %v3444_v51  ;;  %v3442_v28 = vadd.f32 %v3389_v57, %v3241_v52  ;;  %v3651_v26 = vpop.f32.mrf.mxu1  ;;  %v5285_v59 = vadd.f32 %v8472_v7, %v5253_v14  ;;  %5969 = vst.msk [vmem:[%s8087_s7 + $0x150] sm:$0xff] %vm250_vm1, %v5282_v55  ;;  %v3798_v51 = vld [vmem:[#allocation2 + $0x108] sm:$0xff]  ;;  %v3803_v57 = vld [vmem:[#allocation2 + $0x130] sm:$0xff] }
 0x24d   : > { %3738 = vst.msk [vmem:[#allocation2 + $0x3d8] sm:$0xff] %vm250_vm1, %v3706_v5  ;;  %v3704_v17 = vadd.f32 %v3651_v26, %v3506_v58  ;;  %v6660_v18 = vpop.f32.mrf.mxu0  ;;  %v5251_v63 = vld [vmem:[#allocation2 + $0x2a8] sm:$0xff] }
 0x24e   : > { %3474 = vst.msk [vmem:[#allocation2 + $0x2c8] sm:$0xff] %vm250_vm1, %v3442_v28  ;;  %v3447_v29 = vadd.f32 %v6660_v18, %v3246_v60  ;;  %v6694_v0 = vpop.f32.mrf.mxu1  ;;  %5972 = vst.msk [vmem:[%s8087_s7 + $0x178] sm:$0xff] %vm250_vm1, %v5285_v59  ;;  %v5283_v2 = vadd.f32 %v8472_v7, %v5251_v63  ;;  %v3801_v60 = vld [vmem:[#allocation2 + $0x120] sm:$0xff] }
 0x24f   : > { %3736 = vst.msk [vmem:[#allocation2 + $0x3c8] sm:$0xff] %vm250_vm1, %v3704_v17  ;;  %v3709_v3 = vadd.f32 %v6694_v0, %v3511_v12  ;;  %v3402_v6 = vpop.f32.mrf.mxu0  ;;  %v5256_v8 = vld [vmem:[#allocation2 + $0x2d0] sm:$0xff] }
 0x250   : > { %3479 = vst.msk [vmem:[#allocation2 + $0x2f0] sm:$0xff] %vm250_vm1, %v3447_v29  ;;  %v3445_v56 = vadd.f32 %v3402_v6, %v3244_v4  ;;  %v3664_v46 = vpop.f32.mrf.mxu1  ;;  %5970 = vst.msk [vmem:[%s8087_s7 + $0x158] sm:$0xff] %vm250_vm1, %v5283_v2  ;;  %v5288_v11 = vadd.f32 %v8472_v7, %v5256_v8  ;;  %v3804_v2 = vld [vmem:[#allocation2 + $0x138] sm:$0xff] }
 0x251   : > { %3741 = vst.msk [vmem:[#allocation2 + $0x3f0] sm:$0xff] %vm250_vm1, %v3709_v3  ;;  %v3707_v39 = vadd.f32 %v3664_v46, %v3509_v9  ;;  %v6661_v22 = vpop.f32.mrf.mxu0  ;;  %v5254_v15 = vld [vmem:[#allocation2 + $0x2c0] sm:$0xff]  ;;  %v3802_v9 = vld [vmem:[#allocation2 + $0x128] sm:$0xff] }
 0x252   : > { %3477 = vst.msk [vmem:[#allocation2 + $0x2e0] sm:$0xff] %vm250_vm1, %v3445_v56  ;;  %v3448_v16 = vadd.f32 %v6661_v22, %v3247_v13  ;;  %v6695_v20 = vpop.f32.mrf.mxu1  ;;  %5975 = vst.msk [vmem:[%s8087_s7 + $0x1b0] sm:$0xff] %vm250_vm1, %v5288_v11  ;;  %v5286_v44 = vadd.f32 %v8472_v7, %v5254_v15  ;;  %v3807_v15 = vld [vmem:[#allocation2 + $0x150] sm:$0xff] }
 0x253   : > { %3739 = vst.msk [vmem:[#allocation2 + $0x3e0] sm:$0xff] %vm250_vm1, %v3707_v39  ;;  %v3710_v21 = vadd.f32 %v6695_v20, %v3512_v34  ;;  %v3405_v23 = vpop.f32.mrf.mxu0  ;;  %v5257_v10 = vld [vmem:[#allocation2 + $0x2d8] sm:$0xff] }
 0x254   : > { %3480 = vst.msk [vmem:[#allocation2 + $0x2f8] sm:$0xff] %vm250_vm1, %v3448_v16  ;;  %v3446_v24 = vadd.f32 %v3405_v23, %v3245_v1  ;;  %v3667_v41 = vpop.f32.mrf.mxu1  ;;  %v5289_v27 = vadd.f32 %v8472_v7, %v5257_v10  ;;  %5973 = vst.msk [vmem:[%s8087_s7 + $0x190] sm:$0xff] %vm250_vm1, %v5286_v44  ;;  %v3805_v1 = vld [vmem:[#allocation2 + $0x140] sm:$0xff] }
 0x255   : > { %3742 = vst.msk [vmem:[#allocation2 + $0x3f8] sm:$0xff] %vm250_vm1, %v3710_v21  ;;  %v3708_v35 = vadd.f32 %v3667_v41, %v3510_v25  ;;  %v6700_v31 = vpop.f32.mrf.mxu0  ;;  %v5255_v32 = vld [vmem:[#allocation2 + $0x2c8] sm:$0xff] }
 0x256   : > { %3478 = vst.msk [vmem:[#allocation2 + $0x2e8] sm:$0xff] %vm250_vm1, %v3446_v24  ;;  %v4045_v33 = vadd.f32 %v6700_v31, %v3799_v30  ;;  %v6734_v48 = vpop.f32.mrf.mxu1  ;;  %5976 = vst.msk [vmem:[%s8087_s7 + $0x1b8] sm:$0xff] %vm250_vm1, %v5289_v27  ;;  %v5287_v36 = vadd.f32 %v8472_v7, %v5255_v32  ;;  %v3808_v27 = vld [vmem:[#allocation2 + $0x158] sm:$0xff] }
 0x257   : > { %3740 = vst.msk [vmem:[#allocation2 + $0x3e8] sm:$0xff] %vm250_vm1, %v3708_v35  ;;  %v3916_v38 = vpop.f32.mrf.mxu0  ;;  %v5260_v42 = vld [vmem:[#allocation2 + $0x2f0] sm:$0xff] }
 0x258   : > { %4077 = vst.msk [vmem:[#allocation2 + $0x110] sm:$0xff] %vm250_vm1, %v4045_v33  ;;  %v4043_v43 = vadd.f32 %v3916_v38, %v3797_v37  ;;  %v4181_v61 = vpop.f32.mrf.mxu1  ;;  %5974 = vst.msk [vmem:[%s8087_s7 + $0x198] sm:$0xff] %vm250_vm1, %v5287_v36  ;;  %v5292_v45 = vadd.f32 %v8472_v7, %v5260_v42  ;;  %v3806_v37 = vld [vmem:[#allocation2 + $0x148] sm:$0xff] }
 0x259   : > { %v6701_v19 = vpop.f32.mrf.mxu0  ;;  %v5258_v49 = vld [vmem:[#allocation2 + $0x2e0] sm:$0xff] }
 0x25a   : > { %4075 = vst.msk [vmem:[#allocation2 + $0x100] sm:$0xff] %vm250_vm1, %v4043_v43  ;;  %v4046_v40 = vadd.f32 %v6701_v19, %v3800_v53  ;;  %v6735_v50 = vpop.f32.mrf.mxu1  ;;  %v5290_v47 = vadd.f32 %v8472_v7, %v5258_v49  ;;  %5979 = vst.msk [vmem:[%s8087_s7 + $0x1f0] sm:$0xff] %vm250_vm1, %v5292_v45  ;;  %v3811_v49 = vld [vmem:[#allocation2 + $0x170] sm:$0xff] }
 0x25b   : > { %v3919_v54 = vpop.f32.mrf.mxu0  ;;  %v5261_v62 = vld [vmem:[#allocation2 + $0x2f8] sm:$0xff] }
 0x25c   : > { %4078 = vst.msk [vmem:[#allocation2 + $0x118] sm:$0xff] %vm250_vm1, %v4046_v40  ;;  %v4044_v55 = vadd.f32 %v3919_v54, %v3798_v51  ;;  %v4184_v5 = vpop.f32.mrf.mxu1  ;;  %5977 = vst.msk [vmem:[%s8087_s7 + $0x1d0] sm:$0xff] %vm250_vm1, %v5290_v47  ;;  %v5293_v52 = vadd.f32 %v8472_v7, %v5261_v62 }
 0x25d   : > { %v6704_v14 = vpop.f32.mrf.mxu0  ;;  %v5259_v28 = vld [vmem:[#allocation2 + $0x2e8] sm:$0xff] }
 0x25e   : > { %4076 = vst.msk [vmem:[#allocation2 + $0x108] sm:$0xff] %vm250_vm1, %v4044_v55  ;;  %v4049_v58 = vadd.f32 %v6704_v14, %v3803_v57  ;;  %v6738_v26 = vpop.f32.mrf.mxu1  ;;  %v5291_v59 = vadd.f32 %v8472_v7, %v5259_v28  ;;  %5980 = vst.msk [vmem:[%s8087_s7 + $0x1f8] sm:$0xff] %vm250_vm1, %v5293_v52 }
 0x25f   : > { %v4109_v17 = vld [vmem:[#allocation2 + $0x110] sm:$0xff]  ;;  %v3932_v18 = vpop.f32.mrf.mxu0 }
 0x260   : > { %v4310_v63 = vadd.f32 %v6734_v48, %v4109_v17  ;;  %4081 = vst.msk [vmem:[#allocation2 + $0x130] sm:$0xff] %vm250_vm1, %v4049_v58  ;;  %v4047_v29 = vadd.f32 %v3932_v18, %v3801_v60  ;;  %v4197_v12 = vpop.f32.mrf.mxu1  ;;  %5978 = vst.msk [vmem:[%s8087_s7 + $0x1d8] sm:$0xff] %vm250_vm1, %v5291_v59  ;;  %v3812_v17 = vld [vmem:[#allocation2 + $0x178] sm:$0xff] }
 0x261   : > { %v4107_v0 = vld [vmem:[#allocation2 + $0x100] sm:$0xff]  ;;  %v6705_v3 = vpop.f32.mrf.mxu0 }
 0x262   : > { %4342 = vst.msk [vmem:[#allocation2 + $0x110] sm:$0xff] %vm250_vm1, %v4310_v63  ;;  %v4308_v4 = vadd.f32 %v4181_v61, %v4107_v0  ;;  %4079 = vst.msk [vmem:[#allocation2 + $0x120] sm:$0xff] %vm250_vm1, %v4047_v29  ;;  %v4050_v6 = vadd.f32 %v6705_v3, %v3804_v2  ;;  %v6739_v8 = vpop.f32.mrf.mxu1  ;;  %v3810_v2 = vld [vmem:[#allocation2 + $0x168] sm:$0xff] }
 0x263   : > { %v4110_v56 = vld [vmem:[#allocation2 + $0x118] sm:$0xff]  ;;  %v3935_v46 = vpop.f32.mrf.mxu0 }
 0x264   : > { %4340 = vst.msk [vmem:[#allocation2 + $0x100] sm:$0xff] %vm250_vm1, %v4308_v4  ;;  %v4311_v11 = vadd.f32 %v6735_v50, %v4110_v56  ;;  %4082 = vst.msk [vmem:[#allocation2 + $0x138] sm:$0xff] %vm250_vm1, %v4050_v6  ;;  %v4048_v39 = vadd.f32 %v3935_v46, %v3802_v9  ;;  %v4200_v13 = vpop.f32.mrf.mxu1 }
 0x265   : > { %v4108_v22 = vld [vmem:[#allocation2 + $0x108] sm:$0xff]  ;;  %v6708_v16 = vpop.f32.mrf.mxu0 }
 0x266   : > { %4343 = vst.msk [vmem:[#allocation2 + $0x118] sm:$0xff] %vm250_vm1, %v4311_v11  ;;  %v4309_v34 = vadd.f32 %v4184_v5, %v4108_v22  ;;  %4080 = vst.msk [vmem:[#allocation2 + $0x128] sm:$0xff] %vm250_vm1, %v4048_v39  ;;  %v4053_v20 = vadd.f32 %v6708_v16, %v3807_v15  ;;  %v6742_v44 = vpop.f32.mrf.mxu1  ;;  %v3809_v5 = vld [vmem:[#allocation2 + $0x160] sm:$0xff] }
 0x267   : > { %v4113_v21 = vld [vmem:[#allocation2 + $0x130] sm:$0xff]  ;;  %v3948_v23 = vpop.f32.mrf.mxu0 }
 0x268   : > { %4341 = vst.msk [vmem:[#allocation2 + $0x108] sm:$0xff] %vm250_vm1, %v4309_v34  ;;  %v4314_v10 = vadd.f32 %v6738_v26, %v4113_v21  ;;  %4085 = vst.msk [vmem:[#allocation2 + $0x150] sm:$0xff] %vm250_vm1, %v4053_v20  ;;  %v4051_v24 = vadd.f32 %v3948_v23, %v3805_v1  ;;  %v4213_v25 = vpop.f32.mrf.mxu1 }
 0x269   : > { %v4111_v41 = vld [vmem:[#allocation2 + $0x120] sm:$0xff]  ;;  %v6709_v35 = vpop.f32.mrf.mxu0  ;;  %v5007_v30 = vld [vmem:[#allocation2 + $0x110] sm:$0xff] }
 0x26a   : > { %4346 = vst.msk [vmem:[#allocation2 + $0x130] sm:$0xff] %vm250_vm1, %v4314_v10  ;;  %v4312_v31 = vadd.f32 %v4197_v12, %v4111_v41  ;;  %4083 = vst.msk [vmem:[#allocation2 + $0x140] sm:$0xff] %vm250_vm1, %v4051_v24  ;;  %v4054_v32 = vadd.f32 %v6709_v35, %v3808_v27  ;;  %v5039_v33 = vadd.f32 %v8472_v7, %v5007_v30  ;;  %v6743_v48 = vpop.f32.mrf.mxu1  ;;  %v3816_v27 = vld [vmem:[#allocation2 + $0x198] sm:$0xff] }
 0x26b   : > { %v4114_v36 = vld [vmem:[#allocation2 + $0x138] sm:$0xff]  ;;  %v3951_v38 = vpop.f32.mrf.mxu0  ;;  %v5005_v42 = vld [vmem:[#allocation2 + $0x100] sm:$0xff] }
 0x26c   : > { %4344 = vst.msk [vmem:[#allocation2 + $0x120] sm:$0xff] %vm250_vm1, %v4312_v31  ;;  %v4315_v43 = vadd.f32 %v6739_v8, %v4114_v36  ;;  %4086 = vst.msk [vmem:[#allocation2 + $0x158] sm:$0xff] %vm250_vm1, %v4054_v32  ;;  %v4052_v61 = vadd.f32 %v3951_v38, %v3806_v37  ;;  %5105 = vrot.lane.b32.xlu1 %v5039_v33, %s6902_s9  ;;  %v5037_v45 = vadd.f32 %v8472_v7, %v5005_v42  ;;  %v4216_v53 = vpop.f32.mrf.mxu1  ;;  %v3815_v8 = vld [vmem:[#allocation2 + $0x190] sm:$0xff]  ;;  %v3814_v37 = vld [vmem:[#allocation2 + $0x188] sm:$0xff] }
 0x26d   : > { %v4112_v19 = vld [vmem:[#allocation2 + $0x128] sm:$0xff]  ;;  %v6712_v40 = vpop.f32.mrf.mxu0  ;;  %v5008_v50 = vld [vmem:[#allocation2 + $0x118] sm:$0xff] }
 0x26e   : > { %4347 = vst.msk [vmem:[#allocation2 + $0x138] sm:$0xff] %vm250_vm1, %v4315_v43  ;;  %v4313_v47 = vadd.f32 %v4200_v13, %v4112_v19  ;;  %4084 = vst.msk [vmem:[#allocation2 + $0x148] sm:$0xff] %vm250_vm1, %v4052_v61  ;;  %v4057_v51 = vadd.f32 %v6712_v40, %v3811_v49  ;;  %5101 = vrot.lane.b32.xlu0 %v5037_v45, %s6902_s9  ;;  %v5040_v54 = vadd.f32 %v8472_v7, %v5008_v50  ;;  %v6746_v62 = vpop.f32.mrf.mxu1  ;;  %v3819_v61 = vld [vmem:[#allocation2 + $0x1b0] sm:$0xff] }
 0x26f   : > { %v4117_v55 = vld [vmem:[#allocation2 + $0x150] sm:$0xff]  ;;  %v3964_v52 = vpop.f32.mrf.mxu0  ;;  %v5006_v57 = vld [vmem:[#allocation2 + $0x108] sm:$0xff] }
 0x270   : > { %4345 = vst.msk [vmem:[#allocation2 + $0x128] sm:$0xff] %vm250_vm1, %v4313_v47  ;;  %v4318_v14 = vadd.f32 %v6742_v44, %v4117_v55  ;;  %4089 = vst.msk [vmem:[#allocation2 + $0x170] sm:$0xff] %vm250_vm1, %v4057_v51  ;;  %v4055_v28 = vadd.f32 %v3964_v52, %v3809_v5  ;;  %5107 = vrot.lane.b32.xlu1 %v5040_v54, %s6902_s9  ;;  %v5038_v58 = vadd.f32 %v8472_v7, %v5006_v57  ;;  %v4229_v26 = vpop.f32.mrf.mxu1  ;;  %v3813_v44 = vld [vmem:[#allocation2 + $0x180] sm:$0xff] }
 0x271   : > { %v4115_v59 = vld [vmem:[#allocation2 + $0x140] sm:$0xff]  ;;  %v6713_v60 = vpop.f32.mrf.mxu0  ;;  %v5011_v18 = vld [vmem:[#allocation2 + $0x130] sm:$0xff] }
 0x272   : > { %4350 = vst.msk [vmem:[#allocation2 + $0x150] sm:$0xff] %vm250_vm1, %v4318_v14  ;;  %v4316_v63 = vadd.f32 %v4213_v25, %v4115_v59  ;;  %4087 = vst.msk [vmem:[#allocation2 + $0x160] sm:$0xff] %vm250_vm1, %v4055_v28  ;;  %v4058_v29 = vadd.f32 %v6713_v60, %v3812_v17  ;;  %5103 = vrot.lane.b32.xlu0 %v5038_v58, %s6902_s9  ;;  %v6747_v12 = vpop.f32.mrf.mxu1  ;;  %v5043_v56 = vadd.f32 %v8472_v7, %v5011_v18  ;;  %v3817_v5 = vld [vmem:[#allocation2 + $0x1a0] sm:$0xff]  ;;  %v3820_v17 = vld [vmem:[#allocation2 + $0x1b8] sm:$0xff] }
 0x273   : > { %v4118_v0 = vld [vmem:[#allocation2 + $0x158] sm:$0xff]  ;;  %v3967_v3 = vpop.f32.mrf.mxu0  ;;  %v5009_v13 = vld [vmem:[#allocation2 + $0x120] sm:$0xff] }
 0x274   : > { %4348 = vst.msk [vmem:[#allocation2 + $0x140] sm:$0xff] %vm250_vm1, %v4316_v63  ;;  %v4319_v4 = vadd.f32 %v6743_v48, %v4118_v0  ;;  %4090 = vst.msk [vmem:[#allocation2 + $0x178] sm:$0xff] %vm250_vm1, %v4058_v29  ;;  %v4056_v6 = vadd.f32 %v3967_v3, %v3810_v2  ;;  %v4232_v9 = vpop.f32.mrf.mxu1  ;;  %v5041_v24 = vadd.f32 %v8472_v7, %v5009_v13  ;;  %v3818_v3 = vld [vmem:[#allocation2 + $0x1a8] sm:$0xff] }
 0x275   : > { %v4116_v46 = vld [vmem:[#allocation2 + $0x148] sm:$0xff]  ;;  %v6716_v11 = vpop.f32.mrf.mxu0  ;;  %v5012_v39 = vld [vmem:[#allocation2 + $0x138] sm:$0xff] }
 0x276   : > { %4351 = vst.msk [vmem:[#allocation2 + $0x158] sm:$0xff] %vm250_vm1, %v4319_v4  ;;  %v4317_v22 = vadd.f32 %v4216_v53, %v4116_v46  ;;  %4088 = vst.msk [vmem:[#allocation2 + $0x168] sm:$0xff] %vm250_vm1, %v4056_v6  ;;  %v4061_v15 = vadd.f32 %v6716_v11, %v3815_v8  ;;  %5113 = vrot.lane.b32.xlu0 %v5043_v56, %s6902_s9  ;;  %v5044_v16 = vadd.f32 %v8472_v7, %v5012_v39  ;;  %v6750_v34 = vpop.f32.mrf.mxu1  ;;  %v3823_v56 = vld [vmem:[#allocation2 + $0x1d0] sm:$0xff] }
 0x277   : > { %v4121_v20 = vld [vmem:[#allocation2 + $0x170] sm:$0xff]  ;;  %v3980_v21 = vpop.f32.mrf.mxu0  ;;  %v5010_v1 = vld [vmem:[#allocation2 + $0x128] sm:$0xff] }
 0x278   : > { %4349 = vst.msk [vmem:[#allocation2 + $0x148] sm:$0xff] %vm250_vm1, %v4317_v22  ;;  %v4322_v23 = vadd.f32 %v6746_v62, %v4121_v20  ;;  %4093 = vst.msk [vmem:[#allocation2 + $0x190] sm:$0xff] %vm250_vm1, %v4061_v15  ;;  %v4059_v10 = vadd.f32 %v3980_v21, %v3813_v44  ;;  %5115 = vrot.lane.b32.xlu1 %v5044_v16, %s6902_s9  ;;  %v4245_v25 = vpop.f32.mrf.mxu1  ;;  %v5042_v33 = vadd.f32 %v8472_v7, %v5010_v1  ;;  %v3821_v21 = vld [vmem:[#allocation2 + $0x1c0] sm:$0xff] }
 0x279   : > { %v4119_v41 = vld [vmem:[#allocation2 + $0x160] sm:$0xff]  ;;  %v6717_v35 = vpop.f32.mrf.mxu0  ;;  %v5015_v30 = vld [vmem:[#allocation2 + $0x150] sm:$0xff] }
 0x27a   : > { %4354 = vst.msk [vmem:[#allocation2 + $0x170] sm:$0xff] %vm250_vm1, %v4322_v23  ;;  %v4320_v31 = vadd.f32 %v4229_v26, %v4119_v41  ;;  %4091 = vst.msk [vmem:[#allocation2 + $0x180] sm:$0xff] %vm250_vm1, %v4059_v10  ;;  %v4062_v32 = vadd.f32 %v6717_v35, %v3816_v27  ;;  %5109 = vrot.lane.b32.xlu0 %v5041_v24, %s6902_s9  ;;  %v6751_v48 = vpop.f32.mrf.mxu1  ;;  %v5047_v45 = vadd.f32 %v8472_v7, %v5015_v30  ;;  %v3824_v35 = vld [vmem:[#allocation2 + $0x1d8] sm:$0xff] }
 0x27b   : > { %v4122_v36 = vld [vmem:[#allocation2 + $0x178] sm:$0xff]  ;;  %v3983_v38 = vpop.f32.mrf.mxu0  ;;  %v5013_v50 = vld [vmem:[#allocation2 + $0x140] sm:$0xff] }
 0x27c   : > { %4352 = vst.msk [vmem:[#allocation2 + $0x160] sm:$0xff] %vm250_vm1, %v4320_v31  ;;  %v4323_v42 = vadd.f32 %v6747_v12, %v4122_v36  ;;  %4094 = vst.msk [vmem:[#allocation2 + $0x198] sm:$0xff] %vm250_vm1, %v4062_v32  ;;  %v4060_v43 = vadd.f32 %v3983_v38, %v3814_v37  ;;  %5111 = vrot.lane.b32.xlu1 %v5042_v33, %s6902_s9  ;;  %v4248_v53 = vpop.f32.mrf.mxu1  ;;  %v5045_v58 = vadd.f32 %v8472_v7, %v5013_v50  ;;  %v3822_v38 = vld [vmem:[#allocation2 + $0x1c8] sm:$0xff] }
 0x27d   : > { %v4120_v19 = vld [vmem:[#allocation2 + $0x168] sm:$0xff]  ;;  %v6720_v49 = vpop.f32.mrf.mxu0  ;;  %v5016_v40 = vld [vmem:[#allocation2 + $0x158] sm:$0xff] }
 0x27e   : > { %4355 = vst.msk [vmem:[#allocation2 + $0x178] sm:$0xff] %vm250_vm1, %v4323_v42  ;;  %v4321_v47 = vadd.f32 %v4232_v9, %v4120_v19  ;;  %4092 = vst.msk [vmem:[#allocation2 + $0x188] sm:$0xff] %vm250_vm1, %v4060_v43  ;;  %v4065_v51 = vadd.f32 %v6720_v49, %v3819_v61  ;;  %5121 = vrot.lane.b32.xlu0 %v5047_v45, %s6902_s9  ;;  %v5048_v54 = vadd.f32 %v8472_v7, %v5016_v40  ;;  %v6754_v62 = vpop.f32.mrf.mxu1  ;;  %v8693_v9 = vld [vmem:[%s9025_s2] ss:$0 sm:$0xff]  ;;  %v3827_v45 = vld [vmem:[#allocation2 + $0x1f0] sm:$0xff] }
 0x27f   : > { %v4125_v55 = vld [vmem:[#allocation2 + $0x190] sm:$0xff]  ;;  %v3996_v52 = vpop.f32.mrf.mxu0  ;;  %v5014_v57 = vld [vmem:[#allocation2 + $0x148] sm:$0xff] }
 0x280   : > { %4353 = vst.msk [vmem:[#allocation2 + $0x168] sm:$0xff] %vm250_vm1, %v4321_v47  ;;  %v4326_v14 = vadd.f32 %v6750_v34, %v4125_v55  ;;  %4097 = vst.msk [vmem:[#allocation2 + $0x1b0] sm:$0xff] %vm250_vm1, %v4065_v51  ;;  %v4063_v28 = vadd.f32 %v3996_v52, %v3817_v5  ;;  %5123 = vrot.lane.b32.xlu1 %v5048_v54, %s6902_s9  ;;  %v4261_v26 = vpop.f32.mrf.mxu1  ;;  %v5046_v12 = vadd.f32 %v8472_v7, %v5014_v57  ;;  %v3825_v52 = vld [vmem:[#allocation2 + $0x1e0] sm:$0xff] }
 0x281   : > { %v4123_v59 = vld [vmem:[#allocation2 + $0x180] sm:$0xff]  ;;  %v6721_v60 = vpop.f32.mrf.mxu0  ;;  %v5019_v18 = vld [vmem:[#allocation2 + $0x170] sm:$0xff] }
 0x282   : > { %4358 = vst.msk [vmem:[#allocation2 + $0x190] sm:$0xff] %vm250_vm1, %v4326_v14  ;;  %v4324_v63 = vadd.f32 %v4245_v25, %v4123_v59  ;;  %4095 = vst.msk [vmem:[#allocation2 + $0x1a0] sm:$0xff] %vm250_vm1, %v4063_v28  ;;  %v4066_v29 = vadd.f32 %v6721_v60, %v3820_v17  ;;  %5117 = vrot.lane.b32.xlu0 %v5045_v58, %s6902_s9  ;;  %v6755_v0 = vpop.f32.mrf.mxu1  ;;  %v5051_v7 = vadd.f32 %v8693_v9, %v5019_v18  ;;  %v3828_v60 = vld [vmem:[#allocation2 + $0x1f8] sm:$0xff] }
 0x283   : > { %v4126_v2 = vld [vmem:[#allocation2 + $0x198] sm:$0xff]  ;;  %v3999_v4 = vpop.f32.mrf.mxu0  ;;  %v5017_v22 = vld [vmem:[#allocation2 + $0x160] sm:$0xff] }
 0x284   : > { %4356 = vst.msk [vmem:[#allocation2 + $0x180] sm:$0xff] %vm250_vm1, %v4324_v63  ;;  %v4327_v6 = vadd.f32 %v6751_v48, %v4126_v2  ;;  %4098 = vst.msk [vmem:[#allocation2 + $0x1b8] sm:$0xff] %vm250_vm1, %v4066_v29  ;;  %v4064_v8 = vadd.f32 %v3999_v4, %v3818_v3  ;;  %5119 = vrot.lane.b32.xlu1 %v5046_v12, %s6902_s9  ;;  %v4264_v46 = vpop.f32.mrf.mxu1  ;;  %v5049_v25 = vadd.f32 %v8693_v9, %v5017_v22  ;;  %v3826_v4 = vld [vmem:[#allocation2 + $0x1e8] sm:$0xff] }
 0x285   : > { %v4124_v11 = vld [vmem:[#allocation2 + $0x188] sm:$0xff]  ;;  %v6724_v39 = vpop.f32.mrf.mxu0  ;;  %v5020_v13 = vld [vmem:[#allocation2 + $0x178] sm:$0xff] }
 0x286   : > { %4359 = vst.msk [vmem:[#allocation2 + $0x198] sm:$0xff] %vm250_vm1, %v4327_v6  ;;  %v4325_v15 = vadd.f32 %v4248_v53, %v4124_v11  ;;  %4096 = vst.msk [vmem:[#allocation2 + $0x1a8] sm:$0xff] %vm250_vm1, %v4064_v8  ;;  %v4069_v16 = vadd.f32 %v6724_v39, %v3823_v56  ;;  %5129 = vrot.lane.b32.xlu0 %v5051_v7, %s6902_s9  ;;  %v5052_v34 = vadd.f32 %v8693_v9, %v5020_v13  ;;  %v6758_v20 = vpop.f32.mrf.mxu1  ;;  %v4374_v7 = vld [vmem:[#allocation2 + $0x310] sm:$0xff] }
 0x287   : > { %v4129_v44 = vld [vmem:[#allocation2 + $0x1b0] sm:$0xff]  ;;  %v4012_v1 = vpop.f32.mrf.mxu0  ;;  %v5018_v23 = vld [vmem:[#allocation2 + $0x168] sm:$0xff] }
 0x288   : > { %4357 = vst.msk [vmem:[#allocation2 + $0x188] sm:$0xff] %vm250_vm1, %v4325_v15  ;;  %v4330_v10 = vadd.f32 %v6754_v62, %v4129_v44  ;;  %4101 = vst.msk [vmem:[#allocation2 + $0x1d0] sm:$0xff] %vm250_vm1, %v4069_v16  ;;  %v4067_v24 = vadd.f32 %v4012_v1, %v3821_v21  ;;  %5131 = vrot.lane.b32.xlu1 %v5052_v34, %s6902_s9  ;;  %v4277_v41 = vpop.f32.mrf.mxu1  ;;  %v5050_v48 = vadd.f32 %v8693_v9, %v5018_v23  ;;  %v4372_v1 = vld [vmem:[#allocation2 + $0x300] sm:$0xff] }
 0x289   : > { %v4127_v27 = vld [vmem:[#allocation2 + $0x1a0] sm:$0xff]  ;;  %v6725_v30 = vpop.f32.mrf.mxu0  ;;  %v5023_v31 = vld [vmem:[#allocation2 + $0x190] sm:$0xff] }
 0x28a   : > { %4362 = vst.msk [vmem:[#allocation2 + $0x1b0] sm:$0xff] %vm250_vm1, %v4330_v10  ;;  %v4328_v32 = vadd.f32 %v4261_v26, %v4127_v27  ;;  %4099 = vst.msk [vmem:[#allocation2 + $0x1c0] sm:$0xff] %vm250_vm1, %v4067_v24  ;;  %v4070_v33 = vadd.f32 %v6725_v30, %v3824_v35  ;;  %5125 = vrot.lane.b32.xlu0 %v5049_v25, %s6902_s9  ;;  %v6759_v36 = vpop.f32.mrf.mxu1  ;;  %v5055_v53 = vadd.f32 %v8693_v9, %v5023_v31  ;;  %v4375_v30 = vld [vmem:[#allocation2 + $0x318] sm:$0xff] }
 0x28b   : > { %v4130_v37 = vld [vmem:[#allocation2 + $0x1b8] sm:$0xff]  ;;  %v4015_v42 = vpop.f32.mrf.mxu0  ;;  %v5021_v47 = vld [vmem:[#allocation2 + $0x180] sm:$0xff] }
 0x28c   : > { %4360 = vst.msk [vmem:[#allocation2 + $0x1a0] sm:$0xff] %vm250_vm1, %v4328_v32  ;;  %v4331_v43 = vadd.f32 %v6755_v0, %v4130_v37  ;;  %4102 = vst.msk [vmem:[#allocation2 + $0x1d8] sm:$0xff] %vm250_vm1, %v4070_v33  ;;  %v4068_v61 = vadd.f32 %v4015_v42, %v3822_v38  ;;  %5127 = vrot.lane.b32.xlu1 %v5050_v48, %s6902_s9  ;;  %v4280_v19 = vpop.f32.mrf.mxu1  ;;  %v5053_v26 = vadd.f32 %v8693_v9, %v5021_v47  ;;  %v4373_v42 = vld [vmem:[#allocation2 + $0x308] sm:$0xff] }
 0x28d   : > { %v4128_v49 = vld [vmem:[#allocation2 + $0x1a8] sm:$0xff]  ;;  %v6728_v40 = vpop.f32.mrf.mxu0  ;;  %v5024_v50 = vld [vmem:[#allocation2 + $0x198] sm:$0xff] }
 0x28e   : > { %4363 = vst.msk [vmem:[#allocation2 + $0x1b8] sm:$0xff] %vm250_vm1, %v4331_v43  ;;  %v4329_v51 = vadd.f32 %v4264_v46, %v4128_v49  ;;  %4100 = vst.msk [vmem:[#allocation2 + $0x1c8] sm:$0xff] %vm250_vm1, %v4068_v61  ;;  %v4073_v54 = vadd.f32 %v6728_v40, %v3827_v45  ;;  %5137 = vrot.lane.b32.xlu0 %v5055_v53, %s6902_s9  ;;  %v5056_v62 = vadd.f32 %v8693_v9, %v5024_v50  ;;  %v6762_v55 = vpop.f32.mrf.mxu1  ;;  %v4378_v53 = vld [vmem:[#allocation2 + $0x330] sm:$0xff] }
 0x28f   : > { %v4133_v5 = vld [vmem:[#allocation2 + $0x1d0] sm:$0xff]  ;;  %v4028_v57 = vpop.f32.mrf.mxu0  ;;  %v5022_v14 = vld [vmem:[#allocation2 + $0x188] sm:$0xff] }
 0x290   : > { %4361 = vst.msk [vmem:[#allocation2 + $0x1a8] sm:$0xff] %vm250_vm1, %v4329_v51  ;;  %v4334_v28 = vadd.f32 %v6758_v20, %v4133_v5  ;;  %4105 = vst.msk [vmem:[#allocation2 + $0x1f0] sm:$0xff] %vm250_vm1, %v4073_v54  ;;  %v4071_v58 = vadd.f32 %v4028_v57, %v3825_v52  ;;  %5139 = vrot.lane.b32.xlu1 %v5056_v62, %s6902_s9  ;;  %v4293_v59 = vpop.f32.mrf.mxu1  ;;  %v5054_v0 = vadd.f32 %v8693_v9, %v5022_v14  ;;  %v4376_v57 = vld [vmem:[#allocation2 + $0x320] sm:$0xff] }
 0x291   : > { %v4131_v17 = vld [vmem:[#allocation2 + $0x1c0] sm:$0xff]  ;;  %v6729_v18 = vpop.f32.mrf.mxu0  ;;  %v5027_v63 = vld [vmem:[#allocation2 + $0x1b0] sm:$0xff] }
 0x292   : > { %4366 = vst.msk [vmem:[#allocation2 + $0x1d0] sm:$0xff] %vm250_vm1, %v4334_v28  ;;  %v4332_v29 = vadd.f32 %v4277_v41, %v4131_v17  ;;  %4103 = vst.msk [vmem:[#allocation2 + $0x1e0] sm:$0xff] %vm250_vm1, %v4071_v58  ;;  %v4074_v12 = vadd.f32 %v6729_v18, %v3828_v60  ;;  %5133 = vrot.lane.b32.xlu0 %v5053_v26, %s6902_s9  ;;  %v6763_v2 = vpop.f32.mrf.mxu1  ;;  %v5059_v46 = vadd.f32 %v8693_v9, %v5027_v63  ;;  %v4379_v18 = vld [vmem:[#allocation2 + $0x338] sm:$0xff] }
 0x293   : > { %v4134_v3 = vld [vmem:[#allocation2 + $0x1d8] sm:$0xff]  ;;  %v4031_v6 = vpop.f32.mrf.mxu0  ;;  %v5025_v15 = vld [vmem:[#allocation2 + $0x1a0] sm:$0xff] }
 0x294   : > { %4364 = vst.msk [vmem:[#allocation2 + $0x1c0] sm:$0xff] %vm250_vm1, %v4332_v29  ;;  %v4335_v8 = vadd.f32 %v6759_v36, %v4134_v3  ;;  %4106 = vst.msk [vmem:[#allocation2 + $0x1f8] sm:$0xff] %vm250_vm1, %v4074_v12  ;;  %v4072_v56 = vadd.f32 %v4031_v6, %v3826_v4  ;;  %5135 = vrot.lane.b32.xlu1 %v5054_v0, %s6902_s9  ;;  %v4296_v11 = vpop.f32.mrf.mxu1  ;;  %v5057_v41 = vadd.f32 %v8693_v9, %v5025_v15  ;;  %v4377_v6 = vld [vmem:[#allocation2 + $0x328] sm:$0xff] }
 0x295   : > { %v4132_v39 = vld [vmem:[#allocation2 + $0x1c8] sm:$0xff]  ;;  %v6768_v13 = vpop.f32.mrf.mxu0  ;;  %v5028_v22 = vld [vmem:[#allocation2 + $0x1b8] sm:$0xff] }
 0x296   : > { %4367 = vst.msk [vmem:[#allocation2 + $0x1d8] sm:$0xff] %vm250_vm1, %v4335_v8  ;;  %v4333_v16 = vadd.f32 %v4280_v19, %v4132_v39  ;;  %4104 = vst.msk [vmem:[#allocation2 + $0x1e8] sm:$0xff] %vm250_vm1, %v4072_v56  ;;  %v4572_v34 = vadd.f32 %v6768_v13, %v4374_v7  ;;  %5145 = vrot.lane.b32.xlu0 %v5059_v46, %s6902_s9  ;;  %v5060_v20 = vadd.f32 %v8693_v9, %v5028_v22  ;;  %v6802_v44 = vpop.f32.mrf.mxu1  ;;  %v4382_v46 = vld [vmem:[#allocation2 + $0x350] sm:$0xff] }
 0x297   : > { %v4137_v21 = vld [vmem:[#allocation2 + $0x1f0] sm:$0xff]  ;;  %v4443_v23 = vpop.f32.mrf.mxu0  ;;  %v5026_v10 = vld [vmem:[#allocation2 + $0x1a8] sm:$0xff] }
 0x298   : > { %4365 = vst.msk [vmem:[#allocation2 + $0x1c8] sm:$0xff] %vm250_vm1, %v4333_v16  ;;  %v4338_v24 = vadd.f32 %v6762_v55, %v4137_v21  ;;  %4604 = vst.msk [vmem:[#allocation2 + $0x310] sm:$0xff] %vm250_vm1, %v4572_v34  ;;  %v4570_v25 = vadd.f32 %v4443_v23, %v4372_v1  ;;  %5147 = vrot.lane.b32.xlu1 %v5060_v20, %s6902_s9  ;;  %v4708_v27 = vpop.f32.mrf.mxu1  ;;  %v5058_v36 = vadd.f32 %v8693_v9, %v5026_v10  ;;  %v4380_v23 = vld [vmem:[#allocation2 + $0x340] sm:$0xff] }
 0x299   : > { %v4135_v35 = vld [vmem:[#allocation2 + $0x1e0] sm:$0xff]  ;;  %v6769_v31 = vpop.f32.mrf.mxu0  ;;  %v5031_v32 = vld [vmem:[#allocation2 + $0x1d0] sm:$0xff] }
 0x29a   : > { %4370 = vst.msk [vmem:[#allocation2 + $0x1f0] sm:$0xff] %vm250_vm1, %v4338_v24  ;;  %v4336_v33 = vadd.f32 %v4293_v59, %v4135_v35  ;;  %4602 = vst.msk [vmem:[#allocation2 + $0x300] sm:$0xff] %vm250_vm1, %v4570_v25  ;;  %v4573_v48 = vadd.f32 %v6769_v31, %v4375_v30  ;;  %5141 = vrot.lane.b32.xlu0 %v5057_v41, %s6902_s9  ;;  %v6803_v37 = vpop.f32.mrf.mxu1  ;;  %v5063_v19 = vadd.f32 %v8693_v9, %v5031_v32  ;;  %v4383_v31 = vld [vmem:[#allocation2 + $0x358] sm:$0xff] }
 0x29b   : > { %v4138_v38 = vld [vmem:[#allocation2 + $0x1f8] sm:$0xff]  ;;  %v4446_v43 = vpop.f32.mrf.mxu0  ;;  %v5029_v51 = vld [vmem:[#allocation2 + $0x1c0] sm:$0xff] }
 0x29c   : > { %4368 = vst.msk [vmem:[#allocation2 + $0x1e0] sm:$0xff] %vm250_vm1, %v4336_v33  ;;  %v4339_v61 = vadd.f32 %v6763_v2, %v4138_v38  ;;  %4605 = vst.msk [vmem:[#allocation2 + $0x318] sm:$0xff] %vm250_vm1, %v4573_v48  ;;  %v4571_v45 = vadd.f32 %v4446_v43, %v4373_v42  ;;  %5143 = vrot.lane.b32.xlu1 %v5058_v36, %s6902_s9  ;;  %v4711_v49 = vpop.f32.mrf.mxu1  ;;  %v5061_v59 = vadd.f32 %v8693_v9, %v5029_v51  ;;  %v4381_v43 = vld [vmem:[#allocation2 + $0x348] sm:$0xff] }
 0x29d   : > { %v4136_v40 = vld [vmem:[#allocation2 + $0x1e8] sm:$0xff]  ;;  %v6772_v50 = vpop.f32.mrf.mxu0  ;;  %v5032_v47 = vld [vmem:[#allocation2 + $0x1d8] sm:$0xff] }
 0x29e   : > { %4371 = vst.msk [vmem:[#allocation2 + $0x1f8] sm:$0xff] %vm250_vm1, %v4339_v61  ;;  %v4337_v54 = vadd.f32 %v4296_v11, %v4136_v40  ;;  %4603 = vst.msk [vmem:[#allocation2 + $0x308] sm:$0xff] %vm250_vm1, %v4571_v45  ;;  %v4576_v62 = vadd.f32 %v6772_v50, %v4378_v53  ;;  %5153 = vrot.lane.b32.xlu0 %v5063_v19, %s6902_s9  ;;  %v5064_v55 = vadd.f32 %v8693_v9, %v5032_v47  ;;  %v6806_v5 = vpop.f32.mrf.mxu1  ;;  %v4386_v19 = vld [vmem:[#allocation2 + $0x370] sm:$0xff] }
 0x29f   : > { %v4636_v52 = vld [vmem:[#allocation2 + $0x310] sm:$0xff]  ;;  %v4459_v14 = vpop.f32.mrf.mxu0  ;;  %v5030_v28 = vld [vmem:[#allocation2 + $0x1c8] sm:$0xff] }
 0x2a0   : > { %4369 = vst.msk [vmem:[#allocation2 + $0x1e8] sm:$0xff] %vm250_vm1, %v4337_v54  ;;  %v4837_v58 = vadd.f32 %v6802_v44, %v4636_v52  ;;  %4608 = vst.msk [vmem:[#allocation2 + $0x330] sm:$0xff] %vm250_vm1, %v4576_v62  ;;  %v4574_v26 = vadd.f32 %v4459_v14, %v4376_v57  ;;  %5155 = vrot.lane.b32.xlu1 %v5064_v55, %s6902_s9  ;;  %v4724_v17 = vpop.f32.mrf.mxu1  ;;  %v5062_v2 = vadd.f32 %v8693_v9, %v5030_v28  ;;  %v4384_v14 = vld [vmem:[#allocation2 + $0x360] sm:$0xff] }
 0x2a1   : > { %v4634_v60 = vld [vmem:[#allocation2 + $0x300] sm:$0xff]  ;;  %v6773_v63 = vpop.f32.mrf.mxu0  ;;  %v5035_v29 = vld [vmem:[#allocation2 + $0x1f0] sm:$0xff] }
 0x2a2   : > { %4869 = vst.msk [vmem:[#allocation2 + $0x310] sm:$0xff] %vm250_vm1, %v4837_v58  ;;  %v4835_v12 = vadd.f32 %v4708_v27, %v4634_v60  ;;  %4606 = vst.msk [vmem:[#allocation2 + $0x320] sm:$0xff] %vm250_vm1, %v4574_v26  ;;  %v4577_v0 = vadd.f32 %v6773_v63, %v4379_v18  ;;  %5149 = vrot.lane.b32.xlu0 %v5061_v59, %s6902_s9  ;;  %v6807_v3 = vpop.f32.mrf.mxu1  ;;  %v5067_v11 = vadd.f32 %v8693_v9, %v5035_v29  ;;  %v4387_v63 = vld [vmem:[#allocation2 + $0x378] sm:$0xff] }
 0x2a3   : > { %v4637_v4 = vld [vmem:[#allocation2 + $0x318] sm:$0xff]  ;;  %v4462_v8 = vpop.f32.mrf.mxu0  ;;  %v5033_v16 = vld [vmem:[#allocation2 + $0x1e0] sm:$0xff] }
 0x2a4   : > { %4867 = vst.msk [vmem:[#allocation2 + $0x300] sm:$0xff] %vm250_vm1, %v4835_v12  ;;  %v4838_v56 = vadd.f32 %v6803_v37, %v4637_v4  ;;  %4609 = vst.msk [vmem:[#allocation2 + $0x338] sm:$0xff] %vm250_vm1, %v4577_v0  ;;  %v4575_v7 = vadd.f32 %v4462_v8, %v4377_v6  ;;  %5151 = vrot.lane.b32.xlu1 %v5062_v2, %s6902_s9  ;;  %v4727_v39 = vpop.f32.mrf.mxu1  ;;  %v5065_v27 = vadd.f32 %v8693_v9, %v5033_v16  ;;  %v4385_v8 = vld [vmem:[#allocation2 + $0x368] sm:$0xff] }
 0x2a5   : > { %v4635_v13 = vld [vmem:[#allocation2 + $0x308] sm:$0xff]  ;;  %v6776_v22 = vpop.f32.mrf.mxu0  ;;  %v5036_v15 = vld [vmem:[#allocation2 + $0x1f8] sm:$0xff] }
 0x2a6   : > { %4870 = vst.msk [vmem:[#allocation2 + $0x318] sm:$0xff] %vm250_vm1, %v4838_v56  ;;  %v4836_v34 = vadd.f32 %v4711_v49, %v4635_v13  ;;  %4607 = vst.msk [vmem:[#allocation2 + $0x328] sm:$0xff] %vm250_vm1, %v4575_v7  ;;  %v4580_v20 = vadd.f32 %v6776_v22, %v4382_v46  ;;  %5161 = vrot.lane.b32.xlu0 %v5067_v11, %s6902_s9  ;;  %v5068_v44 = vadd.f32 %v8693_v9, %v5036_v15  ;;  %v6810_v21 = vpop.f32.mrf.mxu1  ;;  %v4390_v11 = vld [vmem:[#allocation2 + $0x390] sm:$0xff] }
 0x2a7   : > { %v4640_v1 = vld [vmem:[#allocation2 + $0x330] sm:$0xff]  ;;  %v4475_v10 = vpop.f32.mrf.mxu0  ;;  %v5034_v24 = vld [vmem:[#allocation2 + $0x1e8] sm:$0xff] }
 0x2a8   : > { %4868 = vst.msk [vmem:[#allocation2 + $0x308] sm:$0xff] %vm250_vm1, %v4836_v34  ;;  %v4841_v25 = vadd.f32 %v6806_v5, %v4640_v1  ;;  %4612 = vst.msk [vmem:[#allocation2 + $0x350] sm:$0xff] %vm250_vm1, %v4580_v20  ;;  %v4578_v41 = vadd.f32 %v4475_v10, %v4380_v23  ;;  %5163 = vrot.lane.b32.xlu1 %v5068_v44, %s6902_s9  ;;  %v4740_v35 = vpop.f32.mrf.mxu1  ;;  %v5066_v37 = vadd.f32 %v8693_v9, %v5034_v24  ;;  %v4388_v10 = vld [vmem:[#allocation2 + $0x380] sm:$0xff] }
 0x2a9   : > { %v4638_v30 = vld [vmem:[#allocation2 + $0x320] sm:$0xff]  ;;  %v6777_v32 = vpop.f32.mrf.mxu0  ;;  %v5329_v33 = vld [vmem:[#allocation2 + $0x310] sm:$0xff] }
 0x2aa   : > { %4873 = vst.msk [vmem:[#allocation2 + $0x330] sm:$0xff] %vm250_vm1, %v4841_v25  ;;  %v4839_v48 = vadd.f32 %v4724_v17, %v4638_v30  ;;  %4610 = vst.msk [vmem:[#allocation2 + $0x340] sm:$0xff] %vm250_vm1, %v4578_v41  ;;  %v4581_v36 = vadd.f32 %v6777_v32, %v4383_v31  ;;  %5157 = vrot.lane.b32.xlu0 %v5065_v27, %s6902_s9  ;;  %v6811_v38 = vpop.f32.mrf.mxu1  ;;  %v5361_v49 = vadd.f32 %v8693_v9, %v5329_v33  ;;  %v4391_v32 = vld [vmem:[#allocation2 + $0x398] sm:$0xff] }
 0x2ab   : > { %v4641_v42 = vld [vmem:[#allocation2 + $0x338] sm:$0xff]  ;;  %v4478_v61 = vpop.f32.mrf.mxu0  ;;  %v5327_v54 = vld [vmem:[#allocation2 + $0x300] sm:$0xff] }
 0x2ac   : > { %4871 = vst.msk [vmem:[#allocation2 + $0x320] sm:$0xff] %vm250_vm1, %v4839_v48  ;;  %v4842_v45 = vadd.f32 %v6807_v3, %v4641_v42  ;;  %4613 = vst.msk [vmem:[#allocation2 + $0x358] sm:$0xff] %vm250_vm1, %v4581_v36  ;;  %v4579_v53 = vadd.f32 %v4478_v61, %v4381_v43  ;;  %5159 = vrot.lane.b32.xlu1 %v5066_v37, %s6902_s9  ;;  %v4743_v40 = vpop.f32.mrf.mxu1  ;;  %v5359_v17 = vadd.f32 %v8693_v9, %v5327_v54  ;;  %v4389_v61 = vld [vmem:[#allocation2 + $0x388] sm:$0xff] }
 0x2ad   : > { %v4639_v50 = vld [vmem:[#allocation2 + $0x328] sm:$0xff]  ;;  %v6780_v47 = vpop.f32.mrf.mxu0  ;;  %v5330_v51 = vld [vmem:[#allocation2 + $0x318] sm:$0xff] }
 0x2ae   : > { %4874 = vst.msk [vmem:[#allocation2 + $0x338] sm:$0xff] %vm250_vm1, %v4842_v45  ;;  %v4840_v62 = vadd.f32 %v4727_v39, %v4639_v50  ;;  %4611 = vst.msk [vmem:[#allocation2 + $0x348] sm:$0xff] %vm250_vm1, %v4579_v53  ;;  %v4584_v55 = vadd.f32 %v6780_v47, %v4386_v19  ;;  %5427 = vrot.lane.b32.xlu0 %v5361_v49, %s6902_s9  ;;  %v5362_v5 = vadd.f32 %v8693_v9, %v5330_v51  ;;  %v6814_v52 = vpop.f32.mrf.mxu1  ;;  %v4394_v49 = vld [vmem:[#allocation2 + $0x3b0] sm:$0xff] }
 0x2af   : > { %v4644_v57 = vld [vmem:[#allocation2 + $0x350] sm:$0xff]  ;;  %v4491_v28 = vpop.f32.mrf.mxu0  ;;  %v5328_v58 = vld [vmem:[#allocation2 + $0x308] sm:$0xff] }
 0x2b0   : > { %4872 = vst.msk [vmem:[#allocation2 + $0x328] sm:$0xff] %vm250_vm1, %v4840_v62  ;;  %v4845_v26 = vadd.f32 %v6810_v21, %v4644_v57  ;;  %4616 = vst.msk [vmem:[#allocation2 + $0x370] sm:$0xff] %vm250_vm1, %v4584_v55  ;;  %v4582_v59 = vadd.f32 %v4491_v28, %v4384_v14  ;;  %5429 = vrot.lane.b32.xlu1 %v5362_v5, %s6902_s9  ;;  %v4756_v60 = vpop.f32.mrf.mxu1  ;;  %v5360_v3 = vadd.f32 %v8693_v9, %v5328_v58  ;;  %v4392_v28 = vld [vmem:[#allocation2 + $0x3a0] sm:$0xff] }
 0x2b1   : > { %v4642_v18 = vld [vmem:[#allocation2 + $0x340] sm:$0xff]  ;;  %v6781_v29 = vpop.f32.mrf.mxu0  ;;  %v5333_v12 = vld [vmem:[#allocation2 + $0x330] sm:$0xff] }
 0x2b2   : > { %4877 = vst.msk [vmem:[#allocation2 + $0x350] sm:$0xff] %vm250_vm1, %v4845_v26  ;;  %v4843_v0 = vadd.f32 %v4740_v35, %v4642_v18  ;;  %4614 = vst.msk [vmem:[#allocation2 + $0x360] sm:$0xff] %vm250_vm1, %v4582_v59  ;;  %v4585_v2 = vadd.f32 %v6781_v29, %v4387_v63  ;;  %5423 = vrot.lane.b32.xlu0 %v5359_v17, %s6902_s9  ;;  %v6815_v4 = vpop.f32.mrf.mxu1  ;;  %v5365_v39 = vadd.f32 %v8693_v9, %v5333_v12  ;;  %v4395_v29 = vld [vmem:[#allocation2 + $0x3b8] sm:$0xff] }
 0x2b3   : > { %v4645_v6 = vld [vmem:[#allocation2 + $0x358] sm:$0xff]  ;;  %v4494_v56 = vpop.f32.mrf.mxu0  ;;  %v5331_v34 = vld [vmem:[#allocation2 + $0x320] sm:$0xff] }
 0x2b4   : > { %4875 = vst.msk [vmem:[#allocation2 + $0x340] sm:$0xff] %vm250_vm1, %v4843_v0  ;;  %v4846_v7 = vadd.f32 %v6811_v38, %v4645_v6  ;;  %4617 = vst.msk [vmem:[#allocation2 + $0x378] sm:$0xff] %vm250_vm1, %v4585_v2  ;;  %v4583_v46 = vadd.f32 %v4494_v56, %v4385_v8  ;;  %5425 = vrot.lane.b32.xlu1 %v5360_v3, %s6902_s9  ;;  %v4759_v13 = vpop.f32.mrf.mxu1  ;;  %v5363_v35 = vadd.f32 %v8693_v9, %v5331_v34  ;;  %v4393_v56 = vld [vmem:[#allocation2 + $0x3a8] sm:$0xff] }
 0x2b5   : > { %v4643_v22 = vld [vmem:[#allocation2 + $0x348] sm:$0xff]  ;;  %v6784_v15 = vpop.f32.mrf.mxu0  ;;  %v5334_v16 = vld [vmem:[#allocation2 + $0x338] sm:$0xff] }
 0x2b6   : > { %4878 = vst.msk [vmem:[#allocation2 + $0x358] sm:$0xff] %vm250_vm1, %v4846_v7  ;;  %v4844_v20 = vadd.f32 %v4743_v40, %v4643_v22  ;;  %4615 = vst.msk [vmem:[#allocation2 + $0x368] sm:$0xff] %vm250_vm1, %v4583_v46  ;;  %v4588_v44 = vadd.f32 %v6784_v15, %v4390_v11  ;;  %5435 = vrot.lane.b32.xlu0 %v5365_v39, %s6902_s9  ;;  %v5366_v21 = vadd.f32 %v8693_v9, %v5334_v16  ;;  %v6818_v1 = vpop.f32.mrf.mxu1  ;;  %v4398_v39 = vld [vmem:[#allocation2 + $0x3d0] sm:$0xff] }
 0x2b7   : > { %v4648_v23 = vld [vmem:[#allocation2 + $0x370] sm:$0xff]  ;;  %v4507_v24 = vpop.f32.mrf.mxu0  ;;  %v5332_v25 = vld [vmem:[#allocation2 + $0x328] sm:$0xff] }
 0x2b8   : > { %4876 = vst.msk [vmem:[#allocation2 + $0x348] sm:$0xff] %vm250_vm1, %v4844_v20  ;;  %v4849_v41 = vadd.f32 %v6814_v52, %v4648_v23  ;;  %4620 = vst.msk [vmem:[#allocation2 + $0x390] sm:$0xff] %vm250_vm1, %v4588_v44  ;;  %v4586_v27 = vadd.f32 %v4507_v24, %v4388_v10  ;;  %5437 = vrot.lane.b32.xlu1 %v5366_v21, %s6902_s9  ;;  %v4772_v30 = vpop.f32.mrf.mxu1  ;;  %v5364_v38 = vadd.f32 %v8693_v9, %v5332_v25  ;;  %v4396_v24 = vld [vmem:[#allocation2 + $0x3c0] sm:$0xff] }
 0x2b9   : > { %v4646_v31 = vld [vmem:[#allocation2 + $0x360] sm:$0xff]  ;;  %v6785_v33 = vpop.f32.mrf.mxu0  ;;  %v5337_v48 = vld [vmem:[#allocation2 + $0x350] sm:$0xff] }
 0x2ba   : > { %4881 = vst.msk [vmem:[#allocation2 + $0x370] sm:$0xff] %vm250_vm1, %v4849_v41  ;;  %v4847_v36 = vadd.f32 %v4756_v60, %v4646_v31  ;;  %4618 = vst.msk [vmem:[#allocation2 + $0x380] sm:$0xff] %vm250_vm1, %v4586_v27  ;;  %v4589_v37 = vadd.f32 %v6785_v33, %v4391_v32  ;;  %5431 = vrot.lane.b32.xlu0 %v5363_v35, %s6902_s9  ;;  %v6819_v42 = vpop.f32.mrf.mxu1  ;;  %v5369_v40 = vadd.f32 %v8693_v9, %v5337_v48  ;;  %v4399_v33 = vld [vmem:[#allocation2 + $0x3d8] sm:$0xff] }
 0x2bb   : > { %v4649_v43 = vld [vmem:[#allocation2 + $0x378] sm:$0xff]  ;;  %v4510_v45 = vpop.f32.mrf.mxu0  ;;  %v5335_v62 = vld [vmem:[#allocation2 + $0x340] sm:$0xff] }
 0x2bc   : > { %4879 = vst.msk [vmem:[#allocation2 + $0x360] sm:$0xff] %vm250_vm1, %v4847_v36  ;;  %v4850_v53 = vadd.f32 %v6815_v4, %v4649_v43  ;;  %4621 = vst.msk [vmem:[#allocation2 + $0x398] sm:$0xff] %vm250_vm1, %v4589_v37  ;;  %v4587_v19 = vadd.f32 %v4510_v45, %v4389_v61  ;;  %5433 = vrot.lane.b32.xlu1 %v5364_v38, %s6902_s9  ;;  %v4775_v50 = vpop.f32.mrf.mxu1  ;;  %v5367_v60 = vadd.f32 %v8693_v9, %v5335_v62  ;;  %v4397_v45 = vld [vmem:[#allocation2 + $0x3c8] sm:$0xff] }
 0x2bd   : > { %v4647_v47 = vld [vmem:[#allocation2 + $0x368] sm:$0xff]  ;;  %v6788_v51 = vpop.f32.mrf.mxu0  ;;  %v5338_v54 = vld [vmem:[#allocation2 + $0x358] sm:$0xff] }
 0x2be   : > { %4882 = vst.msk [vmem:[#allocation2 + $0x378] sm:$0xff] %vm250_vm1, %v4850_v53  ;;  %v4848_v55 = vadd.f32 %v4759_v13, %v4647_v47  ;;  %4619 = vst.msk [vmem:[#allocation2 + $0x388] sm:$0xff] %vm250_vm1, %v4587_v19  ;;  %v4592_v5 = vadd.f32 %v6788_v51, %v4394_v49  ;;  %5443 = vrot.lane.b32.xlu0 %v5369_v40, %s6902_s9  ;;  %v5370_v52 = vadd.f32 %v8693_v9, %v5338_v54  ;;  %v6822_v57 = vpop.f32.mrf.mxu1  ;;  %v4402_v40 = vld [vmem:[#allocation2 + $0x3f0] sm:$0xff] }
 0x2bf   : > { %v4652_v14 = vld [vmem:[#allocation2 + $0x390] sm:$0xff]  ;;  %v4523_v58 = vpop.f32.mrf.mxu0  ;;  %v5336_v26 = vld [vmem:[#allocation2 + $0x348] sm:$0xff] }
 0x2c0   : > { %4880 = vst.msk [vmem:[#allocation2 + $0x368] sm:$0xff] %vm250_vm1, %v4848_v55  ;;  %v4853_v59 = vadd.f32 %v6818_v1, %v4652_v14  ;;  %4624 = vst.msk [vmem:[#allocation2 + $0x3b0] sm:$0xff] %vm250_vm1, %v4592_v5  ;;  %v4590_v17 = vadd.f32 %v4523_v58, %v4392_v28  ;;  %5445 = vrot.lane.b32.xlu1 %v5370_v52, %s6902_s9  ;;  %v4788_v18 = vpop.f32.mrf.mxu1  ;;  %v5368_v4 = vadd.f32 %v8693_v9, %v5336_v26  ;;  %v4400_v28 = vld [vmem:[#allocation2 + $0x3e0] sm:$0xff] }
 0x2c1   : > { %v4650_v63 = vld [vmem:[#allocation2 + $0x380] sm:$0xff]  ;;  %v6789_v12 = vpop.f32.mrf.mxu0  ;;  %v5341_v0 = vld [vmem:[#allocation2 + $0x370] sm:$0xff] }
 0x2c2   : > { %4885 = vst.msk [vmem:[#allocation2 + $0x390] sm:$0xff] %vm250_vm1, %v4853_v59  ;;  %v4851_v2 = vadd.f32 %v4772_v30, %v4650_v63  ;;  %4622 = vst.msk [vmem:[#allocation2 + $0x3a0] sm:$0xff] %vm250_vm1, %v4590_v17  ;;  %v4593_v3 = vadd.f32 %v6789_v12, %v4395_v29  ;;  %5439 = vrot.lane.b32.xlu0 %v5367_v60, %s6902_s9  ;;  %v6823_v6 = vpop.f32.mrf.mxu1  ;;  %v5373_v13 = vadd.f32 %v8693_v9, %v5341_v0  ;;  %v4403_v63 = vld [vmem:[#allocation2 + $0x3f8] sm:$0xff] }
 0x2c3   : > { %v4653_v8 = vld [vmem:[#allocation2 + $0x398] sm:$0xff]  ;;  %v4526_v7 = vpop.f32.mrf.mxu0  ;;  %v5339_v20 = vld [vmem:[#allocation2 + $0x360] sm:$0xff] }
 0x2c4   : > { %4883 = vst.msk [vmem:[#allocation2 + $0x380] sm:$0xff] %vm250_vm1, %v4851_v2  ;;  %v4854_v46 = vadd.f32 %v6819_v42, %v4653_v8  ;;  %4625 = vst.msk [vmem:[#allocation2 + $0x3b8] sm:$0xff] %vm250_vm1, %v4593_v3  ;;  %v4591_v11 = vadd.f32 %v4526_v7, %v4393_v56  ;;  %5441 = vrot.lane.b32.xlu1 %v5368_v4, %s6902_s9  ;;  %v4791_v22 = vpop.f32.mrf.mxu1  ;;  %v5371_v30 = vadd.f32 %v8693_v9, %v5339_v20  ;;  %v4401_v8 = vld [vmem:[#allocation2 + $0x3e8] sm:$0xff] }
 0x2c5   : > { %v4651_v15 = vld [vmem:[#allocation2 + $0x388] sm:$0xff]  ;;  %v6792_v16 = vpop.f32.mrf.mxu0  ;;  %v5342_v34 = vld [vmem:[#allocation2 + $0x378] sm:$0xff] }
 0x2c6   : > { %4886 = vst.msk [vmem:[#allocation2 + $0x398] sm:$0xff] %vm250_vm1, %v4854_v46  ;;  %v4852_v44 = vadd.f32 %v4775_v50, %v4651_v15  ;;  %4623 = vst.msk [vmem:[#allocation2 + $0x3a8] sm:$0xff] %vm250_vm1, %v4591_v11  ;;  %v4596_v21 = vadd.f32 %v6792_v16, %v4398_v39  ;;  %5451 = vrot.lane.b32.xlu0 %v5373_v13, %s6902_s9  ;;  %v5374_v1 = vadd.f32 %v8693_v9, %v5342_v34  ;;  %v6826_v23 = vpop.f32.mrf.mxu1 }
 0x2c7   : > { %v4656_v10 = vld [vmem:[#allocation2 + $0x3b0] sm:$0xff]  ;;  %v4539_v25 = vpop.f32.mrf.mxu0  ;;  %v5340_v41 = vld [vmem:[#allocation2 + $0x368] sm:$0xff] }
 0x2c8   : > { %4884 = vst.msk [vmem:[#allocation2 + $0x388] sm:$0xff] %vm250_vm1, %v4852_v44  ;;  %v4857_v27 = vadd.f32 %v6822_v57, %v4656_v10  ;;  %4628 = vst.msk [vmem:[#allocation2 + $0x3d0] sm:$0xff] %vm250_vm1, %v4596_v21  ;;  %v4594_v35 = vadd.f32 %v4539_v25, %v4396_v24  ;;  %5453 = vrot.lane.b32.xlu1 %v5374_v1, %s6902_s9  ;;  %v4804_v31 = vpop.f32.mrf.mxu1  ;;  %v5372_v42 = vadd.f32 %v8693_v9, %v5340_v41 }
 0x2c9   : > { %v4654_v32 = vld [vmem:[#allocation2 + $0x3a0] sm:$0xff]  ;;  %v6793_v48 = vpop.f32.mrf.mxu0  ;;  %v5345_v36 = vld [vmem:[#allocation2 + $0x390] sm:$0xff] }
 0x2ca   : > { %4889 = vst.msk [vmem:[#allocation2 + $0x3b0] sm:$0xff] %vm250_vm1, %v4857_v27  ;;  %v4855_v37 = vadd.f32 %v4788_v18, %v4654_v32  ;;  %4626 = vst.msk [vmem:[#allocation2 + $0x3c0] sm:$0xff] %vm250_vm1, %v4594_v35  ;;  %v4597_v38 = vadd.f32 %v6793_v48, %v4399_v33  ;;  %5447 = vrot.lane.b32.xlu0 %v5371_v30, %s6902_s9  ;;  %v6827_v43 = vpop.f32.mrf.mxu1  ;;  %v5377_v50 = vadd.f32 %v8693_v9, %v5345_v36 }
 0x2cb   : > { %v4657_v61 = vld [vmem:[#allocation2 + $0x3b8] sm:$0xff]  ;;  %v4542_v53 = vpop.f32.mrf.mxu0  ;;  %v5343_v55 = vld [vmem:[#allocation2 + $0x380] sm:$0xff] }
 0x2cc   : > { %4887 = vst.msk [vmem:[#allocation2 + $0x3a0] sm:$0xff] %vm250_vm1, %v4855_v37  ;;  %v4858_v19 = vadd.f32 %v6823_v6, %v4657_v61  ;;  %4629 = vst.msk [vmem:[#allocation2 + $0x3d8] sm:$0xff] %vm250_vm1, %v4597_v38  ;;  %v4595_v49 = vadd.f32 %v4542_v53, %v4397_v45  ;;  %5449 = vrot.lane.b32.xlu1 %v5372_v42, %s6902_s9  ;;  %v4807_v54 = vpop.f32.mrf.mxu1  ;;  %v5375_v60 = vadd.f32 %v8693_v9, %v5343_v55 }
 0x2cd   : > { %v4655_v47 = vld [vmem:[#allocation2 + $0x3a8] sm:$0xff]  ;;  %v6796_v51 = vpop.f32.mrf.mxu0  ;;  %v5346_v62 = vld [vmem:[#allocation2 + $0x398] sm:$0xff] }
 0x2ce   : > { %4890 = vst.msk [vmem:[#allocation2 + $0x3b8] sm:$0xff] %vm250_vm1, %v4858_v19  ;;  %v4856_v5 = vadd.f32 %v4791_v22, %v4655_v47  ;;  %4627 = vst.msk [vmem:[#allocation2 + $0x3c8] sm:$0xff] %vm250_vm1, %v4595_v49  ;;  %v4600_v52 = vadd.f32 %v6796_v51, %v4402_v40  ;;  %5459 = vrot.lane.b32.xlu0 %v5377_v50, %s6902_s9  ;;  %v5378_v57 = vadd.f32 %v8693_v9, %v5346_v62  ;;  %v6830_v12 = vpop.f32.mrf.mxu1 }
 0x2cf   : > { %v4660_v14 = vld [vmem:[#allocation2 + $0x3d0] sm:$0xff]  ;;  %v4555_v58 = vpop.f32.mrf.mxu0  ;;  %v5344_v26 = vld [vmem:[#allocation2 + $0x388] sm:$0xff] }
 0x2d0   : > { %4888 = vst.msk [vmem:[#allocation2 + $0x3a8] sm:$0xff] %vm250_vm1, %v4856_v5  ;;  %v4861_v59 = vadd.f32 %v6826_v23, %v4660_v14  ;;  %4632 = vst.msk [vmem:[#allocation2 + $0x3f0] sm:$0xff] %vm250_vm1, %v4600_v52  ;;  %v4598_v17 = vadd.f32 %v4555_v58, %v4400_v28  ;;  %5461 = vrot.lane.b32.xlu1 %v5378_v57, %s6902_s9  ;;  %v5376_v4 = vadd.f32 %v8693_v9, %v5344_v26  ;;  %v4820_v13 = vpop.f32.mrf.mxu1 }
 0x2d1   : > { %v4658_v18 = vld [vmem:[#allocation2 + $0x3c0] sm:$0xff]  ;;  %v6797_v29 = vpop.f32.mrf.mxu0  ;;  %v5349_v0 = vld [vmem:[#allocation2 + $0x3b0] sm:$0xff] }
 0x2d2   : > { %4893 = vst.msk [vmem:[#allocation2 + $0x3d0] sm:$0xff] %vm250_vm1, %v4861_v59  ;;  %v4859_v2 = vadd.f32 %v4804_v31, %v4658_v18  ;;  %4630 = vst.msk [vmem:[#allocation2 + $0x3e0] sm:$0xff] %vm250_vm1, %v4598_v17  ;;  %v4601_v3 = vadd.f32 %v6797_v29, %v4403_v63  ;;  %5455 = vrot.lane.b32.xlu0 %v5375_v60, %s6902_s9  ;;  %v5381_v11 = vadd.f32 %v8693_v9, %v5349_v0  ;;  %v6831_v10 = vpop.f32.mrf.mxu1 }
 0x2d3   : > { %v4661_v6 = vld [vmem:[#allocation2 + $0x3d8] sm:$0xff]  ;;  %v4558_v56 = vpop.f32.mrf.mxu0  ;;  %v5347_v15 = vld [vmem:[#allocation2 + $0x3a0] sm:$0xff] }
 0x2d4   : > { %4891 = vst.msk [vmem:[#allocation2 + $0x3c0] sm:$0xff] %vm250_vm1, %v4859_v2  ;;  %v4862_v7 = vadd.f32 %v6827_v43, %v4661_v6  ;;  %4633 = vst.msk [vmem:[#allocation2 + $0x3f8] sm:$0xff] %vm250_vm1, %v4601_v3  ;;  %v4599_v46 = vadd.f32 %v4558_v56, %v4401_v8  ;;  %5457 = vrot.lane.b32.xlu1 %v5376_v4, %s6902_s9  ;;  %v5379_v1 = vadd.f32 %v8693_v9, %v5347_v15  ;;  %v4823_v32 = vpop.f32.mrf.mxu1 }
 0x2d5   : > { %v4659_v39 = vld [vmem:[#allocation2 + $0x3c8] sm:$0xff]  ;;  %v5350_v22 = vld [vmem:[#allocation2 + $0x3b8] sm:$0xff] }
 0x2d6   : > { %4894 = vst.msk [vmem:[#allocation2 + $0x3d8] sm:$0xff] %vm250_vm1, %v4862_v7  ;;  %v4860_v16 = vadd.f32 %v4807_v54, %v4659_v39  ;;  %4631 = vst.msk [vmem:[#allocation2 + $0x3e8] sm:$0xff] %vm250_vm1, %v4599_v46  ;;  %5467 = vrot.lane.b32.xlu0 %v5381_v11, %s6902_s9  ;;  %v5382_v34 = vadd.f32 %v8693_v9, %v5350_v22 }
 0x2d7   : > { %v4664_v20 = vld [vmem:[#allocation2 + $0x3f0] sm:$0xff]  ;;  %v5348_v44 = vld [vmem:[#allocation2 + $0x3a8] sm:$0xff] }
 0x2d8   : > { %4892 = vst.msk [vmem:[#allocation2 + $0x3c8] sm:$0xff] %vm250_vm1, %v4860_v16  ;;  %v4865_v21 = vadd.f32 %v6830_v12, %v4664_v20  ;;  %5469 = vrot.lane.b32.xlu1 %v5382_v34, %s6902_s9  ;;  %v5380_v41 = vadd.f32 %v8693_v9, %v5348_v44 }
 0x2d9   : > { %v4662_v23 = vld [vmem:[#allocation2 + $0x3e0] sm:$0xff]  ;;  %v5353_v24 = vld [vmem:[#allocation2 + $0x3d0] sm:$0xff] }
 0x2da   : > { %4897 = vst.msk [vmem:[#allocation2 + $0x3f0] sm:$0xff] %vm250_vm1, %v4865_v21  ;;  %v4863_v25 = vadd.f32 %v4820_v13, %v4662_v23  ;;  %5463 = vrot.lane.b32.xlu0 %v5379_v1, %s6902_s9  ;;  %v5385_v30 = vadd.f32 %v8693_v9, %v5353_v24 }
 0x2db   : > { %v4665_v27 = vld [vmem:[#allocation2 + $0x3f8] sm:$0xff]  ;;  %v5351_v48 = vld [vmem:[#allocation2 + $0x3c0] sm:$0xff] }
 0x2dc   : > { %4895 = vst.msk [vmem:[#allocation2 + $0x3e0] sm:$0xff] %vm250_vm1, %v4863_v25  ;;  %v4866_v35 = vadd.f32 %v6831_v10, %v4665_v27  ;;  %5465 = vrot.lane.b32.xlu1 %v5380_v41, %s6902_s9  ;;  %v5383_v61 = vadd.f32 %v8693_v9, %v5351_v48 }
 0x2dd   : > { %v4663_v31 = vld [vmem:[#allocation2 + $0x3e8] sm:$0xff]  ;;  %v5354_v33 = vld [vmem:[#allocation2 + $0x3d8] sm:$0xff] }
 0x2de   : > { %4898 = vst.msk [vmem:[#allocation2 + $0x3f8] sm:$0xff] %vm250_vm1, %v4866_v35  ;;  %v4864_v36 = vadd.f32 %v4823_v32, %v4663_v31  ;;  %v5106_v37 = vpop.permute.xlu1 %5105  ;;  %5475 = vrot.lane.b32.xlu0 %v5385_v30, %s6902_s9  ;;  %v5386_v38 = vadd.f32 %v8693_v9, %v5354_v33 }
 0x2df   : > { %5200 = vst.msk [vmem:[%s8087_s7 + $0x20] sm:$0xff] %vm5197_vm2, %v5106_v37  ;;  %v5352_v42 = vld [vmem:[#allocation2 + $0x3c8] sm:$0xff] }
 0x2e0   : > { %4896 = vst.msk [vmem:[#allocation2 + $0x3e8] sm:$0xff] %vm250_vm1, %v4864_v36  ;;  %v5102_v43 = vpop.permute.xlu0 %5101  ;;  %5477 = vrot.lane.b32.xlu1 %v5386_v38, %s6902_s9  ;;  %v5384_v53 = vadd.f32 %v8693_v9, %v5352_v42 }
 0x2e1   : > { %5198 = vst.msk [vmem:[%s8087_s7] sm:$0xff] %vm5197_vm2, %v5102_v43  ;;  %v5357_v50 = vld [vmem:[#allocation2 + $0x3f0] sm:$0xff] }
 0x2e2   : > { %v5108_v45 = vpop.permute.xlu1 %5107  ;;  %5471 = vrot.lane.b32.xlu0 %v5383_v61, %s6902_s9  ;;  %v5389_v54 = vadd.f32 %v8693_v9, %v5357_v50 }
 0x2e3   : > { %5201 = vst.msk [vmem:[%s8087_s7 + $0x28] sm:$0xff] %vm5197_vm2, %v5108_v45  ;;  %v5355_v19 = vld [vmem:[#allocation2 + $0x3e0] sm:$0xff] }
 0x2e4   : > { %v5104_v49 = vpop.permute.xlu0 %5103  ;;  %5473 = vrot.lane.b32.xlu1 %v5384_v53, %s6902_s9  ;;  %v5387_v40 = vadd.f32 %v8693_v9, %v5355_v19 }
 0x2e5   : > { %5199 = vst.msk [vmem:[%s8087_s7 + $0x8] sm:$0xff] %vm5197_vm2, %v5104_v49  ;;  %v5358_v55 = vld [vmem:[#allocation2 + $0x3f8] sm:$0xff] }
 0x2e6   : > { %5479 = vrot.lane.b32.xlu0 %v5387_v40, %s6902_s9  ;;  %v5390_v57 = vadd.f32 %v8693_v9, %v5358_v55 }
 0x2e7   : > { %v5356_v47 = vld [vmem:[#allocation2 + $0x3e8] sm:$0xff] }
 0x2e8   : > { %v5114_v51 = vpop.permute.xlu0 %5113  ;;  %v5388_v62 = vadd.f32 %v8693_v9, %v5356_v47 }
 0x2e9   : > { %5204 = vst.msk [vmem:[%s8087_s7 + $0x60] sm:$0xff] %vm5197_vm2, %v5114_v51 }
 0x2ea   : > { %v5116_v5 = vpop.permute.xlu1 %5115  ;;  %5483 = vrot.lane.b32.xlu0 %v5389_v54, %s6902_s9  ;;  %5481 = vrot.lane.b32.xlu1 %v5388_v62, %s6902_s9 }
 0x2eb   : > { %5205 = vst.msk [vmem:[%s8087_s7 + $0x68] sm:$0xff] %vm5197_vm2, %v5116_v5 }
 0x2ec   : > { %v5110_v52 = vpop.permute.xlu0 %5109 }
 0x2ed   : > { %5202 = vst.msk [vmem:[%s8087_s7 + $0x40] sm:$0xff] %vm5197_vm2, %v5110_v52 }
 0x2ee   : > { %v5112_v14 = vpop.permute.xlu1 %5111  ;;  %5485 = vrot.lane.b32.xlu1 %v5390_v57, %s6902_s9 }
 0x2ef   : > { %5203 = vst.msk [vmem:[%s8087_s7 + $0x48] sm:$0xff] %vm5197_vm2, %v5112_v14 }
 0x2f0   : > { %v5122_v28 = vpop.permute.xlu0 %5121 }
 0x2f1   : > { %5208 = vst.msk [vmem:[%s8087_s7 + $0xa0] sm:$0xff] %vm5197_vm2, %v5122_v28 }
 0x2f2   : > { %v5124_v58 = vpop.permute.xlu1 %5123 }
 0x2f3   : > { %5209 = vst.msk [vmem:[%s8087_s7 + $0xa8] sm:$0xff] %vm5197_vm2, %v5124_v58 }
 0x2f4   : > { %v5118_v26 = vpop.permute.xlu0 %5117 }
 0x2f5   : > { %5206 = vst.msk [vmem:[%s8087_s7 + $0x80] sm:$0xff] %vm5197_vm2, %v5118_v26 }
 0x2f6   : > { %v5120_v9 = vpop.permute.xlu1 %5119 }
 0x2f7   : > { %5207 = vst.msk [vmem:[%s8087_s7 + $0x88] sm:$0xff] %vm5197_vm2, %v5120_v9 }
 0x2f8   : > { %v5130_v59 = vpop.permute.xlu0 %5129 }
 0x2f9   : > { %5212 = vst.msk [vmem:[%s8087_s7 + $0xe0] sm:$0xff] %vm5197_vm2, %v5130_v59 }
 0x2fa   : > { %v5132_v17 = vpop.permute.xlu1 %5131 }
 0x2fb   : > { %5213 = vst.msk [vmem:[%s8087_s7 + $0xe8] sm:$0xff] %vm5197_vm2, %v5132_v17 }
 0x2fc   : > { %v5126_v60 = vpop.permute.xlu0 %5125 }
 0x2fd   : > { %5210 = vst.msk [vmem:[%s8087_s7 + $0xc0] sm:$0xff] %vm5197_vm2, %v5126_v60 }
 0x2fe   : > { %v5128_v18 = vpop.permute.xlu1 %5127 }
 0x2ff   : > { %5211 = vst.msk [vmem:[%s8087_s7 + $0xc8] sm:$0xff] %vm5197_vm2, %v5128_v18 }
 0x300   : > { %v5138_v63 = vpop.permute.xlu0 %5137 }
 0x301   : > { %5216 = vst.msk [vmem:[%s8087_s7 + $0x120] sm:$0xff] %vm5197_vm2, %v5138_v63 }
 0x302   : > { %v5140_v29 = vpop.permute.xlu1 %5139 }
 0x303   : > { %5217 = vst.msk [vmem:[%s8087_s7 + $0x128] sm:$0xff] %vm5197_vm2, %v5140_v29 }
 0x304   : > { %v5134_v12 = vpop.permute.xlu0 %5133 }
 0x305   : > { %5214 = vst.msk [vmem:[%s8087_s7 + $0x100] sm:$0xff] %vm5197_vm2, %v5134_v12 }
 0x306   : > { %v5136_v0 = vpop.permute.xlu1 %5135 }
 0x307   : > { %5215 = vst.msk [vmem:[%s8087_s7 + $0x108] sm:$0xff] %vm5197_vm2, %v5136_v0 }
 0x308   : > { %v5146_v2 = vpop.permute.xlu0 %5145 }
 0x309   : > { %5220 = vst.msk [vmem:[%s8087_s7 + $0x160] sm:$0xff] %vm5197_vm2, %v5146_v2 }
 0x30a   : > { %v5148_v3 = vpop.permute.xlu1 %5147 }
 0x30b   : > { %5221 = vst.msk [vmem:[%s8087_s7 + $0x168] sm:$0xff] %vm5197_vm2, %v5148_v3 }
 0x30c   : > { %v5142_v4 = vpop.permute.xlu0 %5141 }
 0x30d   : > { %5218 = vst.msk [vmem:[%s8087_s7 + $0x140] sm:$0xff] %vm5197_vm2, %v5142_v4 }
 0x30e   : > { %v5144_v6 = vpop.permute.xlu1 %5143 }
 0x30f   : > { %5219 = vst.msk [vmem:[%s8087_s7 + $0x148] sm:$0xff] %vm5197_vm2, %v5144_v6 }
 0x310   : > { %v5154_v8 = vpop.permute.xlu0 %5153 }
 0x311   : > { %5224 = vst.msk [vmem:[%s8087_s7 + $0x1a0] sm:$0xff] %vm5197_vm2, %v5154_v8 }
 0x312   : > { %v5156_v56 = vpop.permute.xlu1 %5155 }
 0x313   : > { %5225 = vst.msk [vmem:[%s8087_s7 + $0x1a8] sm:$0xff] %vm5197_vm2, %v5156_v56 }
 0x314   : > { %v5150_v7 = vpop.permute.xlu0 %5149 }
 0x315   : > { %5222 = vst.msk [vmem:[%s8087_s7 + $0x180] sm:$0xff] %vm5197_vm2, %v5150_v7 }
 0x316   : > { %v5152_v46 = vpop.permute.xlu1 %5151 }
 0x317   : > { %5223 = vst.msk [vmem:[%s8087_s7 + $0x188] sm:$0xff] %vm5197_vm2, %v5152_v46 }
 0x318   : > { %v5162_v11 = vpop.permute.xlu0 %5161 }
 0x319   : > { %5228 = vst.msk [vmem:[%s8087_s7 + $0x1e0] sm:$0xff] %vm5197_vm2, %v5162_v11 }
 0x31a   : > { %v5164_v39 = vpop.permute.xlu1 %5163 }
 0x31b   : > { %5229 = vst.msk [vmem:[%s8087_s7 + $0x1e8] sm:$0xff] %vm5197_vm2, %v5164_v39 }
 0x31c   : > { %v5158_v13 = vpop.permute.xlu0 %5157 }
 0x31d   : > { %5226 = vst.msk [vmem:[%s8087_s7 + $0x1c0] sm:$0xff] %vm5197_vm2, %v5158_v13 }
 0x31e   : > { %v5160_v22 = vpop.permute.xlu1 %5159 }
 0x31f   : > { %5227 = vst.msk [vmem:[%s8087_s7 + $0x1c8] sm:$0xff] %vm5197_vm2, %v5160_v22 }
 0x320   : > { %v5428_v15 = vpop.permute.xlu0 %5427 }
 0x321   : > { %5983 = vst.msk [vmem:[%s8087_s7 + $0x30] sm:$0xff] %vm5197_vm2, %v5428_v15 }
 0x322   : > { %v5430_v16 = vpop.permute.xlu1 %5429 }
 0x323   : > { %5984 = vst.msk [vmem:[%s8087_s7 + $0x38] sm:$0xff] %vm5197_vm2, %v5430_v16 }
 0x324   : > { %v5424_v34 = vpop.permute.xlu0 %5423 }
 0x325   : > { %5981 = vst.msk [vmem:[%s8087_s7 + $0x10] sm:$0xff] %vm5197_vm2, %v5424_v34 }
 0x326   : > { %v5426_v20 = vpop.permute.xlu1 %5425 }
 0x327   : > { %5982 = vst.msk [vmem:[%s8087_s7 + $0x18] sm:$0xff] %vm5197_vm2, %v5426_v20 }
 0x328   : > { %v5436_v44 = vpop.permute.xlu0 %5435 }
 0x329   : > { %5987 = vst.msk [vmem:[%s8087_s7 + $0x70] sm:$0xff] %vm5197_vm2, %v5436_v44 }
 0x32a   : > { %v5438_v21 = vpop.permute.xlu1 %5437 }
 0x32b   : > { %5988 = vst.msk [vmem:[%s8087_s7 + $0x78] sm:$0xff] %vm5197_vm2, %v5438_v21 }
 0x32c   : > { %v5432_v1 = vpop.permute.xlu0 %5431 }
 0x32d   : > { %5985 = vst.msk [vmem:[%s8087_s7 + $0x50] sm:$0xff] %vm5197_vm2, %v5432_v1 }
 0x32e   : > { %v5434_v23 = vpop.permute.xlu1 %5433 }
 0x32f   : > { %5986 = vst.msk [vmem:[%s8087_s7 + $0x58] sm:$0xff] %vm5197_vm2, %v5434_v23 }
 0x330   : > { %v5444_v10 = vpop.permute.xlu0 %5443 }
 0x331   : > { %5991 = vst.msk [vmem:[%s8087_s7 + $0xb0] sm:$0xff] %vm5197_vm2, %v5444_v10 }
 0x332   : > { %v5446_v24 = vpop.permute.xlu1 %5445 }
 0x333   : > { %5992 = vst.msk [vmem:[%s8087_s7 + $0xb8] sm:$0xff] %vm5197_vm2, %v5446_v24 }
 0x334   : > { %v5440_v25 = vpop.permute.xlu0 %5439 }
 0x335   : > { %5989 = vst.msk [vmem:[%s8087_s7 + $0x90] sm:$0xff] %vm5197_vm2, %v5440_v25 }
 0x336   : > { %v5442_v41 = vpop.permute.xlu1 %5441 }
 0x337   : > { %5990 = vst.msk [vmem:[%s8087_s7 + $0x98] sm:$0xff] %vm5197_vm2, %v5442_v41 }
 0x338   : > { %v5452_v27 = vpop.permute.xlu0 %5451 }
 0x339   : > { %5995 = vst.msk [vmem:[%s8087_s7 + $0xf0] sm:$0xff] %vm5197_vm2, %v5452_v27 }
 0x33a   : > { %v5454_v35 = vpop.permute.xlu1 %5453 }
 0x33b   : > { %5996 = vst.msk [vmem:[%s8087_s7 + $0xf8] sm:$0xff] %vm5197_vm2, %v5454_v35 }
 0x33c   : > { %v5448_v30 = vpop.permute.xlu0 %5447 }
 0x33d   : > { %5993 = vst.msk [vmem:[%s8087_s7 + $0xd0] sm:$0xff] %vm5197_vm2, %v5448_v30 }
 0x33e   : > { %v5450_v31 = vpop.permute.xlu1 %5449 }
 0x33f   : > { %5994 = vst.msk [vmem:[%s8087_s7 + $0xd8] sm:$0xff] %vm5197_vm2, %v5450_v31 }
 0x340   : > { %v5460_v32 = vpop.permute.xlu0 %5459 }
 0x341   : > { %5999 = vst.msk [vmem:[%s8087_s7 + $0x130] sm:$0xff] %vm5197_vm2, %v5460_v32 }
 0x342   : > { %v5462_v33 = vpop.permute.xlu1 %5461 }
 0x343   : > { %6000 = vst.msk [vmem:[%s8087_s7 + $0x138] sm:$0xff] %vm5197_vm2, %v5462_v33 }
 0x344   : > { %v5456_v48 = vpop.permute.xlu0 %5455 }
 0x345   : > { %5997 = vst.msk [vmem:[%s8087_s7 + $0x110] sm:$0xff] %vm5197_vm2, %v5456_v48 }
 0x346   : > { %v5458_v36 = vpop.permute.xlu1 %5457 }
 0x347   : > { %5998 = vst.msk [vmem:[%s8087_s7 + $0x118] sm:$0xff] %vm5197_vm2, %v5458_v36 }
 0x348   : > { %v5468_v37 = vpop.permute.xlu0 %5467 }
 0x349   : > { %6003 = vst.msk [vmem:[%s8087_s7 + $0x170] sm:$0xff] %vm5197_vm2, %v5468_v37 }
 0x34a   : > { %v5470_v38 = vpop.permute.xlu1 %5469 }
 0x34b   : > { %6004 = vst.msk [vmem:[%s8087_s7 + $0x178] sm:$0xff] %vm5197_vm2, %v5470_v38 }
 0x34c   : > { %v5464_v42 = vpop.permute.xlu0 %5463 }
 0x34d   : > { %6001 = vst.msk [vmem:[%s8087_s7 + $0x150] sm:$0xff] %vm5197_vm2, %v5464_v42 }
 0x34e   : > { %v5466_v43 = vpop.permute.xlu1 %5465 }
 0x34f   : > { %6002 = vst.msk [vmem:[%s8087_s7 + $0x158] sm:$0xff] %vm5197_vm2, %v5466_v43 }
 0x350   : > { %v5476_v61 = vpop.permute.xlu0 %5475 }
 0x351   : > { %6007 = vst.msk [vmem:[%s8087_s7 + $0x1b0] sm:$0xff] %vm5197_vm2, %v5476_v61 }
 0x352   : > { %v5478_v45 = vpop.permute.xlu1 %5477 }
 0x353   : > { %6008 = vst.msk [vmem:[%s8087_s7 + $0x1b8] sm:$0xff] %vm5197_vm2, %v5478_v45 }
 0x354   : > { %v5472_v53 = vpop.permute.xlu0 %5471 }
 0x355   : > { %6005 = vst.msk [vmem:[%s8087_s7 + $0x190] sm:$0xff] %vm5197_vm2, %v5472_v53 }
 0x356   : > { %v5474_v19 = vpop.permute.xlu1 %5473 }
 0x357   : > { %6006 = vst.msk [vmem:[%s8087_s7 + $0x198] sm:$0xff] %vm5197_vm2, %v5474_v19 }
 0x358   : > { %v5480_v49 = vpop.permute.xlu0 %5479 }
 0x359   : > { %6009 = vst.msk [vmem:[%s8087_s7 + $0x1d0] sm:$0xff] %vm5197_vm2, %v5480_v49 }
 0x35c   : > { %v5484_v40 = vpop.permute.xlu0 %5483  ;;  %v5482_v50 = vpop.permute.xlu1 %5481 }
 0x35d   : > { %6011 = vst.msk [vmem:[%s8087_s7 + $0x1f0] sm:$0xff] %vm5197_vm2, %v5484_v40  ;;  %6010 = vst.msk [vmem:[%s8087_s7 + $0x1d8] sm:$0xff] %vm5197_vm2, %v5482_v50 }
 0x360   : > { %v5486_v47 = vpop.permute.xlu1 %5485 }
 0x361   : > { %6012 = vst.msk [vmem:[%s8087_s7 + $0x1f8] sm:$0xff] %vm5197_vm2, %v5486_v47 }
 0x362 PF: > { %s13_s14 = sadd.s32 1, %s6899_s14   ;;  %s9027_s12 = smov %s6895_s13 }
 0x363   : > { %p10_p5 = scmp.ge.s32.totalorder %s13_s14, 4   ;;  %s9028_s13 = smov %s9030_s15 }
 0x365   :  { %12 = sbr.rel (!%p10_p5) target bundleno = 2 (0x2), region = 92 }

</bundles_post_ra>
